<compile_context>
chip_gen: v6e
topology: v6e:2x2x1
jax: 0.10.0
libtpu: 0.0.40
codegen_flags: <defaults>
</compile_context>

<pallas_src>
import functools

import jax
import jax.numpy as jnp
import numpy as np
from jax import lax
from jax.experimental import pallas as pl
from jax.experimental.pallas import tpu as pltpu


# -----------------------------------------------------------------------------
# Pallas kernel (one grid step processes Bt images, concatenated along lanes)
# -----------------------------------------------------------------------------
def _spatial_gate_kernel(x_ref, w1_ref, b1_ref, wd0_ref, bd0_ref, wd1_ref,
                         bd1_ref, wf_ref, bf_ref, o_ref, *, H, W, C, Cr, Bt,
                         dilation):
    d = dilation
    HW = H * W                      # (HW multiple of 128 -> unmasked lane stores)
    N = Bt * HW
    bf16 = jnp.bfloat16
    f32 = jnp.float32

    # --- lane-position masks, shared by both dilated convs -------------------
    idx = lax.broadcasted_iota(jnp.int32, (Cr, N), 1)
    pos = idx % HW                  # pixel index within its image
    wpos = idx % W                  # column index within its row
    h_first = pos < W
    h_last = pos >= HW - W
    w_first = wpos == 0
    w_last = wpos == W - 1

    # Clamped single-step shifts: a lane roll plus a boundary select.  The
    # select implements replicate padding (clamp) AND fixes roll wraparound,
    # including across image boundaries of the batched lane axis.
    def read_prev_row(a):           # out[h, w] = a[max(h - 1, 0), w]
        return jnp.where(h_first, a, pltpu.roll(a, W, 1))

    def read_next_row(a):           # out[h, w] = a[min(h + 1, H - 1), w]
        return jnp.where(h_last, a, pltpu.roll(a, N - W, 1))

    def read_prev_col(a):           # out[h, w] = a[h, max(w - 1, 0)]
        return jnp.where(w_first, a, pltpu.roll(a, 1, 1))

    def read_next_col(a):           # out[h, w] = a[h, min(w + 1, W - 1)]
        return jnp.where(w_last, a, pltpu.roll(a, N - 1, 1))

    def repeat(fn, a, n):
        for _ in range(n):
            a = fn(a)
        return a

    # --- gather the Bt images of this block into one lane-dense (C, N) slab --
    if Bt > 1:
        x = jnp.concatenate([x_ref[i].astype(bf16) for i in range(Bt)], axis=-1)
    else:
        x = x_ref[0].astype(bf16)

    # --- 1x1 reduce conv (BN folded) + ReLU ----------------------------------
    y = jnp.dot(w1_ref[...], x, preferred_element_type=f32)        # (Cr, N)
    y = jnp.maximum(y + b1_ref[...], 0.0)

    # --- two dilated 3x3 convs (replicate padding, BN folded) + ReLU ---------
    for wd_ref, bd_ref in ((wd0_ref, bd0_ref), (wd1_ref, bd1_ref)):
        # Row-shifted sources for kh = 0, 1, 2 (offsets -d, 0, +d).
        row_src = (repeat(read_prev_row, y, d),
                   y,
                   repeat(read_next_row, y, d))
        # Column shifts for kw = 0, 1, 2; taps stacked tap-major along sublanes
        # to match the (O, 3, 3, I) -> (O, 9*I) weight reshape in the wrapper.
        taps = []
        for src in row_src:
            taps.append(repeat(read_prev_col, src, d).astype(bf16))
            taps.append(src.astype(bf16))
            taps.append(repeat(read_next_col, src, d).astype(bf16))
        stacked = jnp.concatenate(taps, axis=0)                     # (9*Cr, N)

        # Single fused MXU matmul per dilated conv (latency-bound at M=Cr=4,
        # but still cheaper than 9 separate tiny matmuls).
        acc = jnp.dot(wd_ref[...], stacked, preferred_element_type=f32)
        y = jnp.maximum(acc + bd_ref[...], 0.0)                     # (Cr, N)

    # --- final 1x1 conv to a single channel: tiny K=Cr reduce on the VPU -----
    s = jnp.sum(y * wf_ref[...], axis=0, keepdims=True) + bf_ref[...]   # (1, N)

    # --- expand_as over channels -> lane-dense (C, HW) stores, one per image -
    for i in range(Bt):
        o_ref[i] = jnp.broadcast_to(s[:, i * HW:(i + 1) * HW],
                                    (C, HW)).astype(o_ref.dtype)


# -----------------------------------------------------------------------------
# Wrapper (no layout transposes: NCHW is only reshaped to (B, C, H*W))
# -----------------------------------------------------------------------------
def _pick_block_batch(B, max_bt=8):
    """Largest divisor of B (<= max_bt) that still leaves >= 2 grid steps."""
    best = 1
    for bt in range(1, min(B, max_bt) + 1):
        if B % bt == 0 and B // bt >= 2:
            best = bt
    return best


def spatial_gate_pallas(x_nchw, p, *, dilation_val=4, block_batch=None):
    B, C, H, W = x_nchw.shape
    Cr = p['w1'].shape[0]
    HW = H * W
    bf16 = jnp.bfloat16

    Bt = _pick_block_batch(B) if block_batch is None else block_batch
    assert B % Bt == 0

    # Matmul-ready parameter layouts (BN already folded into w/b in make_params).
    # Matmul weights pre-cast to bf16: smaller resident blocks, no in-kernel casts.
    w1_k = p['w1'][:, :, 0, 0].astype(bf16)                           # (Cr, C)
    b1_k = p['b1'].reshape(Cr, 1)
    # (O, I, 3, 3) -> (O, 3, 3, I) -> (O, 9*I); K index = (kh*3+kw)*Cr + ci,
    # matching the tap stacking order inside the kernel.
    wd0_k = jnp.transpose(p['wd0'], (0, 2, 3, 1)).reshape(Cr, 9 * Cr).astype(bf16)
    bd0_k = p['bd0'].reshape(Cr, 1)
    wd1_k = jnp.transpose(p['wd1'], (0, 2, 3, 1)).reshape(Cr, 9 * Cr).astype(bf16)
    bd1_k = p['bd1'].reshape(Cr, 1)
    wf_k = p['wf'].reshape(Cr, 1)
    bf_k = p['bf'].reshape(1, 1)

    # NCHW -> (B, C, H*W): a free reshape (no transpose); H*W lands on lanes.
    x_flat = x_nchw.reshape(B, C, HW)

    kernel = functools.partial(_spatial_gate_kernel, H=H, W=W, C=C, Cr=Cr,
                               Bt=Bt, dilation=dilation_val)

    out_flat = pl.pallas_call(
        kernel,
        out_shape=jax.ShapeDtypeStruct((B, C, HW), x_nchw.dtype),
        grid_spec=pltpu.PrefetchScalarGridSpec(
            num_scalar_prefetch=0,
            grid=(B // Bt,),
            in_specs=[
                pl.BlockSpec((Bt, C, HW), lambda b: (b, 0, 0)),
                pl.BlockSpec((Cr, C), lambda b: (0, 0)),
                pl.BlockSpec((Cr, 1), lambda b: (0, 0)),
                pl.BlockSpec((Cr, 9 * Cr), lambda b: (0, 0)),
                pl.BlockSpec((Cr, 1), lambda b: (0, 0)),
                pl.BlockSpec((Cr, 9 * Cr), lambda b: (0, 0)),
                pl.BlockSpec((Cr, 1), lambda b: (0, 0)),
                pl.BlockSpec((Cr, 1), lambda b: (0, 0)),
                pl.BlockSpec((1, 1), lambda b: (0, 0)),
            ],
            out_specs=pl.BlockSpec((Bt, C, HW), lambda b: (b, 0, 0)),
        ),
        compiler_params=pltpu.CompilerParams(dimension_semantics=("parallel",)),
    )(x_flat, w1_k, b1_k, wd0_k, bd0_k, wd1_k, bd1_k, wf_k, bf_k)

    return out_flat.reshape(B, C, H, W)


# -----------------------------------------------------------------------------
# Deterministic parameter construction (BN folded into conv weights, eval mode)
# -----------------------------------------------------------------------------
def make_params(key, gate_channel, reduction_ratio=16, dilation_conv_num=2):
    assert dilation_conv_num == 2  # matches the default module structure handled here
    C = gate_channel
    Cr = gate_channel // reduction_ratio
    eps = 1e-5
    keys = iter(jax.random.split(key, 64))

    def conv_w(shape, fan_in):
        return jax.random.normal(next(keys), shape, jnp.float32) / np.sqrt(fan_in)

    def conv_b(c):
        return 0.05 * jax.random.normal(next(keys), (c,), jnp.float32)

    def bn(c):
        gamma = 1.0 + 0.1 * jax.random.normal(next(keys), (c,), jnp.float32)
        beta = 0.1 * jax.random.normal(next(keys), (c,), jnp.float32)
        mean = 0.1 * jax.random.normal(next(keys), (c,), jnp.float32)
        var = 0.5 + jax.random.uniform(next(keys), (c,), jnp.float32)
        return gamma, beta, mean, var

    def fold(w_oihw, b, gamma, beta, mean, var):
        scale = gamma / jnp.sqrt(var + eps)
        return w_oihw * scale[:, None, None, None], (b - mean) * scale + beta

    w1, b1 = fold(conv_w((Cr, C, 1, 1), C), conv_b(Cr), *bn(Cr))
    wd0, bd0 = fold(conv_w((Cr, Cr, 3, 3), Cr * 9), conv_b(Cr), *bn(Cr))
    wd1, bd1 = fold(conv_w((Cr, Cr, 3, 3), Cr * 9), conv_b(Cr), *bn(Cr))
    wf = conv_w((1, Cr, 1, 1), Cr)
    bf = conv_b(1)

    return dict(w1=w1, b1=b1, wd0=wd0, bd0=bd0, wd1=wd1, bd1=bd1, wf=wf, bf=bf)


# -----------------------------------------------------------------------------
# Matched-precision pure-JAX reference (bf16 matmul inputs, f32 accumulate),
# used only for the correctness check.
# -----------------------------------------------------------------------------
def spatial_gate_reference(x, p, *, dilation_val=4):
    bf16, f32 = jnp.bfloat16, jnp.float32
    pad = dilation_val
    y = jnp.einsum('oc,bchw->bohw', p['w1'][:, :, 0, 0].astype(bf16),
                   x.astype(bf16), preferred_element_type=f32)
    y = jnp.maximum(y + p['b1'][None, :, None, None], 0.0)
    for w, b in ((p['wd0'], p['bd0']), (p['wd1'], p['bd1'])):
        yp = jnp.pad(y, ((0, 0), (0, 0), (pad, pad), (pad, pad)), mode='edge')
        y = jax.lax.conv_general_dilated(
            yp.astype(bf16), w.astype(bf16), window_strides=(1, 1), padding='VALID',
            rhs_dilation=(dilation_val, dilation_val),
            dimension_numbers=('NCHW', 'OIHW', 'NCHW'),
            preferred_element_type=f32)
        y = jnp.maximum(y + b[None, :, None, None], 0.0)
    s = jnp.einsum('oc,bchw->bohw', p['wf'][:, :, 0, 0], y,
                   precision=jax.lax.Precision.HIGHEST)
    s = s + p['bf'][None, :, None, None]
    return jnp.broadcast_to(s, x.shape)


if __name__ == "__main__":
    key = jax.random.PRNGKey(0)
    kx, kp = jax.random.split(key)

    # gate_channel=64, reduction_ratio=16 -> Cr=4; B=4 -> Bt=2, grid=(2,)
    B, C, H, W = 4, 64, 16, 16
    x = jax.random.normal(kx, (B, C, H, W), jnp.float32)
    params = make_params(kp, gate_channel=C, reduction_ratio=16)

    out = spatial_gate_pallas(x, params)
    out = jax.block_until_ready(out)

    ref = spatial_gate_reference(x, params)
    assert out.shape == x.shape
    # Tolerance reflects bf16-input / f32-accumulate matmuls on both sides.
    np.testing.assert_allclose(np.asarray(out), np.asarray(ref), rtol=2e-2, atol=2e-2)

    print("KERNEL_OK")
</pallas_src>

<mosaic_0001>
module attributes {stable_mosaic.version = 11 : i64} {
  func.func @_spatial_gate_kernel(%arg0: i32, %arg1: memref<2x64x256xf32, #tpu.memory_space<vmem>>, %arg2: memref<4x64xbf16, #tpu.memory_space<vmem>>, %arg3: memref<4x1xf32, #tpu.memory_space<vmem>>, %arg4: memref<4x36xbf16, #tpu.memory_space<vmem>>, %arg5: memref<4x1xf32, #tpu.memory_space<vmem>>, %arg6: memref<4x36xbf16, #tpu.memory_space<vmem>>, %arg7: memref<4x1xf32, #tpu.memory_space<vmem>>, %arg8: memref<4x1xf32, #tpu.memory_space<vmem>>, %arg9: memref<1x1xf32, #tpu.memory_space<vmem>>, %arg10: memref<2x64x256xf32, #tpu.memory_space<vmem>>) attributes {dimension_semantics = [#tpu.dimension_semantics<parallel>], iteration_bounds = array<i64: 2>, scalar_prefetch = 0 : i64, scratch_operands = 0 : i64, tpu.core_type = #tpu.core_type<tc>, window_params = [{transform_indices = @transform_0, window_bounds = array<i64: 2, 64, 256>}, {pipeline_mode = #tpu.pipeline_mode<synchronous>, transform_indices = @transform_1, window_bounds = array<i64: 4, 64>}, {pipeline_mode = #tpu.pipeline_mode<synchronous>, transform_indices = @transform_2, window_bounds = array<i64: 4, 1>}, {pipeline_mode = #tpu.pipeline_mode<synchronous>, transform_indices = @transform_3, window_bounds = array<i64: 4, 36>}, {pipeline_mode = #tpu.pipeline_mode<synchronous>, transform_indices = @transform_4, window_bounds = array<i64: 4, 1>}, {pipeline_mode = #tpu.pipeline_mode<synchronous>, transform_indices = @transform_5, window_bounds = array<i64: 4, 36>}, {pipeline_mode = #tpu.pipeline_mode<synchronous>, transform_indices = @transform_6, window_bounds = array<i64: 4, 1>}, {pipeline_mode = #tpu.pipeline_mode<synchronous>, transform_indices = @transform_7, window_bounds = array<i64: 4, 1>}, {pipeline_mode = #tpu.pipeline_mode<synchronous>, transform_indices = @transform_8, window_bounds = array<i64: 1, 1>}, {transform_indices = @transform_9, window_bounds = array<i64: 2, 64, 256>}]} {
    %0 = tpu.iota {dimensions = array<i32: 1>} : vector<4x512xi32>
    %c256_i32 = arith.constant 256 : i32
    %c0_i32 = arith.constant 0 : i32
    %1 = arith.cmpi eq, %c256_i32, %c0_i32 : i32
    %c1_i32 = arith.constant 1 : i32
    %2 = arith.select %1, %c1_i32, %c256_i32 : i32
    %3 = vector.broadcast %2 : i32 to vector<4x512xi32>
    %4 = arith.remsi %0, %3 : vector<4x512xi32>
    %c0_i32_0 = arith.constant 0 : i32
    %5 = vector.broadcast %c0_i32_0 : i32 to vector<4x512xi32>
    %6 = arith.cmpi ne, %4, %5 : vector<4x512xi32>
    %c0_i32_1 = arith.constant 0 : i32
    %7 = vector.broadcast %c0_i32_1 : i32 to vector<4x512xi32>
    %8 = arith.cmpi slt, %4, %7 : vector<4x512xi32>
    %c0_i32_2 = arith.constant 0 : i32
    %9 = arith.cmpi slt, %2, %c0_i32_2 : i32
    %10 = vector.broadcast %9 : i1 to vector<4x512xi1>
    %11 = vector.broadcast %10 : vector<4x512xi1> to vector<4x512xi1>
    %12 = arith.xori %8, %11 : vector<4x512xi1>
    %13 = arith.andi %12, %6 : vector<4x512xi1>
    %14 = vector.broadcast %2 : i32 to vector<4x512xi32>
    %15 = arith.addi %4, %14 : vector<4x512xi32>
    %16 = arith.select %13, %15, %4 : vector<4x512xi1>, vector<4x512xi32>
    %c16_i32 = arith.constant 16 : i32
    %c0_i32_3 = arith.constant 0 : i32
    %17 = arith.cmpi eq, %c16_i32, %c0_i32_3 : i32
    %c1_i32_4 = arith.constant 1 : i32
    %18 = arith.select %17, %c1_i32_4, %c16_i32 : i32
    %19 = vector.broadcast %18 : i32 to vector<4x512xi32>
    %20 = arith.remsi %0, %19 : vector<4x512xi32>
    %c0_i32_5 = arith.constant 0 : i32
    %21 = vector.broadcast %c0_i32_5 : i32 to vector<4x512xi32>
    %22 = arith.cmpi ne, %20, %21 : vector<4x512xi32>
    %c0_i32_6 = arith.constant 0 : i32
    %23 = vector.broadcast %c0_i32_6 : i32 to vector<4x512xi32>
    %24 = arith.cmpi slt, %20, %23 : vector<4x512xi32>
    %c0_i32_7 = arith.constant 0 : i32
    %25 = arith.cmpi slt, %18, %c0_i32_7 : i32
    %26 = vector.broadcast %25 : i1 to vector<4x512xi1>
    %27 = vector.broadcast %26 : vector<4x512xi1> to vector<4x512xi1>
    %28 = arith.xori %24, %27 : vector<4x512xi1>
    %29 = arith.andi %28, %22 : vector<4x512xi1>
    %30 = vector.broadcast %18 : i32 to vector<4x512xi32>
    %31 = arith.addi %20, %30 : vector<4x512xi32>
    %32 = arith.select %29, %31, %20 : vector<4x512xi1>, vector<4x512xi32>
    %c16_i32_8 = arith.constant 16 : i32
    %33 = vector.broadcast %c16_i32_8 : i32 to vector<4x512xi32>
    %34 = arith.cmpi slt, %16, %33 : vector<4x512xi32>
    %c240_i32 = arith.constant 240 : i32
    %35 = vector.broadcast %c240_i32 : i32 to vector<4x512xi32>
    %36 = arith.cmpi sge, %16, %35 : vector<4x512xi32>
    %c0_i32_9 = arith.constant 0 : i32
    %37 = vector.broadcast %c0_i32_9 : i32 to vector<4x512xi32>
    %38 = arith.cmpi eq, %32, %37 : vector<4x512xi32>
    %c15_i32 = arith.constant 15 : i32
    %39 = vector.broadcast %c15_i32 : i32 to vector<4x512xi32>
    %40 = arith.cmpi eq, %32, %39 : vector<4x512xi32>
    %c0 = arith.constant 0 : index
    %c0_10 = arith.constant 0 : index
    %c0_11 = arith.constant 0 : index
    %41 = vector.load %arg1[%c0, %c0_10, %c0_11] : memref<2x64x256xf32, #tpu.memory_space<vmem>>, vector<1x64x256xf32>
    %42 = vector.shape_cast %41 : vector<1x64x256xf32> to vector<64x256xf32>
    %43 = arith.truncf %42 : vector<64x256xf32> to vector<64x256xbf16>
    %c1 = arith.constant 1 : index
    %c0_12 = arith.constant 0 : index
    %c0_13 = arith.constant 0 : index
    %44 = vector.load %arg1[%c1, %c0_12, %c0_13] : memref<2x64x256xf32, #tpu.memory_space<vmem>>, vector<1x64x256xf32>
    %45 = vector.shape_cast %44 : vector<1x64x256xf32> to vector<64x256xf32>
    %46 = arith.truncf %45 : vector<64x256xf32> to vector<64x256xbf16>
    %47 = tpu.concatenate %43, %46 in 1 : vector<64x256xbf16>, vector<64x256xbf16> -> vector<64x512xbf16>
    %c0_14 = arith.constant 0 : index
    %c0_15 = arith.constant 0 : index
    %48 = vector.load %arg2[%c0_14, %c0_15] : memref<4x64xbf16, #tpu.memory_space<vmem>>, vector<4x64xbf16>
    %cst = arith.constant dense<0.000000e+00> : vector<4x512xf32>
    %49 = tpu.matmul %48, %47, %cst {dimension_numbers = #tpu.dot_dimension_numbers<[1], [0], [0], [1], [0, 0, 1, 1], [], []>} : vector<4x64xbf16>, vector<64x512xbf16>, vector<4x512xf32> -> vector<4x512xf32>
    %c0_16 = arith.constant 0 : index
    %c0_17 = arith.constant 0 : index
    %50 = vector.load %arg3[%c0_16, %c0_17] : memref<4x1xf32, #tpu.memory_space<vmem>>, vector<4x1xf32>
    %51 = vector.broadcast %50 : vector<4x1xf32> to vector<4x512xf32>
    %52 = arith.addf %49, %51 : vector<4x512xf32>
    %cst_18 = arith.constant 0.000000e+00 : f32
    %53 = vector.broadcast %cst_18 : f32 to vector<4x512xf32>
    %54 = arith.maximumf %52, %53 : vector<4x512xf32>
    %c16_i32_19 = arith.constant 16 : i32
    %55 = tpu.dynamic_rotate %54 by %c16_i32_19 dim 1 : vector<4x512xf32>, i32 -> vector<4x512xf32>
    %56 = arith.select %34, %54, %55 : vector<4x512xi1>, vector<4x512xf32>
    %c16_i32_20 = arith.constant 16 : i32
    %57 = tpu.dynamic_rotate %56 by %c16_i32_20 dim 1 : vector<4x512xf32>, i32 -> vector<4x512xf32>
    %58 = arith.select %34, %56, %57 : vector<4x512xi1>, vector<4x512xf32>
    %c16_i32_21 = arith.constant 16 : i32
    %59 = tpu.dynamic_rotate %58 by %c16_i32_21 dim 1 : vector<4x512xf32>, i32 -> vector<4x512xf32>
    %60 = arith.select %34, %58, %59 : vector<4x512xi1>, vector<4x512xf32>
    %c16_i32_22 = arith.constant 16 : i32
    %61 = tpu.dynamic_rotate %60 by %c16_i32_22 dim 1 : vector<4x512xf32>, i32 -> vector<4x512xf32>
    %62 = arith.select %34, %60, %61 : vector<4x512xi1>, vector<4x512xf32>
    %c496_i32 = arith.constant 496 : i32
    %63 = tpu.dynamic_rotate %54 by %c496_i32 dim 1 : vector<4x512xf32>, i32 -> vector<4x512xf32>
    %64 = arith.select %36, %54, %63 : vector<4x512xi1>, vector<4x512xf32>
    %c496_i32_23 = arith.constant 496 : i32
    %65 = tpu.dynamic_rotate %64 by %c496_i32_23 dim 1 : vector<4x512xf32>, i32 -> vector<4x512xf32>
    %66 = arith.select %36, %64, %65 : vector<4x512xi1>, vector<4x512xf32>
    %c496_i32_24 = arith.constant 496 : i32
    %67 = tpu.dynamic_rotate %66 by %c496_i32_24 dim 1 : vector<4x512xf32>, i32 -> vector<4x512xf32>
    %68 = arith.select %36, %66, %67 : vector<4x512xi1>, vector<4x512xf32>
    %c496_i32_25 = arith.constant 496 : i32
    %69 = tpu.dynamic_rotate %68 by %c496_i32_25 dim 1 : vector<4x512xf32>, i32 -> vector<4x512xf32>
    %70 = arith.select %36, %68, %69 : vector<4x512xi1>, vector<4x512xf32>
    %c1_i32_26 = arith.constant 1 : i32
    %71 = tpu.dynamic_rotate %62 by %c1_i32_26 dim 1 : vector<4x512xf32>, i32 -> vector<4x512xf32>
    %72 = arith.select %38, %62, %71 : vector<4x512xi1>, vector<4x512xf32>
    %c1_i32_27 = arith.constant 1 : i32
    %73 = tpu.dynamic_rotate %72 by %c1_i32_27 dim 1 : vector<4x512xf32>, i32 -> vector<4x512xf32>
    %74 = arith.select %38, %72, %73 : vector<4x512xi1>, vector<4x512xf32>
    %c1_i32_28 = arith.constant 1 : i32
    %75 = tpu.dynamic_rotate %74 by %c1_i32_28 dim 1 : vector<4x512xf32>, i32 -> vector<4x512xf32>
    %76 = arith.select %38, %74, %75 : vector<4x512xi1>, vector<4x512xf32>
    %c1_i32_29 = arith.constant 1 : i32
    %77 = tpu.dynamic_rotate %76 by %c1_i32_29 dim 1 : vector<4x512xf32>, i32 -> vector<4x512xf32>
    %78 = arith.select %38, %76, %77 : vector<4x512xi1>, vector<4x512xf32>
    %79 = arith.truncf %78 : vector<4x512xf32> to vector<4x512xbf16>
    %80 = arith.truncf %62 : vector<4x512xf32> to vector<4x512xbf16>
    %c511_i32 = arith.constant 511 : i32
    %81 = tpu.dynamic_rotate %62 by %c511_i32 dim 1 : vector<4x512xf32>, i32 -> vector<4x512xf32>
    %82 = arith.select %40, %62, %81 : vector<4x512xi1>, vector<4x512xf32>
    %c511_i32_30 = arith.constant 511 : i32
    %83 = tpu.dynamic_rotate %82 by %c511_i32_30 dim 1 : vector<4x512xf32>, i32 -> vector<4x512xf32>
    %84 = arith.select %40, %82, %83 : vector<4x512xi1>, vector<4x512xf32>
    %c511_i32_31 = arith.constant 511 : i32
    %85 = tpu.dynamic_rotate %84 by %c511_i32_31 dim 1 : vector<4x512xf32>, i32 -> vector<4x512xf32>
    %86 = arith.select %40, %84, %85 : vector<4x512xi1>, vector<4x512xf32>
    %c511_i32_32 = arith.constant 511 : i32
    %87 = tpu.dynamic_rotate %86 by %c511_i32_32 dim 1 : vector<4x512xf32>, i32 -> vector<4x512xf32>
    %88 = arith.select %40, %86, %87 : vector<4x512xi1>, vector<4x512xf32>
    %89 = arith.truncf %88 : vector<4x512xf32> to vector<4x512xbf16>
    %c1_i32_33 = arith.constant 1 : i32
    %90 = tpu.dynamic_rotate %54 by %c1_i32_33 dim 1 : vector<4x512xf32>, i32 -> vector<4x512xf32>
    %91 = arith.select %38, %54, %90 : vector<4x512xi1>, vector<4x512xf32>
    %c1_i32_34 = arith.constant 1 : i32
    %92 = tpu.dynamic_rotate %91 by %c1_i32_34 dim 1 : vector<4x512xf32>, i32 -> vector<4x512xf32>
    %93 = arith.select %38, %91, %92 : vector<4x512xi1>, vector<4x512xf32>
    %c1_i32_35 = arith.constant 1 : i32
    %94 = tpu.dynamic_rotate %93 by %c1_i32_35 dim 1 : vector<4x512xf32>, i32 -> vector<4x512xf32>
    %95 = arith.select %38, %93, %94 : vector<4x512xi1>, vector<4x512xf32>
    %c1_i32_36 = arith.constant 1 : i32
    %96 = tpu.dynamic_rotate %95 by %c1_i32_36 dim 1 : vector<4x512xf32>, i32 -> vector<4x512xf32>
    %97 = arith.select %38, %95, %96 : vector<4x512xi1>, vector<4x512xf32>
    %98 = arith.truncf %97 : vector<4x512xf32> to vector<4x512xbf16>
    %99 = arith.truncf %54 : vector<4x512xf32> to vector<4x512xbf16>
    %c511_i32_37 = arith.constant 511 : i32
    %100 = tpu.dynamic_rotate %54 by %c511_i32_37 dim 1 : vector<4x512xf32>, i32 -> vector<4x512xf32>
    %101 = arith.select %40, %54, %100 : vector<4x512xi1>, vector<4x512xf32>
    %c511_i32_38 = arith.constant 511 : i32
    %102 = tpu.dynamic_rotate %101 by %c511_i32_38 dim 1 : vector<4x512xf32>, i32 -> vector<4x512xf32>
    %103 = arith.select %40, %101, %102 : vector<4x512xi1>, vector<4x512xf32>
    %c511_i32_39 = arith.constant 511 : i32
    %104 = tpu.dynamic_rotate %103 by %c511_i32_39 dim 1 : vector<4x512xf32>, i32 -> vector<4x512xf32>
    %105 = arith.select %40, %103, %104 : vector<4x512xi1>, vector<4x512xf32>
    %c511_i32_40 = arith.constant 511 : i32
    %106 = tpu.dynamic_rotate %105 by %c511_i32_40 dim 1 : vector<4x512xf32>, i32 -> vector<4x512xf32>
    %107 = arith.select %40, %105, %106 : vector<4x512xi1>, vector<4x512xf32>
    %108 = arith.truncf %107 : vector<4x512xf32> to vector<4x512xbf16>
    %c1_i32_41 = arith.constant 1 : i32
    %109 = tpu.dynamic_rotate %70 by %c1_i32_41 dim 1 : vector<4x512xf32>, i32 -> vector<4x512xf32>
    %110 = arith.select %38, %70, %109 : vector<4x512xi1>, vector<4x512xf32>
    %c1_i32_42 = arith.constant 1 : i32
    %111 = tpu.dynamic_rotate %110 by %c1_i32_42 dim 1 : vector<4x512xf32>, i32 -> vector<4x512xf32>
    %112 = arith.select %38, %110, %111 : vector<4x512xi1>, vector<4x512xf32>
    %c1_i32_43 = arith.constant 1 : i32
    %113 = tpu.dynamic_rotate %112 by %c1_i32_43 dim 1 : vector<4x512xf32>, i32 -> vector<4x512xf32>
    %114 = arith.select %38, %112, %113 : vector<4x512xi1>, vector<4x512xf32>
    %c1_i32_44 = arith.constant 1 : i32
    %115 = tpu.dynamic_rotate %114 by %c1_i32_44 dim 1 : vector<4x512xf32>, i32 -> vector<4x512xf32>
    %116 = arith.select %38, %114, %115 : vector<4x512xi1>, vector<4x512xf32>
    %117 = arith.truncf %116 : vector<4x512xf32> to vector<4x512xbf16>
    %118 = arith.truncf %70 : vector<4x512xf32> to vector<4x512xbf16>
    %c511_i32_45 = arith.constant 511 : i32
    %119 = tpu.dynamic_rotate %70 by %c511_i32_45 dim 1 : vector<4x512xf32>, i32 -> vector<4x512xf32>
    %120 = arith.select %40, %70, %119 : vector<4x512xi1>, vector<4x512xf32>
    %c511_i32_46 = arith.constant 511 : i32
    %121 = tpu.dynamic_rotate %120 by %c511_i32_46 dim 1 : vector<4x512xf32>, i32 -> vector<4x512xf32>
    %122 = arith.select %40, %120, %121 : vector<4x512xi1>, vector<4x512xf32>
    %c511_i32_47 = arith.constant 511 : i32
    %123 = tpu.dynamic_rotate %122 by %c511_i32_47 dim 1 : vector<4x512xf32>, i32 -> vector<4x512xf32>
    %124 = arith.select %40, %122, %123 : vector<4x512xi1>, vector<4x512xf32>
    %c511_i32_48 = arith.constant 511 : i32
    %125 = tpu.dynamic_rotate %124 by %c511_i32_48 dim 1 : vector<4x512xf32>, i32 -> vector<4x512xf32>
    %126 = arith.select %40, %124, %125 : vector<4x512xi1>, vector<4x512xf32>
    %127 = arith.truncf %126 : vector<4x512xf32> to vector<4x512xbf16>
    %128 = tpu.concatenate %79, %80, %89, %98, %99, %108, %117, %118, %127 in 0 : vector<4x512xbf16>, vector<4x512xbf16>, vector<4x512xbf16>, vector<4x512xbf16>, vector<4x512xbf16>, vector<4x512xbf16>, vector<4x512xbf16>, vector<4x512xbf16>, vector<4x512xbf16> -> vector<36x512xbf16>
    %c0_49 = arith.constant 0 : index
    %c0_50 = arith.constant 0 : index
    %129 = vector.load %arg4[%c0_49, %c0_50] : memref<4x36xbf16, #tpu.memory_space<vmem>>, vector<4x36xbf16>
    %cst_51 = arith.constant dense<0.000000e+00> : vector<4x512xf32>
    %130 = tpu.matmul %129, %128, %cst_51 {dimension_numbers = #tpu.dot_dimension_numbers<[1], [0], [0], [1], [0, 0, 1, 1], [], []>} : vector<4x36xbf16>, vector<36x512xbf16>, vector<4x512xf32> -> vector<4x512xf32>
    %c0_52 = arith.constant 0 : index
    %c0_53 = arith.constant 0 : index
    %131 = vector.load %arg5[%c0_52, %c0_53] : memref<4x1xf32, #tpu.memory_space<vmem>>, vector<4x1xf32>
    %132 = vector.broadcast %131 : vector<4x1xf32> to vector<4x512xf32>
    %133 = arith.addf %130, %132 : vector<4x512xf32>
    %cst_54 = arith.constant 0.000000e+00 : f32
    %134 = vector.broadcast %cst_54 : f32 to vector<4x512xf32>
    %135 = arith.maximumf %133, %134 : vector<4x512xf32>
    %c16_i32_55 = arith.constant 16 : i32
    %136 = tpu.dynamic_rotate %135 by %c16_i32_55 dim 1 : vector<4x512xf32>, i32 -> vector<4x512xf32>
    %137 = arith.select %34, %135, %136 : vector<4x512xi1>, vector<4x512xf32>
    %c16_i32_56 = arith.constant 16 : i32
    %138 = tpu.dynamic_rotate %137 by %c16_i32_56 dim 1 : vector<4x512xf32>, i32 -> vector<4x512xf32>
    %139 = arith.select %34, %137, %138 : vector<4x512xi1>, vector<4x512xf32>
    %c16_i32_57 = arith.constant 16 : i32
    %140 = tpu.dynamic_rotate %139 by %c16_i32_57 dim 1 : vector<4x512xf32>, i32 -> vector<4x512xf32>
    %141 = arith.select %34, %139, %140 : vector<4x512xi1>, vector<4x512xf32>
    %c16_i32_58 = arith.constant 16 : i32
    %142 = tpu.dynamic_rotate %141 by %c16_i32_58 dim 1 : vector<4x512xf32>, i32 -> vector<4x512xf32>
    %143 = arith.select %34, %141, %142 : vector<4x512xi1>, vector<4x512xf32>
    %c496_i32_59 = arith.constant 496 : i32
    %144 = tpu.dynamic_rotate %135 by %c496_i32_59 dim 1 : vector<4x512xf32>, i32 -> vector<4x512xf32>
    %145 = arith.select %36, %135, %144 : vector<4x512xi1>, vector<4x512xf32>
    %c496_i32_60 = arith.constant 496 : i32
    %146 = tpu.dynamic_rotate %145 by %c496_i32_60 dim 1 : vector<4x512xf32>, i32 -> vector<4x512xf32>
    %147 = arith.select %36, %145, %146 : vector<4x512xi1>, vector<4x512xf32>
    %c496_i32_61 = arith.constant 496 : i32
    %148 = tpu.dynamic_rotate %147 by %c496_i32_61 dim 1 : vector<4x512xf32>, i32 -> vector<4x512xf32>
    %149 = arith.select %36, %147, %148 : vector<4x512xi1>, vector<4x512xf32>
    %c496_i32_62 = arith.constant 496 : i32
    %150 = tpu.dynamic_rotate %149 by %c496_i32_62 dim 1 : vector<4x512xf32>, i32 -> vector<4x512xf32>
    %151 = arith.select %36, %149, %150 : vector<4x512xi1>, vector<4x512xf32>
    %c1_i32_63 = arith.constant 1 : i32
    %152 = tpu.dynamic_rotate %143 by %c1_i32_63 dim 1 : vector<4x512xf32>, i32 -> vector<4x512xf32>
    %153 = arith.select %38, %143, %152 : vector<4x512xi1>, vector<4x512xf32>
    %c1_i32_64 = arith.constant 1 : i32
    %154 = tpu.dynamic_rotate %153 by %c1_i32_64 dim 1 : vector<4x512xf32>, i32 -> vector<4x512xf32>
    %155 = arith.select %38, %153, %154 : vector<4x512xi1>, vector<4x512xf32>
    %c1_i32_65 = arith.constant 1 : i32
    %156 = tpu.dynamic_rotate %155 by %c1_i32_65 dim 1 : vector<4x512xf32>, i32 -> vector<4x512xf32>
    %157 = arith.select %38, %155, %156 : vector<4x512xi1>, vector<4x512xf32>
    %c1_i32_66 = arith.constant 1 : i32
    %158 = tpu.dynamic_rotate %157 by %c1_i32_66 dim 1 : vector<4x512xf32>, i32 -> vector<4x512xf32>
    %159 = arith.select %38, %157, %158 : vector<4x512xi1>, vector<4x512xf32>
    %160 = arith.truncf %159 : vector<4x512xf32> to vector<4x512xbf16>
    %161 = arith.truncf %143 : vector<4x512xf32> to vector<4x512xbf16>
    %c511_i32_67 = arith.constant 511 : i32
    %162 = tpu.dynamic_rotate %143 by %c511_i32_67 dim 1 : vector<4x512xf32>, i32 -> vector<4x512xf32>
    %163 = arith.select %40, %143, %162 : vector<4x512xi1>, vector<4x512xf32>
    %c511_i32_68 = arith.constant 511 : i32
    %164 = tpu.dynamic_rotate %163 by %c511_i32_68 dim 1 : vector<4x512xf32>, i32 -> vector<4x512xf32>
    %165 = arith.select %40, %163, %164 : vector<4x512xi1>, vector<4x512xf32>
    %c511_i32_69 = arith.constant 511 : i32
    %166 = tpu.dynamic_rotate %165 by %c511_i32_69 dim 1 : vector<4x512xf32>, i32 -> vector<4x512xf32>
    %167 = arith.select %40, %165, %166 : vector<4x512xi1>, vector<4x512xf32>
    %c511_i32_70 = arith.constant 511 : i32
    %168 = tpu.dynamic_rotate %167 by %c511_i32_70 dim 1 : vector<4x512xf32>, i32 -> vector<4x512xf32>
    %169 = arith.select %40, %167, %168 : vector<4x512xi1>, vector<4x512xf32>
    %170 = arith.truncf %169 : vector<4x512xf32> to vector<4x512xbf16>
    %c1_i32_71 = arith.constant 1 : i32
    %171 = tpu.dynamic_rotate %135 by %c1_i32_71 dim 1 : vector<4x512xf32>, i32 -> vector<4x512xf32>
    %172 = arith.select %38, %135, %171 : vector<4x512xi1>, vector<4x512xf32>
    %c1_i32_72 = arith.constant 1 : i32
    %173 = tpu.dynamic_rotate %172 by %c1_i32_72 dim 1 : vector<4x512xf32>, i32 -> vector<4x512xf32>
    %174 = arith.select %38, %172, %173 : vector<4x512xi1>, vector<4x512xf32>
    %c1_i32_73 = arith.constant 1 : i32
    %175 = tpu.dynamic_rotate %174 by %c1_i32_73 dim 1 : vector<4x512xf32>, i32 -> vector<4x512xf32>
    %176 = arith.select %38, %174, %175 : vector<4x512xi1>, vector<4x512xf32>
    %c1_i32_74 = arith.constant 1 : i32
    %177 = tpu.dynamic_rotate %176 by %c1_i32_74 dim 1 : vector<4x512xf32>, i32 -> vector<4x512xf32>
    %178 = arith.select %38, %176, %177 : vector<4x512xi1>, vector<4x512xf32>
    %179 = arith.truncf %178 : vector<4x512xf32> to vector<4x512xbf16>
    %180 = arith.truncf %135 : vector<4x512xf32> to vector<4x512xbf16>
    %c511_i32_75 = arith.constant 511 : i32
    %181 = tpu.dynamic_rotate %135 by %c511_i32_75 dim 1 : vector<4x512xf32>, i32 -> vector<4x512xf32>
    %182 = arith.select %40, %135, %181 : vector<4x512xi1>, vector<4x512xf32>
    %c511_i32_76 = arith.constant 511 : i32
    %183 = tpu.dynamic_rotate %182 by %c511_i32_76 dim 1 : vector<4x512xf32>, i32 -> vector<4x512xf32>
    %184 = arith.select %40, %182, %183 : vector<4x512xi1>, vector<4x512xf32>
    %c511_i32_77 = arith.constant 511 : i32
    %185 = tpu.dynamic_rotate %184 by %c511_i32_77 dim 1 : vector<4x512xf32>, i32 -> vector<4x512xf32>
    %186 = arith.select %40, %184, %185 : vector<4x512xi1>, vector<4x512xf32>
    %c511_i32_78 = arith.constant 511 : i32
    %187 = tpu.dynamic_rotate %186 by %c511_i32_78 dim 1 : vector<4x512xf32>, i32 -> vector<4x512xf32>
    %188 = arith.select %40, %186, %187 : vector<4x512xi1>, vector<4x512xf32>
    %189 = arith.truncf %188 : vector<4x512xf32> to vector<4x512xbf16>
    %c1_i32_79 = arith.constant 1 : i32
    %190 = tpu.dynamic_rotate %151 by %c1_i32_79 dim 1 : vector<4x512xf32>, i32 -> vector<4x512xf32>
    %191 = arith.select %38, %151, %190 : vector<4x512xi1>, vector<4x512xf32>
    %c1_i32_80 = arith.constant 1 : i32
    %192 = tpu.dynamic_rotate %191 by %c1_i32_80 dim 1 : vector<4x512xf32>, i32 -> vector<4x512xf32>
    %193 = arith.select %38, %191, %192 : vector<4x512xi1>, vector<4x512xf32>
    %c1_i32_81 = arith.constant 1 : i32
    %194 = tpu.dynamic_rotate %193 by %c1_i32_81 dim 1 : vector<4x512xf32>, i32 -> vector<4x512xf32>
    %195 = arith.select %38, %193, %194 : vector<4x512xi1>, vector<4x512xf32>
    %c1_i32_82 = arith.constant 1 : i32
    %196 = tpu.dynamic_rotate %195 by %c1_i32_82 dim 1 : vector<4x512xf32>, i32 -> vector<4x512xf32>
    %197 = arith.select %38, %195, %196 : vector<4x512xi1>, vector<4x512xf32>
    %198 = arith.truncf %197 : vector<4x512xf32> to vector<4x512xbf16>
    %199 = arith.truncf %151 : vector<4x512xf32> to vector<4x512xbf16>
    %c511_i32_83 = arith.constant 511 : i32
    %200 = tpu.dynamic_rotate %151 by %c511_i32_83 dim 1 : vector<4x512xf32>, i32 -> vector<4x512xf32>
    %201 = arith.select %40, %151, %200 : vector<4x512xi1>, vector<4x512xf32>
    %c511_i32_84 = arith.constant 511 : i32
    %202 = tpu.dynamic_rotate %201 by %c511_i32_84 dim 1 : vector<4x512xf32>, i32 -> vector<4x512xf32>
    %203 = arith.select %40, %201, %202 : vector<4x512xi1>, vector<4x512xf32>
    %c511_i32_85 = arith.constant 511 : i32
    %204 = tpu.dynamic_rotate %203 by %c511_i32_85 dim 1 : vector<4x512xf32>, i32 -> vector<4x512xf32>
    %205 = arith.select %40, %203, %204 : vector<4x512xi1>, vector<4x512xf32>
    %c511_i32_86 = arith.constant 511 : i32
    %206 = tpu.dynamic_rotate %205 by %c511_i32_86 dim 1 : vector<4x512xf32>, i32 -> vector<4x512xf32>
    %207 = arith.select %40, %205, %206 : vector<4x512xi1>, vector<4x512xf32>
    %208 = arith.truncf %207 : vector<4x512xf32> to vector<4x512xbf16>
    %209 = tpu.concatenate %160, %161, %170, %179, %180, %189, %198, %199, %208 in 0 : vector<4x512xbf16>, vector<4x512xbf16>, vector<4x512xbf16>, vector<4x512xbf16>, vector<4x512xbf16>, vector<4x512xbf16>, vector<4x512xbf16>, vector<4x512xbf16>, vector<4x512xbf16> -> vector<36x512xbf16>
    %c0_87 = arith.constant 0 : index
    %c0_88 = arith.constant 0 : index
    %210 = vector.load %arg6[%c0_87, %c0_88] : memref<4x36xbf16, #tpu.memory_space<vmem>>, vector<4x36xbf16>
    %cst_89 = arith.constant dense<0.000000e+00> : vector<4x512xf32>
    %211 = tpu.matmul %210, %209, %cst_89 {dimension_numbers = #tpu.dot_dimension_numbers<[1], [0], [0], [1], [0, 0, 1, 1], [], []>} : vector<4x36xbf16>, vector<36x512xbf16>, vector<4x512xf32> -> vector<4x512xf32>
    %c0_90 = arith.constant 0 : index
    %c0_91 = arith.constant 0 : index
    %212 = vector.load %arg7[%c0_90, %c0_91] : memref<4x1xf32, #tpu.memory_space<vmem>>, vector<4x1xf32>
    %213 = vector.broadcast %212 : vector<4x1xf32> to vector<4x512xf32>
    %214 = arith.addf %211, %213 : vector<4x512xf32>
    %cst_92 = arith.constant 0.000000e+00 : f32
    %215 = vector.broadcast %cst_92 : f32 to vector<4x512xf32>
    %216 = arith.maximumf %214, %215 : vector<4x512xf32>
    %c0_93 = arith.constant 0 : index
    %c0_94 = arith.constant 0 : index
    %217 = vector.load %arg8[%c0_93, %c0_94] : memref<4x1xf32, #tpu.memory_space<vmem>>, vector<4x1xf32>
    %218 = vector.broadcast %217 : vector<4x1xf32> to vector<4x512xf32>
    %219 = arith.mulf %216, %218 : vector<4x512xf32>
    %cst_95 = arith.constant dense<0.000000e+00> : vector<512xf32>
    %220 = vector.multi_reduction <add>, %219, %cst_95 [0] : vector<4x512xf32> to vector<512xf32>
    %221 = vector.shape_cast %220 : vector<512xf32> to vector<1x512xf32>
    %c0_96 = arith.constant 0 : index
    %c0_97 = arith.constant 0 : index
    %222 = vector.load %arg9[%c0_96, %c0_97] : memref<1x1xf32, #tpu.memory_space<vmem>>, vector<1x1xf32>
    %223 = vector.broadcast %222 : vector<1x1xf32> to vector<1x512xf32>
    %224 = arith.addf %221, %223 : vector<1x512xf32>
    %225 = vector.extract_strided_slice %224 {offsets = [0, 0], sizes = [1, 256], strides = [1, 1]} : vector<1x512xf32> to vector<1x256xf32>
    %226 = vector.shape_cast %225 : vector<1x256xf32> to vector<1x256xf32>
    %227 = vector.broadcast %226 : vector<1x256xf32> to vector<64x256xf32>
    %c0_98 = arith.constant 0 : index
    %c0_99 = arith.constant 0 : index
    %c0_100 = arith.constant 0 : index
    %228 = vector.load %arg10[%c0_98, %c0_99, %c0_100] : memref<2x64x256xf32, #tpu.memory_space<vmem>>, vector<1x64x256xf32>
    %229 = vector.shape_cast %228 : vector<1x64x256xf32> to vector<64x256xf32>
    %230 = vector.shape_cast %227 : vector<64x256xf32> to vector<1x64x256xf32>
    tpu.vector_store %arg10[%c0_98, %c0_99, %c0_100], %230 {strides = array<i32>} : memref<2x64x256xf32, #tpu.memory_space<vmem>>, vector<1x64x256xf32>,
    %231 = vector.extract_strided_slice %224 {offsets = [0, 256], sizes = [1, 256], strides = [1, 1]} : vector<1x512xf32> to vector<1x256xf32>
    %232 = vector.shape_cast %231 : vector<1x256xf32> to vector<1x256xf32>
    %233 = vector.broadcast %232 : vector<1x256xf32> to vector<64x256xf32>
    %c1_101 = arith.constant 1 : index
    %c0_102 = arith.constant 0 : index
    %c0_103 = arith.constant 0 : index
    %234 = vector.load %arg10[%c1_101, %c0_102, %c0_103] : memref<2x64x256xf32, #tpu.memory_space<vmem>>, vector<1x64x256xf32>
    %235 = vector.shape_cast %234 : vector<1x64x256xf32> to vector<64x256xf32>
    %236 = vector.shape_cast %233 : vector<64x256xf32> to vector<1x64x256xf32>
    tpu.vector_store %arg10[%c1_101, %c0_102, %c0_103], %236 {strides = array<i32>} : memref<2x64x256xf32, #tpu.memory_space<vmem>>, vector<1x64x256xf32>,
    return
  }
  func.func @transform_0(%arg0: i32) -> (i32, i32, i32) {
    %c0_i32 = arith.constant 0 : i32
    %c0_i32_0 = arith.constant 0 : i32
    %c0_i32_1 = arith.constant 0 : i32
    return %arg0, %c0_i32, %c0_i32_0 : i32, i32, i32
  }
  func.func @transform_1(%arg0: i32) -> (i32, i32) {
    %c0_i32 = arith.constant 0 : i32
    %c0_i32_0 = arith.constant 0 : i32
    %c0_i32_1 = arith.constant 0 : i32
    return %c0_i32, %c0_i32_0 : i32, i32
  }
  func.func @transform_2(%arg0: i32) -> (i32, i32) {
    %c0_i32 = arith.constant 0 : i32
    %c0_i32_0 = arith.constant 0 : i32
    %c0_i32_1 = arith.constant 0 : i32
    return %c0_i32, %c0_i32_0 : i32, i32
  }
  func.func @transform_3(%arg0: i32) -> (i32, i32) {
    %c0_i32 = arith.constant 0 : i32
    %c0_i32_0 = arith.constant 0 : i32
    %c0_i32_1 = arith.constant 0 : i32
    return %c0_i32, %c0_i32_0 : i32, i32
  }
  func.func @transform_4(%arg0: i32) -> (i32, i32) {
    %c0_i32 = arith.constant 0 : i32
    %c0_i32_0 = arith.constant 0 : i32
    %c0_i32_1 = arith.constant 0 : i32
    return %c0_i32, %c0_i32_0 : i32, i32
  }
  func.func @transform_5(%arg0: i32) -> (i32, i32) {
    %c0_i32 = arith.constant 0 : i32
    %c0_i32_0 = arith.constant 0 : i32
    %c0_i32_1 = arith.constant 0 : i32
    return %c0_i32, %c0_i32_0 : i32, i32
  }
  func.func @transform_6(%arg0: i32) -> (i32, i32) {
    %c0_i32 = arith.constant 0 : i32
    %c0_i32_0 = arith.constant 0 : i32
    %c0_i32_1 = arith.constant 0 : i32
    return %c0_i32, %c0_i32_0 : i32, i32
  }
  func.func @transform_7(%arg0: i32) -> (i32, i32) {
    %c0_i32 = arith.constant 0 : i32
    %c0_i32_0 = arith.constant 0 : i32
    %c0_i32_1 = arith.constant 0 : i32
    return %c0_i32, %c0_i32_0 : i32, i32
  }
  func.func @transform_8(%arg0: i32) -> (i32, i32) {
    %c0_i32 = arith.constant 0 : i32
    %c0_i32_0 = arith.constant 0 : i32
    %c0_i32_1 = arith.constant 0 : i32
    return %c0_i32, %c0_i32_0 : i32, i32
  }
  func.func @transform_9(%arg0: i32) -> (i32, i32, i32) {
    %c0_i32 = arith.constant 0 : i32
    %c0_i32_0 = arith.constant 0 : i32
    %c0_i32_1 = arith.constant 0 : i32
    return %arg0, %c0_i32, %c0_i32_0 : i32, i32, i32
  }
}

</mosaic_0001>

<bundles_post_ra>
// kernel: tpu_custom_call.1
= control target key start
LH: loop header
LB: loop body
LE: loop exit
PB: predicated region body
PF: predicated region fallthrough
CT: control target
= control target key end

     0   :  { %s5161_s0 = inlined_call_operand.hbm [shape: f32[4,64,256], index: 0, kind: input, shape index: {}]   ;;  %s5162_s1 = inlined_call_operand.vmem [shape: bf16[4,64], index: 1, kind: input, shape index: {}]   ;;  %s5163_s2 = inlined_call_operand.vmem [shape: f32[4,1], index: 2, kind: input, shape index: {}]   ;;  %s5164_s3 = inlined_call_operand.vmem [shape: bf16[4,36], index: 3, kind: input, shape index: {}]   ;;  %s5165_s4 = inlined_call_operand.vmem [shape: f32[4,1], index: 4, kind: input, shape index: {}]   ;;  %s5166_s5 = inlined_call_operand.vmem [shape: bf16[4,36], index: 5, kind: input, shape index: {}]   ;;  %s5167_s6 = inlined_call_operand.vmem [shape: f32[4,1], index: 6, kind: input, shape index: {}]   ;;  %s5168_s7 = inlined_call_operand.vmem [shape: f32[4,1], index: 7, kind: input, shape index: {}]   ;;  %s5169_s8 = inlined_call_operand.<no memory space> [shape: f32[1,1], index: 8, kind: input, shape index: {}]   ;;  %s5170_s9 = inlined_call_operand.hbm [shape: f32[4,64,256], index: 9, kind: output, shape index: {}]  }
   0x1   :  { %v14_v0 = vstv %s5169_s8 }
   0x2   :  { %15 = vst [vmem:[#allocation2] sm:$0x1] %v14_v0 }
   0x3   :  { %16 = vsyncpa [#allocation4], 0 }
   0x4   :  { %18 = vsyncpa [#allocation4 + $0x1], 0 }
   0x5   :  { %19 = vsyncpa [#allocation5], 0 }
   0x6   :  { %21 = vsyncpa [#allocation5 + $0x1], 0  ;;  %s3252_s11 = smov 0   ;;  %s3254_s12 = smov 0  }
   0x7   :  { %s3256_s13 = smov 0   ;;  %s3258_s14 = smov 0  }
   0x8 LB: > { %s3273_s8 = sadd.s32 4294967295, %s3187_s14   ;;  %s2337_s15 = sadd.s32 4294967294, %s3187_s14   ;;  %s3187_s14 = sphi %s3258_s14, %s5398_s14   ;;  %s3183_s13 = sphi %s3256_s13, %s5397_s13   ;;  %s3179_s12 = sphi %s3254_s12, %s5396_s12   ;;  %s3175_s11 = sphi %s3252_s11, %s5395_s11  }
   0x9   : > { %s3277_s16 = sadd.s32 1, %s3187_s14   ;;  %s34_s17 = sadd.s32 1, %s3183_s13 }
   0xa   : > { %s31_s18 = ssub.s32 %s3187_s14, %s3277_s16  ;;  %p41_p0 = scmp.ne.s32.totalorder %s3183_s13, %s3179_s12 }
   0xb   : > { %p32_p1 = scmp.eq.s32.totalorder %s31_s18, 0  ;;  %p42_p2 = scmp.eq.s32.totalorder %s3187_s14, 0 }
   0xc   : > { %p47_p3 = scmp.ne.s32.totalorder %s3179_s12, %s3175_s11  ;;  %p48_p4 = scmp.eq.s32.totalorder %s3273_s8, 0 }
   0xd   : > { %s3289_s19 = scalar_select %p32_p1, %s3183_s13, %s34_s17  }
   0xe   : > { %p3291_p5 = por %p42_p2, %p41_p0  ;;  %p3295_p6 = por %p48_p4, %p47_p3 }
   0xf   : > { %5187 = sst [smem:[#allocation9_spill]] %s3289_s19  ;;  %p239_p7 = scmp.eq.s32.totalorder %s3273_s8, 1 }
  0x10   : > { %s5189_s21 = scalar_select %p3295_p6, 1, 0 }
  0x11   : > { %p245_p8 = scmp.eq.s32.totalorder %s2337_s15, 1  ;;  %p2411_p10 = scmp.lt.s32.totalorder %s3187_s14, 2 }
  0x12   : > { %p3302_p11 = por %p239_p7, %p41_p0  ;;  %s289_s24 = sand.u32 1, %s3183_s13  }
  0x13   : > { %p3306_p12 = por %p245_p8, %p47_p3  ;;  %s2396_s25 = sshll.u32 %s3187_s14, 12 }
  0x14   : > { %s5190_s22 = scalar_select %p3302_p11, 1, 0 }
  0x15   : > { %s5191_s23 = scalar_select %p3306_p12, 1, 0 }
  0x16   : > { %s2340_s26 = sshll.u32 %s289_s24, 8  ;;  %s3315_s29 = scalar_lea.hbm %s5161_s0, %s2396_s25 }
  0x17   : > { %s293_s30 = scalar_lea.vmem [#allocation3], %s2340_s26  ;;  %p3319_p13 = pnand %p2411_p10, %p3291_p5 }
  0x18   : > { %s301_s10 = sshll.u32 %s293_s30, 4  ;;  %s3325_s17 = scalar_lea.sflag [#allocation4], %s289_s24  ;;  %s3323_s10 = int_to_ptr.vmem [resolvable:$true] %s301_s10 }
  0x19   : > { %s3095_s18 = scalar_lea.hbm %s3315_s29, 4096  ;;  %p3097_p1 = pneg %p3319_p13 }
  0x1a   : > { %p3096_p0 = scmp.ne.s32.totalorder %s3315_s29, %s3095_s18  ;;  %s3100_s26 = scalar_lea.hbm %s5161_s0, 8192 }
  0x1b   : > { %p3101_p4 = scmp.lt.s32.totalorder %s3315_s29, %s5161_s0  ;;  %p3102_p5 = scmp.lt.s32.totalorder %s3100_s26, %s3095_s18 }
  0x1c   : > { %p3098_p2 = pnand %p3097_p1, %p3096_p0 }
  0x1d   : > { %p3103_p7 = por %p3102_p5, %p3101_p4 }
  0x1e   : > { %p3099_p3 = pneg %p3098_p2 }
  0x20   : > { %p3104_p8 = pnand %p3103_p7, %p3099_p3 }
  0x22   : > { %3107 = shalt.err (!%p3104_p8)
}
  0x23   : > { %s3108_s24 = scalar_lea.vmem %s3323_s10, 4096  ;;  %s3189_s30 = smov [#allocation3]  }
  0x24   : > { %p3109_p10 = scmp.ne.s32.totalorder %s3323_s10, %s3108_s24  ;;  %s3113_s19 = sshll.u32 %s3189_s30, 4  ;;  %s3114_s19 = int_to_ptr.vmem [resolvable:$false] %s3113_s19 }
  0x25   : > { %s3115_s25 = scalar_lea.vmem %s3114_s19, 8192  ;;  %p3116_p2 = scmp.lt.s32.totalorder %s3323_s10, %s3114_s19 }
  0x26   : > { %p3111_p9 = pnand %p3109_p10, %p3097_p1  ;;  %p3117_p12 = scmp.lt.s32.totalorder %s3115_s25, %s3108_s24 }
  0x28   : > { %p3112_p0 = pneg %p3111_p9  ;;  %p3118_p11 = por %p3117_p12, %p3116_p2 }
  0x2a   : > { %p3119_p6 = pnand %p3118_p11, %p3112_p0 }
  0x2c   : > { %3122 = shalt.err (!%p3119_p6)
}
  0x2d   : > { %s3190_s18 = smov 256   ;;  %s3191_s27 = smov 16  }
  0x2e   : > { %2406 = dma.hbm_to_vmem [thread:$0]  (!%p3319_p13), %s3315_s29, 4096, %s3323_s10, %s3325_s17, %s3190_s18, %s3190_s18, %s3191_s27  }
  0x2f   : > { %p2344_p9 = scmp.ge.s32.totalorder %s3187_s14, 1  ;;  %p309_p1 = scmp.lt.s32.totalorder %s3187_s14, 3 }
  0x31   : > { %p310_p3 = pnand %p2344_p9, %p309_p1 }
  0x32   : > { %s3349_s19 = sand.u32 (!%p310_p3), 1, %s3179_s12   ;;  %p5193_p6 = scmp.ne.s32.totalorder (!%p310_p3), %s5189_s21, 0 }
  0x33   : > { %313 = sbr.rel (%p310_p3) target bundleno = 2737 (0xab1), region = 56  ;;  %s2345_s26 = sshll.u32 (!%p310_p3), %s3349_s19, 8 }
  0x34   : > { %s316_s20 = scalar_lea.sflag (!%p310_p3), [#allocation4], %s3349_s19  ;;  %s3355_s28 = scalar_lea.vmem (!%p310_p3), [#allocation3], %s2345_s26 }
  0x38   : > { %3166 = dma.done.wait (%p5193_p6), %s316_s20, 4096  }
  0x39   : > { %3168 = vsyncadd (%p5193_p6), %s316_s20, 4294963200  ;;  %v3192_v1 = vmov 0   ;;  %v487_v2 = vld [vmem:[%s3355_s28 + $0x68] sm:$0xff]  ;;  %v489_v3 = vld [vmem:[%s3355_s28 + $0x78] sm:$0xff]  ;;  %vm530_vm0 = vcmask 523264   ;;  %s3193_s17 = smov 112  }
  0x3a   : > { %566 = vmatprep.mubr.bf16.mxu0 %v3192_v1  ;;  %607 = vmatprep.mubr.bf16.mxu1 %v3192_v1  ;;  %v2360_v4 = vld [vmem:[%s3355_s28 + $0xe8] sm:$0xff]  ;;  %v497_v5 = vpack.c.bf16 %v489_v3, %v487_v2  ;;  %v2362_v6 = vld [vmem:[%s3355_s28 + $0xf8] sm:$0xff]  ;;  %v486_v7 = vld [vmem:[%s3355_s28 + $0x60] sm:$0xff]  ;;  %s3194_s24 = smov 16   ;;  %s3195_s30 = smov 127  }
  0x3b   : > { %2453 = vset.pattern.permute.xlu0 %v3192_v1  ;;  %2774 = vset.pattern.permute.xlu1 %v3192_v1  ;;  %v488_v8 = vld [vmem:[%s3355_s28 + $0x70] sm:$0xff]  ;;  %v522_v9 = vpack.c.bf16 %v2362_v6, %v2360_v4  ;;  %v2359_v11 = vld [vmem:[%s3355_s28 + $0xe0] sm:$0xff]  ;;  %v483_v13 = vld [vmem:[%s3355_s28 + $0x48] sm:$0xff]  ;;  %s3196_s25 = smov 1   ;;  %s5077_s18 = scalar_lea.vmem [#allocation6], %s2345_s26 }
  0x3c   : > { %v496_v10 = vpack.c.bf16 %v488_v8, %v486_v7  ;;  %v2361_v12 = vld [vmem:[%s3355_s28 + $0xf0] sm:$0xff]  ;;  %542 = vmatprep.subr.bf16.mxu0 %v497_v5  ;;  %v485_v15 = vld [vmem:[%s3355_s28 + $0x58] sm:$0xff]  ;;  %v2356_v16 = vld [vmem:[%s3355_s28 + $0xc8] sm:$0xff]  ;;  %v357_v8 = vlaneseq  ;;  %s2264_s27 = sshll.u32 %s5077_s18, 4  ;;  %p5391_p12 = scmp.ne.s32.totalorder %s5190_s22, 0  ;;  %s5101_s27 = int_to_ptr.vmem [resolvable:$true] %s2264_s27 }
  0x3d   : > { %v521_v14 = vpack.c.bf16 %v2361_v12, %v2359_v11  ;;  %v2358_v17 = vld [vmem:[%s3355_s28 + $0xd8] sm:$0xff]  ;;  %583 = vmatprep.subr.bf16.mxu1 %v522_v9  ;;  %v495_v18 = vpack.c.bf16 %v485_v15, %v483_v13  ;;  %v482_v20 = vld [vmem:[%s3355_s28 + $0x40] sm:$0xff]  ;;  %v484_v21 = vld [vmem:[%s3355_s28 + $0x50] sm:$0xff]  ;;  %s3123_s21 = scalar_lea.vmem %s5101_s27, 4096  ;;  %s3197_s29 = smov [#allocation6]  }
  0x3e   : > { %543 = vmatpush1.bf16.msra.mxu0 %v496_v10  ;;  %v520_v19 = vpack.c.bf16 %v2358_v17, %v2356_v16  ;;  %v2355_v22 = vld [vmem:[%s3355_s28 + $0xc0] sm:$0xff]  ;;  %v494_v23 = vpack.c.bf16 %v484_v21, %v482_v20  ;;  %v2357_v24 = vld [vmem:[%s3355_s28 + $0xd0] sm:$0xff]  ;;  %v479_v25 = vld [vmem:[%s3355_s28 + $0x28] sm:$0xff]  ;;  %v3430_v9 = vand.u32 127, %v357_v8  ;;  %p3124_p11 = scmp.ne.s32.totalorder %s5101_s27, %s3123_s21  ;;  %s3127_s10 = sshll.u32 %s3197_s29, 4  ;;  %s3128_s10 = int_to_ptr.vmem [resolvable:$false] %s3127_s10 }
  0x3f   : > { %584 = vmatpush1.bf16.msra.mxu1 %v521_v14  ;;  %v481_v26 = vld [vmem:[%s3355_s28 + $0x38] sm:$0xff]  ;;  %544 = vmatprep.subr.bf16.mxu0 %v495_v18  ;;  %v519_v27 = vpack.c.bf16 %v2357_v24, %v2355_v22  ;;  %v2352_v29 = vld [vmem:[%s3355_s28 + $0xa8] sm:$0xff]  ;;  %v478_v31 = vld [vmem:[%s3355_s28 + $0x20] sm:$0xff]  ;;  %s3129_s15 = scalar_lea.vmem %s3128_s10, 8192  ;;  %p3130_p5 = scmp.lt.s32.totalorder %s5101_s27, %s3128_s10 }
  0x40   : > { %585 = vmatprep.subr.bf16.mxu1 %v520_v19  ;;  %v493_v28 = vpack.c.bf16 %v481_v26, %v479_v25  ;;  %v2354_v30 = vld [vmem:[%s3355_s28 + $0xb8] sm:$0xff]  ;;  %v480_v33 = vld [vmem:[%s3355_s28 + $0x30] sm:$0xff]  ;;  %v2351_v34 = vld [vmem:[%s3355_s28 + $0xa0] sm:$0xff]  ;;  %v3433_v10 = vadd.s32 384, %v3430_v9  ;;  %v3436_v11 = vadd.s32 128, %v3430_v9  ;;  %v3439_v12 = vadd.s32 256, %v3430_v9  ;;  %p3125_p13 = pnand %p3124_p11, %p5391_p12  ;;  %p3131_p7 = scmp.lt.s32.totalorder %s3129_s15, %s3123_s21 }
  0x41   : > { %v518_v32 = vpack.c.bf16 %v2354_v30, %v2352_v29  ;;  %v2353_v35 = vld [vmem:[%s3355_s28 + $0xb0] sm:$0xff]  ;;  %v492_v36 = vpack.c.bf16 %v480_v33, %v478_v31  ;;  %v475_v37 = vld [vmem:[%s3355_s28 + $0x8] sm:$0xff]  ;;  %v477_v38 = vld [vmem:[%s3355_s28 + $0x18] sm:$0xff]  ;;  %vm5174_vm1 = vcmp.lt.s32.totalorder %v3430_v9, 112  ;;  %v366_v17 = vand.u32 255, %v3430_v9 }
  0x42   : > { %545 = vmatpush1.bf16.msra.mxu0 %v494_v23  ;;  %v2348_v39 = vld [vmem:[%s3355_s28 + $0x88] sm:$0xff]  ;;  %v517_v40 = vpack.c.bf16 %v2353_v35, %v2351_v34  ;;  %v491_v41 = vpack.c.bf16 %v477_v38, %v475_v37  ;;  %v2350_v42 = vld [vmem:[%s3355_s28 + $0x98] sm:$0xff]  ;;  %v474_v43 = vld [vmem:[%s3355_s28] sm:$0xff]  ;;  %v387_v13 = vand.u32 255, %v3433_v10  ;;  %v373_v14 = vand.u32 255, %v3436_v11  ;;  %p3126_p4 = pneg %p3125_p13  ;;  %p3132_p8 = por %p3131_p7, %p3130_p5 }
  0x43   : > { %586 = vmatpush1.bf16.msra.mxu1 %v519_v27  ;;  %546 = vmatprep.subr.bf16.mxu0 %v493_v28  ;;  %v476_v44 = vld [vmem:[%s3355_s28 + $0x10] sm:$0xff]  ;;  %v516_v45 = vpack.c.bf16 %v2350_v42, %v2348_v39  ;;  %v2347_v46 = vld [vmem:[%s3355_s28 + $0x80] sm:$0xff]  ;;  %v380_v15 = vand.u32 255, %v3439_v12  ;;  %vm5173_vm4 = vcmp.lt.s32.totalorder %v3430_v9, 16  ;;  %vm3467_vm6 = vcmp.lt.s32.totalorder %v366_v17, 16 }
  0x44   : > { %587 = vmatprep.subr.bf16.mxu1 %v518_v32  ;;  %v2349_v47 = vld [vmem:[%s3355_s28 + $0x90] sm:$0xff]  ;;  %v524_v48 = vld [vmem:[%s5163_s2] sm:$0xf]  ;;  %v490_v49 = vpack.c.bf16 %v476_v44, %v474_v43  ;;  %vm3446_vm2 = vcmp.ge.s32.totalorder %v387_v13, 240  ;;  %vm3450_vm3 = vcmp.ge.s32.totalorder %v373_v14, 240  ;;  %vm5176_vm7 = vcmp.lt.s32.totalorder %v3430_v9, 127  ;;  %p3133_p10 = pnand %p3132_p8, %p3126_p4 }
  0x45   : > { %527 = vperm.xlu0 %2453, %v524_v48   ;;  %v515_v50 = vpack.c.bf16 %v2349_v47, %v2347_v46  ;;  %v523_v51 = vld [vmem:[%s5162_s1] sm:$0x3]  ;;  %vm3457_vm5 = vcmp.lt.s32.totalorder %v380_v15, 16  ;;  %vm5175_vm12 = vcmp.lt.s32.totalorder %v3430_v9, 1  ;;  %s2250_s28 = scalar_lea.sflag [#allocation5], %s3349_s19 }
  0x46   : > { %547 = vmatpush1.bf16.msra.mxu0 %v492_v36 }
  0x47   : > { %588 = vmatpush1.bf16.msra.mxu1 %v517_v40  ;;  %548 = vmatprep.subr.bf16.mxu0 %v491_v41 }
  0x48   : > { %589 = vmatprep.subr.bf16.mxu1 %v516_v45 }
  0x4a   : > { %549 = vmatpush1.bf16.msra.mxu0 %v490_v49 }
  0x4b   : > { %590 = vmatpush1.bf16.msra.mxu1 %v515_v50 }
  0x4d   : > { %2363 = vmatmul.mubr.msk.bf16.vlgmr.msra.gmra.mxu0 %vm530_vm0, %v523_v51 }
  0x4e   : > { %2364 = vmatmul.mubr.msk.bf16.vlgmr.msra.gmra.mxu1 %vm530_vm0, %v523_v51  ;;  %1342 = vmatprep.mubr.bf16.mxu0 %v3192_v1 }
  0x4f   : > { %1383 = vmatprep.mubr.bf16.mxu1 %v3192_v1 }
  0xc0   : > { %v528_v52 = vpop.permute.xlu0 %527 }
 0x10d   : > { %v568_v53 = vpop.f32.mrf.mxu0 }
 0x10e   : > { %v569_v54 = vadd.f32 %v568_v53, %v528_v52  ;;  %v609_v55 = vpop.f32.mrf.mxu1 }
 0x10f   : > { %v610_v56 = vadd.f32 %v609_v55, %v528_v52  ;;  %v570_v57 = vpop.f32.mrf.mxu0 }
 0x110   : > { %v571_v58 = vadd.f32 %v570_v57, %v528_v52  ;;  %v611_v59 = vpop.f32.mrf.mxu1  ;;  %v3405_v62 = vmax.f32 %v569_v54, 0.0 }
 0x111   : > { %v612_v60 = vadd.f32 %v611_v59, %v528_v52  ;;  %v572_v61 = vpop.f32.mrf.mxu0  ;;  %v3409_v2 = vmax.f32 %v610_v56, 0.0 }
 0x112   : > { %v3407_v63 = vmax.f32 %v571_v58, 0.0  ;;  %v613_v0 = vpop.f32.mrf.mxu1 }
 0x113   : > { %v3411_v3 = vmax.f32 %v612_v60, 0.0  ;;  %v573_v4 = vpop.f32.mrf.mxu0 }
 0x114   : > { %v614_v5 = vpop.f32.mrf.mxu1  ;;  %v3415_v6 = vpack.i.bf16 %v3407_v63, %v3405_v62 }
 0x115   : > { %v3419_v7 = vpack.i.bf16 %v3411_v3, %v3409_v2 }
 0x116   : > { %2455 = vrot.lane.b32.xlu0 %v3415_v6, %s3193_s17 }
 0x117   : > { %2460 = vrot.lane.b32.xlu1 %v3419_v7, %s3193_s17 }
 0x11a   : > { %2470 = vrot.lane.b32.xlu0 %v3419_v7, %s3194_s24 }
 0x11b   : > { %2465 = vrot.lane.b32.xlu1 %v3415_v6, %s3194_s24 }
 0x188   : > { %v2456_v16 = vpop.permute.xlu0 %2455 }
 0x189   : > { %v2461_v18 = vpop.permute.xlu1 %2460  ;;  %v2458_v19 = vunpack.i.h.bf16 %v2456_v16  ;;  %v2457_v20 = vunpack.i.l.bf16 %v2456_v16 }
 0x18a   : > { %v2463_v21 = vunpack.i.h.bf16 %v2461_v18  ;;  %v2462_v22 = vunpack.i.l.bf16 %v2461_v18 }
 0x18b   : > { %v696_v25 = vsel %vm5174_vm1, %v2457_v20, %v2458_v19 }
 0x18c   : > { %v2471_v27 = vpop.permute.xlu0 %2470  ;;  %v694_v28 = vsel %vm5174_vm1, %v2462_v22, %v2463_v21  ;;  %v697_v29 = vsel %vm5174_vm1, %v2463_v21, %v2457_v20  ;;  %v695_v30 = vsel %vm5174_vm1, %v2458_v19, %v2462_v22 }
 0x18d   : > { %v2466_v32 = vpop.permute.xlu1 %2465  ;;  %v2473_v33 = vunpack.i.h.bf16 %v2471_v27  ;;  %v2472_v34 = vunpack.i.l.bf16 %v2471_v27  ;;  %v701_v35 = vsel %vm3446_vm2, %v3411_v3, %v697_v29  ;;  %v699_v36 = vsel %vm3450_vm3, %v3407_v63, %v695_v30 }
 0x18e   : > { %v2468_v37 = vunpack.i.h.bf16 %v2466_v32  ;;  %v2467_v38 = vunpack.i.l.bf16 %v2466_v32  ;;  %v2479_v39 = vpack.i.bf16 %v701_v35, %v694_v28  ;;  %v2474_v40 = vpack.i.bf16 %v699_v36, %v696_v25 }
 0x18f   : > { %v629_v41 = vsel %vm5173_vm4, %v2472_v34, %v2473_v33 }
 0x190   : > { %2480 = vrot.lane.b32.xlu0 %v2479_v39, %s3193_s17  ;;  %2475 = vrot.lane.b32.xlu1 %v2474_v40, %s3193_s17  ;;  %v630_v42 = vsel %vm5173_vm4, %v2468_v37, %v2472_v34  ;;  %v631_v43 = vsel %vm5173_vm4, %v2467_v38, %v2468_v37  ;;  %v632_v44 = vsel %vm5173_vm4, %v2473_v33, %v2467_v38 }
 0x191   : > { %v635_v45 = vsel %vm3457_vm5, %v3409_v2, %v630_v42  ;;  %v633_v46 = vsel %vm3467_vm6, %v3405_v62, %v632_v44 }
 0x192   : > { %v2489_v47 = vpack.i.bf16 %v629_v41, %v635_v45  ;;  %v2484_v48 = vpack.i.bf16 %v631_v43, %v633_v46 }
 0x194   : > { %2490 = vrot.lane.b32.xlu0 %v2489_v47, %s3194_s24  ;;  %2485 = vrot.lane.b32.xlu1 %v2484_v48, %s3194_s24 }
 0x202   : > { %v2481_v49 = vpop.permute.xlu0 %2480  ;;  %v2476_v50 = vpop.permute.xlu1 %2475 }
 0x203   : > { %v2483_v51 = vunpack.i.h.bf16 %v2481_v49  ;;  %v2482_v52 = vunpack.i.l.bf16 %v2481_v49  ;;  %v2478_v53 = vunpack.i.h.bf16 %v2476_v50  ;;  %v2477_v54 = vunpack.i.l.bf16 %v2476_v50 }
 0x205   : > { %v710_v55 = vsel %vm5174_vm1, %v2482_v52, %v2483_v51  ;;  %v713_v56 = vsel %vm5174_vm1, %v2483_v51, %v2477_v54  ;;  %v711_v57 = vsel %vm5174_vm1, %v2478_v53, %v2482_v52  ;;  %v712_v58 = vsel %vm5174_vm1, %v2477_v54, %v2478_v53 }
 0x206   : > { %v2491_v59 = vpop.permute.xlu0 %2490  ;;  %v2486_v60 = vpop.permute.xlu1 %2485  ;;  %v717_v61 = vsel %vm3446_vm2, %v3411_v3, %v713_v56  ;;  %v715_v0 = vsel %vm3450_vm3, %v3407_v63, %v711_v57 }
 0x207   : > { %v2493_v4 = vunpack.i.h.bf16 %v2491_v59  ;;  %v2492_v5 = vunpack.i.l.bf16 %v2491_v59  ;;  %v2488_v13 = vunpack.i.h.bf16 %v2486_v60  ;;  %v2487_v14 = vunpack.i.l.bf16 %v2486_v60 }
 0x208   : > { %v2499_v15 = vpack.i.bf16 %v717_v61, %v710_v55  ;;  %v2494_v16 = vpack.i.bf16 %v715_v0, %v712_v58 }
 0x209   : > { %v645_v17 = vsel %vm5173_vm4, %v2492_v5, %v2493_v4  ;;  %v646_v18 = vsel %vm5173_vm4, %v2488_v13, %v2492_v5  ;;  %v647_v19 = vsel %vm5173_vm4, %v2487_v14, %v2488_v13  ;;  %v648_v20 = vsel %vm5173_vm4, %v2493_v4, %v2487_v14 }
 0x20a   : > { %2500 = vrot.lane.b32.xlu0 %v2499_v15, %s3193_s17  ;;  %2495 = vrot.lane.b32.xlu1 %v2494_v16, %s3193_s17  ;;  %v651_v21 = vsel %vm3457_vm5, %v3409_v2, %v646_v18  ;;  %v649_v22 = vsel %vm3467_vm6, %v3405_v62, %v648_v20 }
 0x20b   : > { %v2509_v25 = vpack.i.bf16 %v645_v17, %v651_v21  ;;  %v2504_v27 = vpack.i.bf16 %v647_v19, %v649_v22 }
 0x20e   : > { %2510 = vrot.lane.b32.xlu0 %v2509_v25, %s3194_s24  ;;  %2505 = vrot.lane.b32.xlu1 %v2504_v27, %s3194_s24 }
 0x27c   : > { %v2501_v28 = vpop.permute.xlu0 %2500  ;;  %v2496_v29 = vpop.permute.xlu1 %2495 }
 0x27d   : > { %v2503_v30 = vunpack.i.h.bf16 %v2501_v28  ;;  %v2502_v32 = vunpack.i.l.bf16 %v2501_v28  ;;  %v2498_v33 = vunpack.i.h.bf16 %v2496_v29  ;;  %v2497_v34 = vunpack.i.l.bf16 %v2496_v29 }
 0x27f   : > { %v726_v35 = vsel %vm5174_vm1, %v2502_v32, %v2503_v30  ;;  %v729_v36 = vsel %vm5174_vm1, %v2503_v30, %v2497_v34  ;;  %v727_v37 = vsel %vm5174_vm1, %v2498_v33, %v2502_v32  ;;  %v728_v38 = vsel %vm5174_vm1, %v2497_v34, %v2498_v33 }
 0x280   : > { %v2511_v39 = vpop.permute.xlu0 %2510  ;;  %v2506_v40 = vpop.permute.xlu1 %2505  ;;  %v733_v41 = vsel %vm3446_vm2, %v3411_v3, %v729_v36  ;;  %v731_v42 = vsel %vm3450_vm3, %v3407_v63, %v727_v37  ;;  %v414_v37 = vand.u32 15, %v3430_v9 }
 0x281   : > { %v2513_v43 = vunpack.i.h.bf16 %v2511_v39  ;;  %v2512_v44 = vunpack.i.l.bf16 %v2511_v39  ;;  %v2508_v45 = vunpack.i.h.bf16 %v2506_v40  ;;  %v2507_v46 = vunpack.i.l.bf16 %v2506_v40 }
 0x282   : > { %v2519_v47 = vpack.i.bf16 %v733_v41, %v726_v35  ;;  %v2514_v48 = vpack.i.bf16 %v731_v42, %v728_v38  ;;  %v435_v40 = vand.u32 15, %v3433_v10  ;;  %v421_v41 = vand.u32 15, %v3436_v11 }
 0x283   : > { %v661_v49 = vsel %vm5173_vm4, %v2512_v44, %v2513_v43  ;;  %v662_v50 = vsel %vm5173_vm4, %v2508_v45, %v2512_v44  ;;  %v663_v51 = vsel %vm5173_vm4, %v2507_v46, %v2508_v45  ;;  %v664_v52 = vsel %vm5173_vm4, %v2513_v43, %v2507_v46 }
 0x284   : > { %2520 = vrot.lane.b32.xlu0 %v2519_v47, %s3193_s17  ;;  %2515 = vrot.lane.b32.xlu1 %v2514_v48, %s3193_s17  ;;  %v667_v53 = vsel %vm3457_vm5, %v3409_v2, %v662_v50  ;;  %v665_v54 = vsel %vm3467_vm6, %v3405_v62, %v664_v52  ;;  %v428_v44 = vand.u32 15, %v3439_v12  ;;  %vm3626_vm8 = vcmp.eq.s32.totalorder %v414_v37, 15 }
 0x285   : > { %v2529_v55 = vpack.i.bf16 %v661_v49, %v667_v53  ;;  %v2524_v56 = vpack.i.bf16 %v663_v51, %v665_v54  ;;  %v5202_v47 = vmov 0  ;;  %vm3630_vm9 = vcmp.eq.s32.totalorder %v435_v40, 15 }
 0x286   : > { %v5203_v47 = vsel %vm3626_vm8, 4294967295, %v5202_v47  ;;  %vm3634_vm10 = vcmp.eq.s32.totalorder %v421_v41, 15  ;;  %v5206_v11 = vmov 0  ;;  %vm3640_vm11 = vcmp.eq.s32.totalorder %v428_v44, 15 }
 0x287   : > { %v5207_v11 = vsel %vm3634_vm10, 4294967295, %v5206_v11  ;;  %vm3671_vm13 = vcmp.eq.s32.totalorder %v414_v37, 0  ;;  %vm3675_vm14 = vcmp.eq.s32.totalorder %v435_v40, 0  ;;  %vm3679_vm15 = vcmp.eq.s32.totalorder %v421_v41, 0 }
 0x288   : > { %2530 = vrot.lane.b32.xlu0 %v2529_v55, %s3194_s24  ;;  %2525 = vrot.lane.b32.xlu1 %v2524_v56, %s3194_s24  ;;  %vm3683_vm0 = vcmp.eq.s32.totalorder %v428_v44, 0 }
 0x28c   : > { %2540 = vrot.lane.b32.xlu0 %v3419_v7, %s3195_s30  ;;  %2535 = vrot.lane.b32.xlu1 %v3415_v6, %s3195_s30 }
 0x2f6   : > { %v2521_v57 = vpop.permute.xlu0 %2520  ;;  %v2516_v58 = vpop.permute.xlu1 %2515 }
 0x2f7   : > { %v2523_v59 = vunpack.i.h.bf16 %v2521_v57  ;;  %v2522_v60 = vunpack.i.l.bf16 %v2521_v57  ;;  %v2518_v61 = vunpack.i.h.bf16 %v2516_v58  ;;  %v2517_v0 = vunpack.i.l.bf16 %v2516_v58 }
 0x2f8   : > { %v5210_v58 = vmov 0 }
 0x2f9   : > { %v3565_v4 = vsel %vm5174_vm1, %v2522_v60, %v2523_v59  ;;  %v743_v5 = vsel %vm5174_vm1, %v2518_v61, %v2522_v60  ;;  %v3571_v13 = vsel %vm5174_vm1, %v2517_v0, %v2518_v61  ;;  %v745_v14 = vsel %vm5174_vm1, %v2523_v59, %v2517_v0 }
 0x2fa   : > { %v3578_v15 = vsel %vm3450_vm3, %v3407_v63, %v743_v5  ;;  %v3583_v16 = vsel %vm3446_vm2, %v3411_v3, %v745_v14  ;;  %v2531_v17 = vpop.permute.xlu0 %2530  ;;  %v2526_v18 = vpop.permute.xlu1 %2525  ;;  %v5211_v58 = vsel %vm3671_vm13, 4294967295, %v5210_v58  ;;  %vm5179_vm1 = vcmask 1043456  }
 0x2fb   : > { %v2533_v19 = vunpack.i.h.bf16 %v2531_v17  ;;  %v2532_v20 = vunpack.i.l.bf16 %v2531_v17  ;;  %v2528_v21 = vunpack.i.h.bf16 %v2526_v18  ;;  %v2527_v22 = vunpack.i.l.bf16 %v2526_v18 }
 0x2fc   : > { %v2549_v25 = vpack.i.bf16 %v3583_v16, %v3565_v4  ;;  %v2544_v27 = vpack.i.bf16 %v3578_v15, %v3571_v13 }
 0x2fd   : > { %v678_v28 = vsel %vm5173_vm4, %v2528_v21, %v2532_v20  ;;  %v680_v29 = vsel %vm5173_vm4, %v2533_v19, %v2527_v22  ;;  %v3597_v30 = vsel %vm5173_vm4, %v2532_v20, %v2533_v19  ;;  %v3606_v33 = vsel %vm5173_vm4, %v2527_v22, %v2528_v21 }
 0x2fe   : > { %2550 = vrot.lane.b32.xlu0 %v2549_v25, %s3196_s25  ;;  %2545 = vrot.lane.b32.xlu1 %v2544_v27, %s3196_s25  ;;  %v3602_v32 = vsel %vm3457_vm5, %v3409_v2, %v678_v28  ;;  %v3611_v34 = vsel %vm3467_vm6, %v3405_v62, %v680_v29  ;;  %v2541_v35 = vpop.permute.xlu0 %2540  ;;  %v2536_v36 = vpop.permute.xlu1 %2535  ;;  %vm5180_vm4 = vcmask 1041408  }
 0x2ff   : > { %v2569_v38 = vpack.i.bf16 %v3597_v30, %v3602_v32  ;;  %v2564_v39 = vpack.i.bf16 %v3606_v33, %v3611_v34  ;;  %v2543_v42 = vunpack.i.h.bf16 %v2541_v35  ;;  %v2542_v43 = vunpack.i.l.bf16 %v2541_v35 }
 0x300   : > { %v2538_v45 = vunpack.i.h.bf16 %v2536_v36  ;;  %v2537_v46 = vunpack.i.l.bf16 %v2536_v36 }
 0x301   : > { %v972_v12 = vsel %vm5176_vm7, %v2542_v43, %v2543_v42 }
 0x302   : > { %2560 = vrot.lane.b32.xlu0 %v2549_v25, %s3195_s30  ;;  %2555 = vrot.lane.b32.xlu1 %v2544_v27, %s3195_s30  ;;  %v975_v49 = vsel %vm5176_vm7, %v2543_v42, %v2537_v46  ;;  %v973_v50 = vsel %vm5176_vm7, %v2538_v45, %v2542_v43  ;;  %v974_v51 = vsel %vm5176_vm7, %v2537_v46, %v2538_v45 }
 0x303   : > { %v978_v52 = vsel %vm3640_vm11, %v3409_v2, %v972_v12  ;;  %v979_v53 = vsel %vm3630_vm9, %v3411_v3, %v975_v49  ;;  %v976_v54 = vsel %vm3626_vm8, %v3405_v62, %v974_v51  ;;  %v977_v55 = vsel %vm3634_vm10, %v3407_v63, %v973_v50 }
 0x304   : > { %v2599_v56 = vpack.i.bf16 %v979_v53, %v978_v52  ;;  %v2594_v57 = vpack.i.bf16 %v977_v55, %v976_v54 }
 0x306   : > { %2570 = vrot.lane.b32.xlu0 %v2569_v38, %s3195_s30  ;;  %2565 = vrot.lane.b32.xlu1 %v2564_v39, %s3195_s30 }
 0x30a   : > { %2585 = vrot.lane.b32.xlu0 %v2569_v38, %s3196_s25  ;;  %2575 = vrot.lane.b32.xlu1 %v2564_v39, %s3196_s25 }
 0x30e   : > { %2590 = vrot.lane.b32.xlu0 %v3419_v7, %s3196_s25  ;;  %2580 = vrot.lane.b32.xlu1 %v3415_v6, %s3196_s25  ;;  %v5214_v7 = vmov 0 }
 0x30f   : > { %v5215_v7 = vsel %vm3679_vm15, 4294967295, %v5214_v7 }
 0x312   : > { %2600 = vrot.lane.b32.xlu0 %v2599_v56, %s3195_s30  ;;  %2595 = vrot.lane.b32.xlu1 %v2594_v57, %s3195_s30 }
 0x370   : > { %v2551_v60 = vpop.permute.xlu0 %2550  ;;  %v2546_v61 = vpop.permute.xlu1 %2545 }
 0x371   : > { %v2553_v0 = vunpack.i.h.bf16 %v2551_v60  ;;  %v2552_v5 = vunpack.i.l.bf16 %v2551_v60  ;;  %v2548_v14 = vunpack.i.h.bf16 %v2546_v61  ;;  %v2547_v17 = vunpack.i.l.bf16 %v2546_v61 }
 0x373   : > { %v1040_v18 = vsel %vm5175_vm12, %v2552_v5, %v2553_v0  ;;  %v1041_v19 = vsel %vm5175_vm12, %v2548_v14, %v2552_v5  ;;  %v1042_v20 = vsel %vm5175_vm12, %v2547_v17, %v2548_v14  ;;  %v1043_v21 = vsel %vm5175_vm12, %v2553_v0, %v2547_v17 }
 0x374   : > { %v2561_v22 = vpop.permute.xlu0 %2560  ;;  %v2556_v25 = vpop.permute.xlu1 %2555  ;;  %v1046_v27 = vsel %vm3683_vm0, %v3565_v4, %v1041_v19  ;;  %v1047_v28 = vsel %vm3675_vm14, %v3583_v16, %v1040_v18  ;;  %v1044_v29 = vsel %vm3671_vm13, %v3571_v13, %v1043_v21  ;;  %v1045_v35 = vsel %vm3679_vm15, %v3578_v15, %v1042_v20 }
 0x375   : > { %v2563_v36 = vunpack.i.h.bf16 %v2561_v22  ;;  %v2562_v37 = vunpack.i.l.bf16 %v2561_v22  ;;  %v2558_v38 = vunpack.i.h.bf16 %v2556_v25  ;;  %v2557_v39 = vunpack.i.l.bf16 %v2556_v25 }
 0x376   : > { %v2609_v40 = vpack.i.bf16 %v1047_v28, %v1046_v27  ;;  %v2604_v41 = vpack.i.bf16 %v1045_v35, %v1044_v29 }
 0x377   : > { %v1112_v42 = vsel %vm5176_vm7, %v2562_v37, %v2563_v36  ;;  %v1115_v43 = vsel %vm5176_vm7, %v2563_v36, %v2557_v39  ;;  %v1113_v44 = vsel %vm5176_vm7, %v2558_v38, %v2562_v37  ;;  %v1114_v45 = vsel %vm5176_vm7, %v2557_v39, %v2558_v38 }
 0x378   : > { %2610 = vrot.lane.b32.xlu0 %v2609_v40, %s3196_s25  ;;  %2605 = vrot.lane.b32.xlu1 %v2604_v41, %s3196_s25  ;;  %v2571_v46 = vpop.permute.xlu0 %2570  ;;  %v2566_v12 = vpop.permute.xlu1 %2565  ;;  %v1118_v49 = vsel %vm3640_vm11, %v3565_v4, %v1112_v42  ;;  %v1119_v50 = vsel %vm3630_vm9, %v3583_v16, %v1115_v43  ;;  %v1116_v51 = vsel %vm3626_vm8, %v3571_v13, %v1114_v45 }
 0x379   : > { %v2573_v52 = vunpack.i.h.bf16 %v2571_v46  ;;  %v2572_v53 = vunpack.i.l.bf16 %v2571_v46  ;;  %v2568_v54 = vunpack.i.h.bf16 %v2566_v12  ;;  %v2567_v55 = vunpack.i.l.bf16 %v2566_v12 }
 0x37a   : > { %v2619_v56 = vpack.i.bf16 %v1119_v50, %v1118_v49  ;;  %v1117_v57 = vsel %vm3634_vm10, %v3578_v15, %v1113_v44 }
 0x37b   : > { %v2614_v60 = vpack.i.bf16 %v1117_v57, %v1116_v51  ;;  %v832_v61 = vsel %vm5176_vm7, %v2572_v53, %v2573_v52  ;;  %v835_v0 = vsel %vm5176_vm7, %v2573_v52, %v2567_v55  ;;  %v833_v5 = vsel %vm5176_vm7, %v2568_v54, %v2572_v53 }
 0x37c   : > { %2620 = vrot.lane.b32.xlu0 %v2619_v56, %s3195_s30  ;;  %v2586_v14 = vpop.permute.xlu0 %2585  ;;  %v2576_v17 = vpop.permute.xlu1 %2575  ;;  %v838_v18 = vsel %vm3640_vm11, %v3602_v32, %v832_v61  ;;  %v839_v19 = vsel %vm3630_vm9, %v3597_v30, %v835_v0  ;;  %v834_v20 = vsel %vm5176_vm7, %v2567_v55, %v2568_v54  ;;  %v837_v21 = vsel %vm3634_vm10, %v3606_v33, %v833_v5 }
 0x37d   : > { %2615 = vrot.lane.b32.xlu1 %v2614_v60, %s3195_s30  ;;  %v2588_v22 = vunpack.i.h.bf16 %v2586_v14  ;;  %v2587_v25 = vunpack.i.l.bf16 %v2586_v14  ;;  %v2578_v27 = vunpack.i.h.bf16 %v2576_v17  ;;  %v2577_v28 = vunpack.i.l.bf16 %v2576_v17 }
 0x37e   : > { %v2629_v29 = vpack.i.bf16 %v839_v19, %v838_v18  ;;  %v836_v35 = vsel %vm3626_vm8, %v3611_v34, %v834_v20 }
 0x37f   : > { %v2624_v36 = vpack.i.bf16 %v837_v21, %v836_v35  ;;  %v759_v37 = vsel %vm5175_vm12, %v2587_v25, %v2588_v22  ;;  %v760_v38 = vsel %vm5175_vm12, %v2578_v27, %v2587_v25  ;;  %v761_v39 = vsel %vm5175_vm12, %v2577_v28, %v2578_v27 }
 0x380   : > { %2630 = vrot.lane.b32.xlu0 %v2629_v29, %s3195_s30  ;;  %v2591_v40 = vpop.permute.xlu0 %2590  ;;  %v2581_v41 = vpop.permute.xlu1 %2580  ;;  %v765_v42 = vsel %vm3683_vm0, %v3602_v32, %v760_v38  ;;  %v766_v43 = vsel %vm3675_vm14, %v3597_v30, %v759_v37  ;;  %v762_v44 = vsel %vm5175_vm12, %v2588_v22, %v2577_v28  ;;  %v764_v45 = vsel %vm3679_vm15, %v3606_v33, %v761_v39 }
 0x381   : > { %2625 = vrot.lane.b32.xlu1 %v2624_v36, %s3195_s30  ;;  %v2593_v46 = vunpack.i.h.bf16 %v2591_v40  ;;  %v2592_v12 = vunpack.i.l.bf16 %v2591_v40  ;;  %v2583_v49 = vunpack.i.h.bf16 %v2581_v41  ;;  %v2582_v50 = vunpack.i.l.bf16 %v2581_v41 }
 0x382   : > { %v2644_v51 = vpack.i.bf16 %v766_v43, %v765_v42  ;;  %v763_v52 = vsel %vm3671_vm13, %v3611_v34, %v762_v44 }
 0x383   : > { %v2634_v53 = vpack.i.bf16 %v764_v45, %v763_v52  ;;  %v900_v54 = vsel %vm5175_vm12, %v2592_v12, %v2593_v46  ;;  %v901_v55 = vsel %vm5175_vm12, %v2583_v49, %v2592_v12  ;;  %v902_v56 = vsel %vm5175_vm12, %v2582_v50, %v2583_v49 }
 0x384   : > { %2645 = vrot.lane.b32.xlu0 %v2644_v51, %s3196_s25  ;;  %v2601_v57 = vpop.permute.xlu0 %2600  ;;  %v2596_v60 = vpop.permute.xlu1 %2595  ;;  %v906_v61 = vsel %vm3683_vm0, %v3409_v2, %v901_v55  ;;  %v907_v0 = vsel %vm3675_vm14, %v3411_v3, %v900_v54  ;;  %v903_v5 = vsel %vm5175_vm12, %v2593_v46, %v2582_v50  ;;  %v905_v14 = vsel %vm3679_vm15, %v3407_v63, %v902_v56 }
 0x385   : > { %2635 = vrot.lane.b32.xlu1 %v2634_v53, %s3196_s25  ;;  %v2603_v17 = vunpack.i.h.bf16 %v2601_v57  ;;  %v2602_v18 = vunpack.i.l.bf16 %v2601_v57  ;;  %v2598_v19 = vunpack.i.h.bf16 %v2596_v60  ;;  %v2597_v20 = vunpack.i.l.bf16 %v2596_v60 }
 0x386   : > { %v2649_v21 = vpack.i.bf16 %v907_v0, %v906_v61  ;;  %v904_v22 = vsel %vm3671_vm13, %v3405_v62, %v903_v5 }
 0x387   : > { %v2639_v25 = vpack.i.bf16 %v905_v14, %v904_v22  ;;  %v988_v27 = vsel %vm5176_vm7, %v2602_v18, %v2603_v17  ;;  %v991_v28 = vsel %vm5176_vm7, %v2603_v17, %v2597_v20  ;;  %v989_v29 = vsel %vm5176_vm7, %v2598_v19, %v2602_v18 }
 0x388   : > { %2650 = vrot.lane.b32.xlu0 %v2649_v21, %s3196_s25  ;;  %v994_v35 = vsel %vm3640_vm11, %v3409_v2, %v988_v27  ;;  %v995_v36 = vsel %vm3630_vm9, %v3411_v3, %v991_v28  ;;  %v990_v37 = vsel %vm5176_vm7, %v2597_v20, %v2598_v19  ;;  %v993_v38 = vsel %vm3634_vm10, %v3407_v63, %v989_v29 }
 0x389   : > { %2640 = vrot.lane.b32.xlu1 %v2639_v25, %s3196_s25  ;;  %v2659_v39 = vpack.i.bf16 %v995_v36, %v994_v35  ;;  %v992_v40 = vsel %vm3626_vm8, %v3405_v62, %v990_v37 }
 0x38a   : > { %v2654_v41 = vpack.i.bf16 %v993_v38, %v992_v40 }
 0x38c   : > { %2660 = vrot.lane.b32.xlu0 %v2659_v39, %s3195_s30 }
 0x38d   : > { %2655 = vrot.lane.b32.xlu1 %v2654_v41, %s3195_s30 }
 0x3ea   : > { %v2611_v42 = vpop.permute.xlu0 %2610  ;;  %v2606_v43 = vpop.permute.xlu1 %2605 }
 0x3eb   : > { %v2613_v44 = vunpack.i.h.bf16 %v2611_v42  ;;  %v2612_v45 = vunpack.i.l.bf16 %v2611_v42  ;;  %v2608_v46 = vunpack.i.h.bf16 %v2606_v43  ;;  %v2607_v12 = vunpack.i.l.bf16 %v2606_v43 }
 0x3ed   : > { %v1056_v49 = vsel %vm5175_vm12, %v2612_v45, %v2613_v44  ;;  %v1057_v50 = vsel %vm5175_vm12, %v2608_v46, %v2612_v45  ;;  %v1058_v51 = vsel %vm5175_vm12, %v2607_v12, %v2608_v46  ;;  %v1059_v52 = vsel %vm5175_vm12, %v2613_v44, %v2607_v12 }
 0x3ee   : > { %v2621_v53 = vpop.permute.xlu0 %2620  ;;  %v1062_v54 = vsel %vm3683_vm0, %v3565_v4, %v1057_v50  ;;  %v1063_v55 = vsel %vm3675_vm14, %v3583_v16, %v1056_v49  ;;  %v1060_v56 = vsel %vm3671_vm13, %v3571_v13, %v1059_v52  ;;  %v1061_v57 = vsel %vm3679_vm15, %v3578_v15, %v1058_v51 }
 0x3ef   : > { %v2623_v60 = vunpack.i.h.bf16 %v2621_v53  ;;  %v2622_v61 = vunpack.i.l.bf16 %v2621_v53  ;;  %v2616_v0 = vpop.permute.xlu1 %2615  ;;  %v2669_v5 = vpack.i.bf16 %v1063_v55, %v1062_v54  ;;  %v2664_v14 = vpack.i.bf16 %v1061_v57, %v1060_v56 }
 0x3f0   : > { %v2618_v17 = vunpack.i.h.bf16 %v2616_v0  ;;  %v2617_v18 = vunpack.i.l.bf16 %v2616_v0 }
 0x3f1   : > { %2670 = vrot.lane.b32.xlu0 %v2669_v5, %s3196_s25  ;;  %2665 = vrot.lane.b32.xlu1 %v2664_v14, %s3196_s25  ;;  %v1128_v19 = vsel %vm5176_vm7, %v2622_v61, %v2623_v60 }
 0x3f2   : > { %v2631_v20 = vpop.permute.xlu0 %2630  ;;  %v1131_v21 = vsel %vm5176_vm7, %v2623_v60, %v2617_v18  ;;  %v1134_v22 = vsel %vm3640_vm11, %v3565_v4, %v1128_v19  ;;  %v1129_v25 = vsel %vm5176_vm7, %v2618_v17, %v2622_v61  ;;  %v1130_v27 = vsel %vm5176_vm7, %v2617_v18, %v2618_v17 }
 0x3f3   : > { %v2633_v28 = vunpack.i.h.bf16 %v2631_v20  ;;  %v2632_v29 = vunpack.i.l.bf16 %v2631_v20  ;;  %v2626_v35 = vpop.permute.xlu1 %2625  ;;  %v1135_v36 = vsel %vm3630_vm9, %v3583_v16, %v1131_v21  ;;  %v1132_v37 = vsel %vm3626_vm8, %v3571_v13, %v1130_v27 }
 0x3f4   : > { %v2628_v38 = vunpack.i.h.bf16 %v2626_v35  ;;  %v2627_v39 = vunpack.i.l.bf16 %v2626_v35  ;;  %v2679_v40 = vpack.i.bf16 %v1135_v36, %v1134_v22  ;;  %v1133_v41 = vsel %vm3634_vm10, %v3578_v15, %v1129_v25 }
 0x3f5   : > { %v848_v42 = vsel %vm5176_vm7, %v2632_v29, %v2633_v28  ;;  %v2674_v43 = vpack.i.bf16 %v1133_v41, %v1132_v37 }
 0x3f6   : > { %v849_v44 = vsel %vm5176_vm7, %v2628_v38, %v2632_v29  ;;  %v850_v45 = vsel %vm5176_vm7, %v2627_v39, %v2628_v38  ;;  %v851_v46 = vsel %vm5176_vm7, %v2633_v28, %v2627_v39  ;;  %2680 = vrot.lane.b32.xlu0 %v2679_v40, %s3195_s30  ;;  %v2646_v12 = vpop.permute.xlu0 %2645  ;;  %v854_v49 = vsel %vm3640_vm11, %v3602_v32, %v848_v42 }
 0x3f7   : > { %2675 = vrot.lane.b32.xlu1 %v2674_v43, %s3195_s30  ;;  %v2648_v50 = vunpack.i.h.bf16 %v2646_v12  ;;  %v2647_v51 = vunpack.i.l.bf16 %v2646_v12  ;;  %v2636_v52 = vpop.permute.xlu1 %2635  ;;  %v855_v53 = vsel %vm3630_vm9, %v3597_v30, %v851_v46  ;;  %v852_v54 = vsel %vm3626_vm8, %v3611_v34, %v850_v45 }
 0x3f8   : > { %v2638_v55 = vunpack.i.h.bf16 %v2636_v52  ;;  %v2637_v56 = vunpack.i.l.bf16 %v2636_v52  ;;  %v2689_v57 = vpack.i.bf16 %v855_v53, %v854_v49  ;;  %v853_v60 = vsel %vm3634_vm10, %v3606_v33, %v849_v44 }
 0x3f9   : > { %v775_v61 = vsel %vm5175_vm12, %v2647_v51, %v2648_v50  ;;  %v2684_v0 = vpack.i.bf16 %v853_v60, %v852_v54 }
 0x3fa   : > { %v776_v5 = vsel %vm5175_vm12, %v2638_v55, %v2647_v51  ;;  %v777_v14 = vsel %vm5175_vm12, %v2637_v56, %v2638_v55  ;;  %v778_v17 = vsel %vm5175_vm12, %v2648_v50, %v2637_v56  ;;  %2690 = vrot.lane.b32.xlu0 %v2689_v57, %s3195_s30  ;;  %v2651_v18 = vpop.permute.xlu0 %2650  ;;  %v782_v19 = vsel %vm3675_vm14, %v3597_v30, %v775_v61 }
 0x3fb   : > { %2685 = vrot.lane.b32.xlu1 %v2684_v0, %s3195_s30  ;;  %v2653_v20 = vunpack.i.h.bf16 %v2651_v18  ;;  %v2652_v21 = vunpack.i.l.bf16 %v2651_v18  ;;  %v2641_v22 = vpop.permute.xlu1 %2640  ;;  %v781_v25 = vsel %vm3683_vm0, %v3602_v32, %v776_v5  ;;  %v779_v27 = vsel %vm3671_vm13, %v3611_v34, %v778_v17 }
 0x3fc   : > { %v2643_v28 = vunpack.i.h.bf16 %v2641_v22  ;;  %v2642_v29 = vunpack.i.l.bf16 %v2641_v22  ;;  %v2704_v35 = vpack.i.bf16 %v782_v19, %v781_v25  ;;  %v780_v36 = vsel %vm3679_vm15, %v3606_v33, %v777_v14 }
 0x3fd   : > { %v916_v37 = vsel %vm5175_vm12, %v2652_v21, %v2653_v20  ;;  %v2694_v38 = vpack.i.bf16 %v780_v36, %v779_v27 }
 0x3fe   : > { %v917_v39 = vsel %vm5175_vm12, %v2643_v28, %v2652_v21  ;;  %v918_v40 = vsel %vm5175_vm12, %v2642_v29, %v2643_v28  ;;  %v919_v41 = vsel %vm5175_vm12, %v2653_v20, %v2642_v29  ;;  %2705 = vrot.lane.b32.xlu0 %v2704_v35, %s3196_s25  ;;  %v2661_v42 = vpop.permute.xlu0 %2660  ;;  %v923_v43 = vsel %vm3675_vm14, %v3411_v3, %v916_v37 }
 0x3ff   : > { %2695 = vrot.lane.b32.xlu1 %v2694_v38, %s3196_s25  ;;  %v2663_v44 = vunpack.i.h.bf16 %v2661_v42  ;;  %v2662_v45 = vunpack.i.l.bf16 %v2661_v42  ;;  %v2656_v46 = vpop.permute.xlu1 %2655  ;;  %v922_v12 = vsel %vm3683_vm0, %v3409_v2, %v917_v39  ;;  %v920_v49 = vsel %vm3671_vm13, %v3405_v62, %v919_v41 }
 0x400   : > { %v2658_v50 = vunpack.i.h.bf16 %v2656_v46  ;;  %v2657_v51 = vunpack.i.l.bf16 %v2656_v46  ;;  %v2709_v52 = vpack.i.bf16 %v923_v43, %v922_v12  ;;  %v921_v53 = vsel %vm3679_vm15, %v3407_v63, %v918_v40 }
 0x401   : > { %v1004_v54 = vsel %vm5176_vm7, %v2662_v45, %v2663_v44  ;;  %v2699_v55 = vpack.i.bf16 %v921_v53, %v920_v49 }
 0x402   : > { %v1005_v56 = vsel %vm5176_vm7, %v2658_v50, %v2662_v45  ;;  %v1006_v57 = vsel %vm5176_vm7, %v2657_v51, %v2658_v50  ;;  %v1007_v60 = vsel %vm5176_vm7, %v2663_v44, %v2657_v51  ;;  %2710 = vrot.lane.b32.xlu0 %v2709_v52, %s3196_s25  ;;  %v1010_v61 = vsel %vm3640_vm11, %v3409_v2, %v1004_v54 }
 0x403   : > { %2700 = vrot.lane.b32.xlu1 %v2699_v55, %s3196_s25  ;;  %v1011_v0 = vsel %vm3630_vm9, %v3411_v3, %v1007_v60  ;;  %v1008_v5 = vsel %vm3626_vm8, %v3405_v62, %v1006_v57  ;;  %v1009_v14 = vsel %vm3634_vm10, %v3407_v63, %v1005_v56 }
 0x404   : > { %v2719_v17 = vpack.i.bf16 %v1011_v0, %v1010_v61  ;;  %v2714_v18 = vpack.i.bf16 %v1009_v14, %v1008_v5 }
 0x406   : > { %2720 = vrot.lane.b32.xlu0 %v2719_v17, %s3195_s30 }
 0x407   : > { %2715 = vrot.lane.b32.xlu1 %v2714_v18, %s3195_s30 }
 0x463   : > { %v2671_v19 = vpop.permute.xlu0 %2670  ;;  %v2666_v20 = vpop.permute.xlu1 %2665 }
 0x464   : > { %v2673_v21 = vunpack.i.h.bf16 %v2671_v19  ;;  %v2672_v22 = vunpack.i.l.bf16 %v2671_v19  ;;  %v2668_v25 = vunpack.i.h.bf16 %v2666_v20  ;;  %v2667_v27 = vunpack.i.l.bf16 %v2666_v20 }
 0x466   : > { %v1072_v28 = vsel %vm5175_vm12, %v2672_v22, %v2673_v21  ;;  %v1073_v29 = vsel %vm5175_vm12, %v2668_v25, %v2672_v22  ;;  %v1074_v35 = vsel %vm5175_vm12, %v2667_v27, %v2668_v25  ;;  %v1075_v36 = vsel %vm5175_vm12, %v2673_v21, %v2667_v27 }
 0x467   : > { %v1078_v37 = vsel %vm3683_vm0, %v3565_v4, %v1073_v29  ;;  %v1079_v38 = vsel %vm3675_vm14, %v3583_v16, %v1072_v28  ;;  %v1076_v39 = vsel %vm3671_vm13, %v3571_v13, %v1075_v36  ;;  %v1077_v40 = vsel %vm3679_vm15, %v3578_v15, %v1074_v35 }
 0x468   : > { %v2681_v41 = vpop.permute.xlu0 %2680  ;;  %v2729_v42 = vpack.i.bf16 %v1079_v38, %v1078_v37  ;;  %v2724_v43 = vpack.i.bf16 %v1077_v40, %v1076_v39 }
 0x469   : > { %v2683_v44 = vunpack.i.h.bf16 %v2681_v41  ;;  %v2682_v45 = vunpack.i.l.bf16 %v2681_v41  ;;  %v2676_v46 = vpop.permute.xlu1 %2675 }
 0x46a   : > { %v2678_v12 = vunpack.i.h.bf16 %v2676_v46  ;;  %v2677_v49 = vunpack.i.l.bf16 %v2676_v46  ;;  %2730 = vrot.lane.b32.xlu0 %v2729_v42, %s3196_s25  ;;  %2725 = vrot.lane.b32.xlu1 %v2724_v43, %s3196_s25 }
 0x46b   : > { %v1144_v50 = vsel %vm5176_vm7, %v2682_v45, %v2683_v44 }
 0x46c   : > { %v1145_v51 = vsel %vm5176_vm7, %v2678_v12, %v2682_v45  ;;  %v1146_v52 = vsel %vm5176_vm7, %v2677_v49, %v2678_v12  ;;  %v1147_v53 = vsel %vm5176_vm7, %v2683_v44, %v2677_v49  ;;  %v2691_v54 = vpop.permute.xlu0 %2690  ;;  %v1150_v55 = vsel %vm3640_vm11, %v3565_v4, %v1144_v50 }
 0x46d   : > { %v2693_v56 = vunpack.i.h.bf16 %v2691_v54  ;;  %v2692_v57 = vunpack.i.l.bf16 %v2691_v54  ;;  %v2686_v60 = vpop.permute.xlu1 %2685  ;;  %v1151_v61 = vsel %vm3630_vm9, %v3583_v16, %v1147_v53  ;;  %v1148_v0 = vsel %vm3626_vm8, %v3571_v13, %v1146_v52 }
 0x46e   : > { %v2688_v5 = vunpack.i.h.bf16 %v2686_v60  ;;  %v2687_v14 = vunpack.i.l.bf16 %v2686_v60  ;;  %v2739_v17 = vpack.i.bf16 %v1151_v61, %v1150_v55  ;;  %v1149_v18 = vsel %vm3634_vm10, %v3578_v15, %v1145_v51 }
 0x46f   : > { %v864_v19 = vsel %vm5176_vm7, %v2692_v57, %v2693_v56  ;;  %v2734_v20 = vpack.i.bf16 %v1149_v18, %v1148_v0 }
 0x470   : > { %v865_v21 = vsel %vm5176_vm7, %v2688_v5, %v2692_v57  ;;  %v866_v22 = vsel %vm5176_vm7, %v2687_v14, %v2688_v5  ;;  %v867_v25 = vsel %vm5176_vm7, %v2693_v56, %v2687_v14  ;;  %2740 = vrot.lane.b32.xlu0 %v2739_v17, %s3195_s30  ;;  %v2706_v27 = vpop.permute.xlu0 %2705  ;;  %v870_v28 = vsel %vm3640_vm11, %v3602_v32, %v864_v19 }
 0x471   : > { %2735 = vrot.lane.b32.xlu1 %v2734_v20, %s3195_s30  ;;  %v2708_v29 = vunpack.i.h.bf16 %v2706_v27  ;;  %v2707_v35 = vunpack.i.l.bf16 %v2706_v27  ;;  %v2696_v36 = vpop.permute.xlu1 %2695  ;;  %v871_v37 = vsel %vm3630_vm9, %v3597_v30, %v867_v25  ;;  %v868_v38 = vsel %vm3626_vm8, %v3611_v34, %v866_v22 }
 0x472   : > { %v2698_v39 = vunpack.i.h.bf16 %v2696_v36  ;;  %v2697_v40 = vunpack.i.l.bf16 %v2696_v36  ;;  %v2749_v41 = vpack.i.bf16 %v871_v37, %v870_v28  ;;  %v869_v42 = vsel %vm3634_vm10, %v3606_v33, %v865_v21  ;;  %v1288_v28 = vld [vmem:[%s5165_s4] sm:$0xf] }
 0x473   : > { %v791_v43 = vsel %vm5175_vm12, %v2707_v35, %v2708_v29  ;;  %v2744_v44 = vpack.i.bf16 %v869_v42, %v868_v38 }
 0x474   : > { %v792_v45 = vsel %vm5175_vm12, %v2698_v39, %v2707_v35  ;;  %v793_v46 = vsel %vm5175_vm12, %v2697_v40, %v2698_v39  ;;  %v794_v12 = vsel %vm5175_vm12, %v2708_v29, %v2697_v40  ;;  %2750 = vrot.lane.b32.xlu0 %v2749_v41, %s3195_s30  ;;  %v2711_v49 = vpop.permute.xlu0 %2710  ;;  %v798_v50 = vsel %vm3675_vm14, %v3597_v30, %v791_v43 }
 0x475   : > { %2745 = vrot.lane.b32.xlu1 %v2744_v44, %s3195_s30  ;;  %v2713_v51 = vunpack.i.h.bf16 %v2711_v49  ;;  %v2712_v52 = vunpack.i.l.bf16 %v2711_v49  ;;  %v2701_v53 = vpop.permute.xlu1 %2700  ;;  %v797_v54 = vsel %vm3683_vm0, %v3602_v32, %v792_v45  ;;  %v795_v55 = vsel %vm3671_vm13, %v3611_v34, %v794_v12 }
 0x476   : > { %v2703_v56 = vunpack.i.h.bf16 %v2701_v53  ;;  %v2702_v57 = vunpack.i.l.bf16 %v2701_v53  ;;  %v2764_v60 = vpack.i.bf16 %v798_v50, %v797_v54  ;;  %v796_v61 = vsel %vm3679_vm15, %v3606_v33, %v793_v46 }
 0x477   : > { %v932_v0 = vsel %vm5175_vm12, %v2712_v52, %v2713_v51  ;;  %v2754_v5 = vpack.i.bf16 %v796_v61, %v795_v55  ;;  %v1101_v44 = vpack.c.bf16 %v3578_v15, %v3578_v15  ;;  %v1100_v45 = vpack.c.bf16 %v3571_v13, %v3571_v13 }
 0x478   : > { %v933_v14 = vsel %vm5175_vm12, %v2703_v56, %v2712_v52  ;;  %v934_v17 = vsel %vm5175_vm12, %v2702_v57, %v2703_v56  ;;  %v935_v18 = vsel %vm5175_vm12, %v2713_v51, %v2702_v57  ;;  %2765 = vrot.lane.b32.xlu0 %v2764_v60, %s3196_s25  ;;  %v939_v19 = vsel %vm3675_vm14, %v3411_v3, %v932_v0  ;;  %v2721_v29 = vpop.permute.xlu0 %2720 }
 0x479   : > { %2755 = vrot.lane.b32.xlu1 %v2754_v5, %s3196_s25  ;;  %v938_v20 = vsel %vm3683_vm0, %v3409_v2, %v933_v14  ;;  %v936_v21 = vsel %vm3671_vm13, %v3405_v62, %v935_v18  ;;  %v937_v25 = vsel %vm3679_vm15, %v3407_v63, %v934_v17  ;;  %v2716_v35 = vpop.permute.xlu1 %2715  ;;  %v2723_v36 = vunpack.i.h.bf16 %v2721_v29 }
 0x47a   : > { %v2769_v22 = vpack.i.bf16 %v939_v19, %v938_v20  ;;  %v2759_v27 = vpack.i.bf16 %v937_v25, %v936_v21  ;;  %v2722_v37 = vunpack.i.l.bf16 %v2721_v29  ;;  %v2718_v38 = vunpack.i.h.bf16 %v2716_v35 }
 0x47b   : > { %v2717_v39 = vunpack.i.l.bf16 %v2716_v35  ;;  %v1102_v46 = vpack.c.bf16 %v3565_v4, %v3565_v4  ;;  %v1103_v51 = vpack.c.bf16 %v3583_v16, %v3583_v16  ;;  %v960_v52 = vpack.c.bf16 %v3405_v62, %v3405_v62 }
 0x47c   : > { %2770 = vrot.lane.b32.xlu0 %v2769_v22, %s3196_s25  ;;  %v1020_v40 = vsel %vm5176_vm7, %v2722_v37, %v2723_v36  ;;  %v1021_v41 = vsel %vm5176_vm7, %v2718_v38, %v2722_v37  ;;  %v820_v53 = vpack.c.bf16 %v3606_v33, %v3606_v33  ;;  %v822_v54 = vpack.c.bf16 %v3597_v30, %v3597_v30 }
 0x47d   : > { %2760 = vrot.lane.b32.xlu1 %v2759_v27, %s3196_s25  ;;  %v1023_v42 = vsel %vm5176_vm7, %v2723_v36, %v2717_v39  ;;  %v1022_v43 = vsel %vm5176_vm7, %v2717_v39, %v2718_v38  ;;  %v1026_v12 = vsel %vm3640_vm11, %v3409_v2, %v1020_v40  ;;  %v1025_v49 = vsel %vm3634_vm10, %v3407_v63, %v1021_v41 }
 0x47e   : > { %v1027_v50 = vsel %vm3630_vm9, %v3411_v3, %v1023_v42  ;;  %v1024_v55 = vsel %vm3626_vm8, %v3405_v62, %v1022_v43  ;;  %v961_v56 = vpack.c.bf16 %v3407_v63, %v3407_v63  ;;  %v963_v57 = vpack.c.bf16 %v3411_v3, %v3411_v3 }
 0x47f   : > { %v962_v60 = vpack.c.bf16 %v3409_v2, %v3409_v2  ;;  %v1030_v61 = vpack.c.bf16 %v1026_v12, %v1026_v12  ;;  %v1029_v0 = vpack.c.bf16 %v1025_v49, %v1025_v49  ;;  %v1031_v5 = vpack.c.bf16 %v1027_v50, %v1027_v50 }
 0x480   : > { %v4104_v14 = vrot.slane %v1100_v45, 2  ;;  %v4106_v17 = vrot.slane %v1101_v44, 2  ;;  %v4108_v18 = vrot.slane %v1103_v51, 2  ;;  %v4110_v19 = vrot.slane %v1102_v46, 2 }
 0x481   : > { %1291 = vperm.xlu1 %2774, %v1288_v28   ;;  %v819_v20 = vpack.c.bf16 %v3611_v34, %v3611_v34  ;;  %v1028_v21 = vpack.c.bf16 %v1024_v55, %v1024_v55  ;;  %v4114_v27 = vrot.slane %v820_v53, 6  ;;  %v4116_v28 = vrot.slane %v822_v54, 6 }
 0x482   : > { %v821_v29 = vpack.c.bf16 %v3602_v32, %v3602_v32  ;;  %v1202_v39 = vrot.slane %v1030_v61, 6  ;;  %v1201_v40 = vrot.slane %v1029_v0, 6  ;;  %v1203_v41 = vrot.slane %v1031_v5, 6 }
 0x483   : > { %v1200_v46 = vrot.slane %v1028_v21, 6  ;;  %v4141_v5 = vrot.slane %v819_v20, 6 }
 0x484   : > { %v1263_v0 = vsel %vm5180_vm4, %v962_v60, %v1202_v39  ;;  %v4143_v21 = vrot.slane %v821_v29, 6 }
 0x4dc   : > { %v2731_v22 = vpop.permute.xlu0 %2730  ;;  %v2726_v25 = vpop.permute.xlu1 %2725 }
 0x4dd   : > { %v2733_v35 = vunpack.i.h.bf16 %v2731_v22  ;;  %v2732_v36 = vunpack.i.l.bf16 %v2731_v22  ;;  %v2728_v37 = vunpack.i.h.bf16 %v2726_v25  ;;  %v2727_v38 = vunpack.i.l.bf16 %v2726_v25 }
 0x4df   : > { %v1088_v42 = vsel %vm5175_vm12, %v2732_v36, %v2733_v35  ;;  %v1089_v43 = vsel %vm5175_vm12, %v2728_v37, %v2732_v36  ;;  %v1090_v44 = vsel %vm5175_vm12, %v2727_v38, %v2728_v37  ;;  %v1091_v45 = vsel %vm5175_vm12, %v2733_v35, %v2727_v38 }
 0x4e0   : > { %v1094_v12 = vsel %vm3683_vm0, %v3565_v4, %v1089_v43  ;;  %v1092_v49 = vsel %vm3671_vm13, %v3571_v13, %v1091_v45  ;;  %v1093_v50 = vsel %vm3679_vm15, %v3578_v15, %v1090_v44  ;;  %v1095_v51 = vsel %vm3675_vm14, %v3583_v16, %v1088_v42 }
 0x4e1   : > { %v1098_v53 = vpack.c.bf16 %v1094_v12, %v1094_v12  ;;  %v1096_v54 = vpack.c.bf16 %v1092_v49, %v1092_v49  ;;  %v1097_v55 = vpack.c.bf16 %v1093_v50, %v1093_v50  ;;  %v1260_v36 = vsel %vm5180_vm4, %v961_v56, %v1201_v40 }
 0x4e2   : > { %v2741_v61 = vpop.permute.xlu0 %2740  ;;  %v4147_v37 = vsel %vm5180_vm4, %v963_v57, %v1203_v41  ;;  %v1099_v38 = vpack.c.bf16 %v1095_v51, %v1095_v51  ;;  %v1257_v44 = vsel %vm5180_vm4, %v960_v52, %v1200_v46 }
 0x4e3   : > { %v2743_v22 = vunpack.i.h.bf16 %v2741_v61  ;;  %v2742_v25 = vunpack.i.l.bf16 %v2741_v61  ;;  %v2736_v35 = vpop.permute.xlu1 %2735  ;;  %v1210_v45 = vrot.slane %v1098_v53, 4  ;;  %v1208_v12 = vrot.slane %v1096_v54, 4 }
 0x4e4   : > { %v2738_v42 = vunpack.i.h.bf16 %v2736_v35  ;;  %v2737_v43 = vunpack.i.l.bf16 %v2736_v35  ;;  %v1209_v20 = vrot.slane %v1097_v55, 4 }
 0x4e5   : > { %v1160_v60 = vsel %vm5176_vm7, %v2742_v25, %v2743_v22 }
 0x4e6   : > { %v1161_v29 = vsel %vm5176_vm7, %v2738_v42, %v2742_v25  ;;  %v1162_v56 = vsel %vm5176_vm7, %v2737_v43, %v2738_v42  ;;  %v1163_v57 = vsel %vm5176_vm7, %v2743_v22, %v2737_v43  ;;  %v2751_v39 = vpop.permute.xlu0 %2750  ;;  %v1166_v52 = vsel %vm3640_vm11, %v3565_v4, %v1160_v60 }
 0x4e7   : > { %v2753_v40 = vunpack.i.h.bf16 %v2751_v39  ;;  %v2752_v41 = vunpack.i.l.bf16 %v2751_v39  ;;  %v2746_v46 = vpop.permute.xlu1 %2745  ;;  %v1165_v49 = vsel %vm3634_vm10, %v3578_v15, %v1161_v29  ;;  %v1167_v50 = vsel %vm3630_vm9, %v3583_v16, %v1163_v57 }
 0x4e8   : > { %v2748_v51 = vunpack.i.h.bf16 %v2746_v46  ;;  %v2747_v53 = vunpack.i.l.bf16 %v2746_v46  ;;  %v1169_v54 = vpack.c.bf16 %v1165_v49, %v1165_v49  ;;  %v1171_v55 = vpack.c.bf16 %v1167_v50, %v1167_v50 }
 0x4e9   : > { %v880_v61 = vsel %vm5176_vm7, %v2752_v41, %v2753_v40  ;;  %v1170_v4 = vpack.c.bf16 %v1166_v52, %v1166_v52  ;;  %v1211_v22 = vrot.slane %v1099_v38, 4  ;;  %v1268_v25 = vsel %vm5179_vm1, %v1257_v44, %v1208_v12 }
 0x4ea   : > { %v4173_v35 = vsel %vm3640_vm11, %v3602_v32, %v880_v61  ;;  %v881_v15 = vsel %vm5176_vm7, %v2748_v51, %v2752_v41  ;;  %v882_v16 = vsel %vm5176_vm7, %v2747_v53, %v2748_v51  ;;  %v883_v42 = vsel %vm5176_vm7, %v2753_v40, %v2747_v53  ;;  %2365 = vmatprep.subr.msk.bf16.mxu0 %vm5180_vm4, %v1169_v54  ;;  %v2766_v43 = vpop.permute.xlu0 %2765 }
 0x4eb   : > { %v885_v38 = vsel %vm3634_vm10, %v3606_v33, %v881_v15  ;;  %v4188_v44 = vsel %vm3626_vm8, %v3611_v34, %v882_v16  ;;  %v887_v12 = vsel %vm3630_vm9, %v3597_v30, %v883_v42  ;;  %2367 = vmatprep.subr.msk.bf16.mxu1 %vm5180_vm4, %v1171_v55  ;;  %v2756_v60 = vpop.permute.xlu1 %2755  ;;  %v1164_v29 = vsel %vm3626_vm8, %v3571_v13, %v1162_v56 }
 0x4ec   : > { %v890_v57 = vpack.c.bf16 %v4173_v35, %v4173_v35  ;;  %v2768_v39 = vunpack.i.h.bf16 %v2766_v43  ;;  %v1270_v52 = vsel %vm5179_vm1, %v1260_v36, %v1209_v20  ;;  %v1272_v40 = vsel %vm5179_vm1, %v1263_v0, %v1210_v45 }
 0x4ed   : > { %v889_v41 = vpack.c.bf16 %v885_v38, %v885_v38  ;;  %v2767_v46 = vunpack.i.l.bf16 %v2766_v43  ;;  %v2758_v49 = vunpack.i.h.bf16 %v2756_v60  ;;  %v2757_v50 = vunpack.i.l.bf16 %v2756_v60 }
 0x4ee   : > { %v888_v51 = vpack.c.bf16 %v4188_v44, %v4188_v44  ;;  %v891_v53 = vpack.c.bf16 %v887_v12, %v887_v12  ;;  %v1168_v54 = vpack.c.bf16 %v1164_v29, %v1164_v29  ;;  %v1305_v55 = vsel %vm5180_vm4, %v1170_v4, 0  ;;  %v2771_v45 = vpop.permute.xlu0 %2770 }
 0x4ef   : > { %vm5218_vm7 = vcmp.lt.s32.totalorder %v3430_v9, 1  ;;  %1362 = vmatpush1.bf16.msra.mxu1 %v1305_v55  ;;  %v2761_v15 = vpop.permute.xlu1 %2760  ;;  %v2773_v44 = vunpack.i.h.bf16 %v2771_v45  ;;  %v2772_v12 = vunpack.i.l.bf16 %v2771_v45 }
 0x4f0   : > { %v807_v13 = vsel %vm5218_vm7, %v2767_v46, %v2768_v39  ;;  %vm5219_vm12 = vmmov %vm5218_vm7  ;;  %v2762_v29 = vunpack.i.l.bf16 %v2761_v15 }
 0x4f1   : > { %v808_v56 = vsel %vm5219_vm12, %v2758_v49, %v2767_v46  ;;  %vm5220_vm10 = vmmov %vm5218_vm7  ;;  %v814_v20 = vsel %vm3675_vm14, %v3597_v30, %v807_v13  ;;  %v1299_v30 = vsel %vm5180_vm4, %v1168_v54, 0  ;;  %v1187_v54 = vrot.slane %v891_v53, 4 }
 0x4f2   : > { %v809_v0 = vsel %vm5220_vm10, %v2757_v50, %v2758_v49  ;;  %vm5221_vm1 = vmmov %vm5218_vm7  ;;  %v813_v61 = vsel %vm3683_vm0, %v3602_v32, %v808_v56  ;;  %v818_v16 = vpack.c.bf16 %v814_v20, %v814_v20  ;;  %vm5223_vm7 = vcmask 1043456   ;;  %1321 = vmatpush1.bf16.msra.mxu0 %v1299_v30 }
 0x4f3   : > { %v810_v36 = vsel %vm5221_vm1, %v2768_v39, %v2757_v50  ;;  %v812_v35 = vsel %vm3679_vm15, %v3606_v33, %v809_v0  ;;  %v817_v42 = vpack.c.bf16 %v813_v61, %v813_v61  ;;  %vm5222_vm1 = vcmask 1045504  }
 0x4f4   : > { %v811_v4 = vsel %vm3671_vm13, %v3611_v34, %v810_v36  ;;  %v816_v43 = vpack.c.bf16 %v812_v35, %v812_v35  ;;  %v1279_v38 = vsel %vm5222_vm1, %v1270_v52, %v4106_v17  ;;  %v1274_v32 = vsel %vm5223_vm7, %v4147_v37, %v1211_v22  ;;  %vm5224_vm10 = vmmov %vm5222_vm1 }
 0x4f5   : > { %v815_v60 = vpack.c.bf16 %v811_v4, %v811_v4  ;;  %v1285_v34 = vsel %vm5224_vm10, %v1274_v32, %v4108_v18  ;;  %v2763_v33 = vunpack.i.h.bf16 %v2761_v15  ;;  %1322 = vmatprep.subr.bf16.mxu0 %v1279_v38  ;;  %v948_v39 = vsel %vm5219_vm12, %v2772_v12, %v2773_v44  ;;  %vm5225_vm4 = vmmov %vm5222_vm1 }
 0x4f6   : > { %1363 = vmatprep.subr.bf16.mxu1 %v1285_v34  ;;  %v1276_v17 = vsel %vm5222_vm1, %v1268_v25, %v4104_v14  ;;  %v1282_v37 = vsel %vm5225_vm4, %v1272_v40, %v4110_v19  ;;  %v1185_v22 = vrot.slane %v889_v41, 4  ;;  %vm5226_vm7 = vmmov %vm5219_vm12  ;;  %v955_v49 = vsel %vm3675_vm14, %v3411_v3, %v948_v39 }
 0x4f7   : > { %v949_v52 = vsel %vm5226_vm7, %v2763_v33, %v2772_v12  ;;  %vm5227_vm8 = vmmov %vm5226_vm7  ;;  %1364 = vmatpush1.bf16.msra.mxu1 %v1282_v37  ;;  %vm5229_vm4 = vcmask 1041408   ;;  %1323 = vmatpush1.bf16.msra.mxu0 %v1276_v17  ;;  %v959_v50 = vpack.c.bf16 %v955_v49, %v955_v49  ;;  %v1186_v56 = vrot.slane %v890_v57, 4 }
 0x4f8   : > { %v950_v18 = vsel %vm5227_vm8, %v2762_v29, %v2763_v33  ;;  %vm5228_vm10 = vmmov %vm5226_vm7  ;;  %v954_v14 = vsel %vm3683_vm0, %v3409_v2, %v949_v52  ;;  %v1226_v40 = vsel %vm5229_vm4, %v816_v43, %v4114_v27  ;;  %vm5233_vm7 = vcmask 1043456  }
 0x4f9   : > { %v951_v46 = vsel %vm5228_vm10, %v2773_v44, %v2762_v29  ;;  %v953_v25 = vsel %vm3679_vm15, %v3407_v63, %v950_v18  ;;  %vm5230_vm8 = vmmov %vm5229_vm4  ;;  %v958_v13 = vpack.c.bf16 %v954_v14, %v954_v14  ;;  %v1184_v63 = vrot.slane %v888_v51, 4  ;;  %v1287_v51 = vld [vmem:[%s5164_s3] sm:$0x3] }
 0x4fa   : > { %v952_v19 = vsel %vm3671_vm13, %v3405_v62, %v951_v46  ;;  %v957_v41 = vpack.c.bf16 %v953_v25, %v953_v25  ;;  %v1232_v3 = vsel %vm5230_vm8, %v818_v16, %v4116_v28  ;;  %vm5231_vm12 = vmmov %vm5229_vm4  ;;  %v1195_v36 = vrot.slane %v959_v50, 2 }
 0x4fb   : > { %v956_v55 = vpack.c.bf16 %v952_v19, %v952_v19  ;;  %v1223_v2 = vsel %vm5231_vm12, %v815_v60, %v4141_v5  ;;  %vm5232_vm1 = vmmov %vm5229_vm4  ;;  %v1237_v27 = vsel %vm5233_vm7, %v1226_v40, %v1185_v22  ;;  %v1194_v20 = vrot.slane %v958_v13, 2 }
 0x4fc   : > { %v1229_v62 = vsel %vm5232_vm1, %v817_v42, %v4143_v21  ;;  %v1193_v0 = vrot.slane %v957_v41, 2  ;;  %vm5234_vm10 = vmmov %vm5233_vm7  ;;  %vm5235_vm4 = vcmask 1045504   ;;  %v1292_v35 = vpop.permute.xlu1 %1291 }
 0x4fd   : > { %v1241_v45 = vsel %vm5234_vm10, %v1232_v3, %v1187_v54  ;;  %v1192_v53 = vrot.slane %v956_v55, 2  ;;  %vm5236_vm8 = vmmov %vm5235_vm4 }
 0x4fe   : > { %v1247_v28 = vsel %vm5235_vm4, %v1237_v27, %v1193_v0  ;;  %v1253_v61 = vsel %vm5236_vm8, %v1241_v45, %v1195_v36  ;;  %vm5237_vm15 = vmmov %vm5233_vm7  ;;  %vm5245_vm8 = vcmp.lt.s32.totalorder %v3430_v9, 16 }
 0x4ff   : > { %v1235_v5 = vsel %vm5237_vm15, %v1223_v2, %v1184_v63  ;;  %vm5238_vm12 = vmmov %vm5233_vm7  ;;  %1324 = vmatprep.subr.bf16.mxu0 %v1247_v28  ;;  %1365 = vmatprep.subr.bf16.mxu1 %v1253_v61  ;;  %vm1294_vm7 = vcmask 293888  }
 0x500   : > { %v1239_v4 = vsel %vm5238_vm12, %v1229_v62, %v1186_v56  ;;  %vm5239_vm1 = vmmov %vm5235_vm4 }
 0x501   : > { %v1244_v21 = vsel %vm5239_vm1, %v1235_v5, %v1192_v53  ;;  %vm5240_vm13 = vmmov %vm5239_vm1 }
 0x502   : > { %v1250_v57 = vsel %vm5240_vm13, %v1239_v4, %v1194_v20  ;;  %1325 = vmatpush1.bf16.msra.mxu0 %v1244_v21  ;;  %vm5241_vm13 = vcmp.lt.s32.totalorder %v3430_v9, 112  ;;  %vm5246_vm12 = vmmov %vm5245_vm8 }
 0x503   : > { %1366 = vmatpush1.bf16.msra.mxu1 %v1250_v57  ;;  %vm5242_vm15 = vmmov %vm5241_vm13 }
 0x504   : > { %vm5243_vm10 = vmmov %vm5241_vm13 }
 0x505   : > { %2366 = vmatmul.mubr.msk.bf16.vlgmr.msra.gmra.mxu0 %vm1294_vm7, %v1287_v51  ;;  %vm5244_vm4 = vmmov %vm5243_vm10 }
 0x506   : > { %2368 = vmatmul.mubr.msk.bf16.vlgmr.msra.gmra.mxu1 %vm1294_vm7, %v1287_v51  ;;  %2110 = vmatprep.mubr.bf16.mxu0 %v3192_v1  ;;  %vm5247_vm1 = vmmov %vm5245_vm8 }
 0x507   : > { %2151 = vmatprep.mubr.bf16.mxu1 %v3192_v1 }
 0x5c5   : > { %v1344_v15 = vpop.f32.mrf.mxu0 }
 0x5c6   : > { %v1385_v16 = vpop.f32.mrf.mxu1  ;;  %v1345_v42 = vadd.f32 %v1344_v15, %v1292_v35 }
 0x5c7   : > { %v1386_v43 = vadd.f32 %v1385_v16, %v1292_v35  ;;  %v1346_v38 = vpop.f32.mrf.mxu0 }
 0x5c8   : > { %v1387_v30 = vpop.f32.mrf.mxu1  ;;  %v1347_v32 = vadd.f32 %v1346_v38, %v1292_v35  ;;  %v4278_v34 = vmax.f32 %v1345_v42, 0.0 }
 0x5c9   : > { %v1388_v44 = vadd.f32 %v1387_v30, %v1292_v35  ;;  %v1348_v12 = vpop.f32.mrf.mxu0  ;;  %v4280_v33 = vmax.f32 %v1386_v43, 0.0 }
 0x5ca   : > { %v1389_v60 = vpop.f32.mrf.mxu1  ;;  %v4282_v29 = vmax.f32 %v1347_v32, 0.0 }
 0x5cb   : > { %v4284_v39 = vmax.f32 %v1388_v44, 0.0  ;;  %v1349_v1 = vpop.f32.mrf.mxu0 }
 0x5cc   : > { %v1390_v17 = vpop.f32.mrf.mxu1  ;;  %v4292_v22 = vpack.i.bf16 %v4282_v29, %v4278_v34 }
 0x5cd   : > { %v4288_v37 = vpack.i.bf16 %v4284_v39, %v4280_v33 }
 0x5ce   : > { %2776 = vrot.lane.b32.xlu0 %v4292_v22, %s3193_s17 }
 0x5cf   : > { %2781 = vrot.lane.b32.xlu1 %v4288_v37, %s3193_s17 }
 0x5d2   : > { %2786 = vrot.lane.b32.xlu0 %v4292_v22, %s3194_s24 }
 0x5d3   : > { %2791 = vrot.lane.b32.xlu1 %v4288_v37, %s3194_s24 }
 0x640   : > { %v2777_v18 = vpop.permute.xlu0 %2776 }
 0x641   : > { %v2782_v52 = vpop.permute.xlu1 %2781  ;;  %v2779_v14 = vunpack.i.h.bf16 %v2777_v18  ;;  %v2778_v19 = vunpack.i.l.bf16 %v2777_v18 }
 0x642   : > { %v2784_v46 = vunpack.i.h.bf16 %v2782_v52  ;;  %v2783_v49 = vunpack.i.l.bf16 %v2782_v52 }
 0x643   : > { %v1470_v50 = vsel %vm5244_vm4, %v2778_v19, %v2779_v14 }
 0x644   : > { %v1469_v25 = vsel %vm5241_vm13, %v2779_v14, %v2783_v49  ;;  %v1471_v40 = vsel %vm5242_vm15, %v2784_v46, %v2778_v19  ;;  %v1468_v41 = vsel %vm5243_vm10, %v2783_v49, %v2784_v46  ;;  %v2787_v3 = vpop.permute.xlu0 %2786  ;;  %vm5248_vm13 = vmmov %vm5247_vm1 }
 0x645   : > { %v2792_v54 = vpop.permute.xlu1 %2791  ;;  %v1475_v55 = vsel %vm3446_vm2, %v4284_v39, %v1471_v40  ;;  %v1473_v2 = vsel %vm3450_vm3, %v4282_v29, %v1469_v25  ;;  %v2789_v56 = vunpack.i.h.bf16 %v2787_v3  ;;  %v2788_v63 = vunpack.i.l.bf16 %v2787_v3  ;;  %vm5249_vm15 = vmmov %vm5244_vm4 }
 0x646   : > { %v2794_v13 = vunpack.i.h.bf16 %v2792_v54  ;;  %v2793_v62 = vunpack.i.l.bf16 %v2792_v54  ;;  %v2800_v0 = vpack.i.bf16 %v1475_v55, %v1468_v41  ;;  %v2795_v36 = vpack.i.bf16 %v1473_v2, %v1470_v50  ;;  %vm5250_vm10 = vmmov %vm5244_vm4 }
 0x647   : > { %v1406_v20 = vsel %vm5248_vm13, %v2788_v63, %v2789_v56  ;;  %vm5253_vm13 = vmmov %vm5247_vm1 }
 0x648   : > { %v1405_v27 = vsel %vm5245_vm8, %v2789_v56, %v2793_v62  ;;  %v1407_v45 = vsel %vm5246_vm12, %v2794_v13, %v2788_v63  ;;  %v1404_v53 = vsel %vm5247_vm1, %v2793_v62, %v2794_v13  ;;  %2801 = vrot.lane.b32.xlu1 %v2800_v0, %s3193_s17  ;;  %2796 = vrot.lane.b32.xlu0 %v2795_v36, %s3193_s17  ;;  %vm5251_vm8 = vmmov %vm5244_vm4 }
 0x649   : > { %v1410_v28 = vsel %vm3457_vm5, %v4280_v33, %v1405_v27  ;;  %v1408_v61 = vsel %vm3467_vm6, %v4278_v34, %v1407_v45  ;;  %vm5252_vm12 = vmmov %vm5247_vm1 }
 0x64a   : > { %v2810_v5 = vpack.i.bf16 %v1404_v53, %v1410_v28  ;;  %v2805_v4 = vpack.i.bf16 %v1406_v20, %v1408_v61 }
 0x64c   : > { %2811 = vrot.lane.b32.xlu1 %v2810_v5, %s3194_s24  ;;  %2806 = vrot.lane.b32.xlu0 %v2805_v4, %s3194_s24 }
 0x6ba   : > { %v2802_v21 = vpop.permute.xlu1 %2801  ;;  %v2797_v57 = vpop.permute.xlu0 %2796 }
 0x6bb   : > { %v2804_v51 = vunpack.i.h.bf16 %v2802_v21  ;;  %v2803_v35 = vunpack.i.l.bf16 %v2802_v21  ;;  %v2799_v15 = vunpack.i.h.bf16 %v2797_v57  ;;  %v2798_v16 = vunpack.i.l.bf16 %v2797_v57 }
 0x6bd   : > { %v1485_v42 = vsel %vm5249_vm15, %v2799_v15, %v2803_v35  ;;  %v1487_v43 = vsel %vm5250_vm10, %v2804_v51, %v2798_v16  ;;  %v1484_v38 = vsel %vm5244_vm4, %v2803_v35, %v2804_v51  ;;  %v1486_v30 = vsel %vm5251_vm8, %v2798_v16, %v2799_v15  ;;  %vm5254_vm15 = vmmov %vm5247_vm1 }
 0x6be   : > { %v2812_v32 = vpop.permute.xlu1 %2811  ;;  %v2807_v44 = vpop.permute.xlu0 %2806  ;;  %v1491_v12 = vsel %vm3446_vm2, %v4284_v39, %v1487_v43  ;;  %v1489_v60 = vsel %vm3450_vm3, %v4282_v29, %v1485_v42  ;;  %vm5255_vm10 = vmmov %vm5244_vm4 }
 0x6bf   : > { %v2814_v1 = vunpack.i.h.bf16 %v2812_v32  ;;  %v2813_v17 = vunpack.i.l.bf16 %v2812_v32  ;;  %v2809_v52 = vunpack.i.h.bf16 %v2807_v44  ;;  %v2808_v18 = vunpack.i.l.bf16 %v2807_v44  ;;  %vm5256_vm8 = vmmov %vm5244_vm4 }
 0x6c0   : > { %v2820_v46 = vpack.i.bf16 %v1491_v12, %v1484_v38  ;;  %v2815_v49 = vpack.i.bf16 %v1489_v60, %v1486_v30 }
 0x6c1   : > { %v1421_v14 = vsel %vm5252_vm12, %v2809_v52, %v2813_v17  ;;  %v1423_v19 = vsel %vm5247_vm1, %v2814_v1, %v2808_v18  ;;  %v1420_v25 = vsel %vm5253_vm13, %v2813_v17, %v2814_v1  ;;  %v1422_v40 = vsel %vm5254_vm15, %v2808_v18, %v2809_v52  ;;  %vm5257_vm12 = vmmov %vm5244_vm4 }
 0x6c2   : > { %2821 = vrot.lane.b32.xlu1 %v2820_v46, %s3193_s17  ;;  %2816 = vrot.lane.b32.xlu0 %v2815_v49, %s3193_s17  ;;  %v1426_v41 = vsel %vm3457_vm5, %v4280_v33, %v1421_v14  ;;  %v1424_v50 = vsel %vm3467_vm6, %v4278_v34, %v1423_v19  ;;  %vm5258_vm13 = vmmov %vm5247_vm1 }
 0x6c3   : > { %v2830_v54 = vpack.i.bf16 %v1420_v25, %v1426_v41  ;;  %v2825_v3 = vpack.i.bf16 %v1422_v40, %v1424_v50  ;;  %vm5259_vm15 = vmmov %vm5247_vm1 }
 0x6c6   : > { %2831 = vrot.lane.b32.xlu1 %v2830_v54, %s3194_s24  ;;  %2826 = vrot.lane.b32.xlu0 %v2825_v3, %s3194_s24 }
 0x734   : > { %v2822_v55 = vpop.permute.xlu1 %2821  ;;  %v2817_v2 = vpop.permute.xlu0 %2816 }
 0x735   : > { %v2824_v13 = vunpack.i.h.bf16 %v2822_v55  ;;  %v2823_v62 = vunpack.i.l.bf16 %v2822_v55  ;;  %v2819_v56 = vunpack.i.h.bf16 %v2817_v2  ;;  %v2818_v63 = vunpack.i.l.bf16 %v2817_v2 }
 0x737   : > { %v1501_v0 = vsel %vm5255_vm10, %v2819_v56, %v2823_v62  ;;  %v1503_v36 = vsel %vm5244_vm4, %v2824_v13, %v2818_v63  ;;  %v1500_v27 = vsel %vm5256_vm8, %v2823_v62, %v2824_v13  ;;  %v1502_v45 = vsel %vm5257_vm12, %v2818_v63, %v2819_v56  ;;  %vm5260_vm10 = vmmov %vm5247_vm1 }
 0x738   : > { %v2832_v53 = vpop.permute.xlu1 %2831  ;;  %v2827_v20 = vpop.permute.xlu0 %2826  ;;  %v1507_v28 = vsel %vm3446_vm2, %v4284_v39, %v1503_v36  ;;  %v1505_v61 = vsel %vm3450_vm3, %v4282_v29, %v1501_v0  ;;  %vm5261_vm8 = vmmov %vm5244_vm4 }
 0x739   : > { %v2834_v5 = vunpack.i.h.bf16 %v2832_v53  ;;  %v2833_v4 = vunpack.i.l.bf16 %v2832_v53  ;;  %v2829_v21 = vunpack.i.h.bf16 %v2827_v20  ;;  %v2828_v57 = vunpack.i.l.bf16 %v2827_v20  ;;  %vm5262_vm12 = vmmov %vm5244_vm4 }
 0x73a   : > { %v2840_v51 = vpack.i.bf16 %v1507_v28, %v1500_v27  ;;  %v2835_v35 = vpack.i.bf16 %v1505_v61, %v1502_v45 }
 0x73b   : > { %v1437_v15 = vsel %vm5247_vm1, %v2829_v21, %v2833_v4  ;;  %v1439_v16 = vsel %vm5258_vm13, %v2834_v5, %v2828_v57  ;;  %v1436_v42 = vsel %vm5259_vm15, %v2833_v4, %v2834_v5  ;;  %v1438_v43 = vsel %vm5260_vm10, %v2828_v57, %v2829_v21  ;;  %vm5263_vm1 = vmmov %vm5244_vm4 }
 0x73c   : > { %2841 = vrot.lane.b32.xlu1 %v2840_v51, %s3193_s17  ;;  %2836 = vrot.lane.b32.xlu0 %v2835_v35, %s3193_s17  ;;  %v1442_v38 = vsel %vm3457_vm5, %v4280_v33, %v1437_v15  ;;  %v1440_v30 = vsel %vm3467_vm6, %v4278_v34, %v1439_v16 }
 0x73d   : > { %v2850_v32 = vpack.i.bf16 %v1436_v42, %v1442_v38  ;;  %v2845_v44 = vpack.i.bf16 %v1438_v43, %v1440_v30 }
 0x740   : > { %2851 = vrot.lane.b32.xlu1 %v2850_v32, %s3194_s24  ;;  %2846 = vrot.lane.b32.xlu0 %v2845_v44, %s3194_s24 }
 0x744   : > { %2861 = vrot.lane.b32.xlu1 %v4288_v37, %s3195_s30  ;;  %2856 = vrot.lane.b32.xlu0 %v4292_v22, %s3195_s30 }
 0x7ae   : > { %v2842_v12 = vpop.permute.xlu1 %2841  ;;  %v2837_v60 = vpop.permute.xlu0 %2836 }
 0x7af   : > { %v2844_v1 = vunpack.i.h.bf16 %v2842_v12  ;;  %v2843_v17 = vunpack.i.l.bf16 %v2842_v12  ;;  %v2839_v52 = vunpack.i.h.bf16 %v2837_v60  ;;  %v2838_v18 = vunpack.i.l.bf16 %v2837_v60 }
 0x7b1   : > { %v4404_v46 = vsel %vm5244_vm4, %v2843_v17, %v2844_v1  ;;  %v1517_v49 = vsel %vm5261_vm8, %v2839_v52, %v2843_v17  ;;  %v4410_v14 = vsel %vm5262_vm12, %v2838_v18, %v2839_v52  ;;  %v1519_v19 = vsel %vm5263_vm1, %v2844_v1, %v2838_v18 }
 0x7b2   : > { %v4417_v25 = vsel %vm3450_vm3, %v4282_v29, %v1517_v49  ;;  %v4422_v40 = vsel %vm3446_vm2, %v4284_v39, %v1519_v19  ;;  %v2852_v41 = vpop.permute.xlu1 %2851  ;;  %v2847_v50 = vpop.permute.xlu0 %2846  ;;  %vm5264_vm3 = vmmov %vm5260_vm10  ;;  %vm5272_vm8 = vnez %v5203_v47  ;;  %vm5273_vm12 = vnez %v5207_v11 }
 0x7b3   : > { %v2854_v54 = vunpack.i.h.bf16 %v2852_v41  ;;  %v2853_v3 = vunpack.i.l.bf16 %v2852_v41  ;;  %v2849_v55 = vunpack.i.h.bf16 %v2847_v50  ;;  %v2848_v2 = vunpack.i.l.bf16 %v2847_v50  ;;  %vm5265_vm13 = vmmov %vm5264_vm3 }
 0x7b4   : > { %v2870_v13 = vpack.i.bf16 %v4422_v40, %v4404_v46  ;;  %v2865_v62 = vpack.i.bf16 %v4417_v25, %v4410_v14  ;;  %vm5266_vm2 = vmmov %vm5264_vm3  ;;  %vm5274_vm1 = vcmp.lt.s32.totalorder %v3430_v9, 1 }
 0x7b5   : > { %v1453_v24 = vsel %vm5264_vm3, %v2849_v55, %v2853_v3  ;;  %v1455_v23 = vsel %vm5265_vm13, %v2854_v54, %v2848_v2  ;;  %v4436_v56 = vsel %vm5266_vm2, %v2853_v3, %v2854_v54  ;;  %vm5267_vm15 = vmmov %vm5266_vm2 }
 0x7b6   : > { %2871 = vrot.lane.b32.xlu1 %v2870_v13, %s3196_s25  ;;  %2866 = vrot.lane.b32.xlu0 %v2865_v62, %s3196_s25  ;;  %v4441_v63 = vsel %vm3457_vm5, %v4280_v33, %v1453_v24  ;;  %v4445_v0 = vsel %vm5267_vm15, %v2848_v2, %v2849_v55  ;;  %v4450_v36 = vsel %vm3467_vm6, %v4278_v34, %v1455_v23  ;;  %v2862_v27 = vpop.permute.xlu1 %2861  ;;  %v2857_v45 = vpop.permute.xlu0 %2856  ;;  %vm5268_vm5 = vcmp.lt.s32.totalorder %v3430_v9, 127  ;;  %vm5275_vm3 = vmmov %vm5274_vm1 }
 0x7b7   : > { %v2890_v26 = vpack.i.bf16 %v4436_v56, %v4441_v63  ;;  %v2885_v53 = vpack.i.bf16 %v4445_v0, %v4450_v36  ;;  %v2864_v20 = vunpack.i.h.bf16 %v2862_v27  ;;  %v2863_v28 = vunpack.i.l.bf16 %v2862_v27  ;;  %vm5269_vm6 = vmmov %vm5268_vm5 }
 0x7b8   : > { %v2859_v61 = vunpack.i.h.bf16 %v2857_v45  ;;  %v2858_v5 = vunpack.i.l.bf16 %v2857_v45  ;;  %vm5270_vm10 = vmmov %vm5268_vm5  ;;  %vm5278_vm15 = vnez %v5211_v58 }
 0x7b9   : > { %v1744_v31 = vsel %vm5268_vm5, %v2863_v28, %v2864_v20  ;;  %vm5271_vm4 = vmmov %vm5268_vm5  ;;  %vm5279_vm5 = vnez %v5215_v7 }
 0x7ba   : > { %2881 = vrot.lane.b32.xlu1 %v2870_v13, %s3195_s30  ;;  %2876 = vrot.lane.b32.xlu0 %v2865_v62, %s3195_s30  ;;  %v1745_v4 = vsel %vm5269_vm6, %v2859_v61, %v2863_v28  ;;  %v1746_v21 = vsel %vm5270_vm10, %v2858_v5, %v2859_v61  ;;  %v1747_v57 = vsel %vm5271_vm4, %v2864_v20, %v2858_v5  ;;  %vm5276_vm13 = vmmov %vm5274_vm1 }
 0x7bb   : > { %v1750_v51 = vsel %vm3640_vm11, %v4280_v33, %v1744_v31  ;;  %v1751_v35 = vsel %vm3630_vm9, %v4284_v39, %v1747_v57  ;;  %v1748_v15 = vsel %vm5272_vm8, %v4278_v34, %v1746_v21  ;;  %v1749_v16 = vsel %vm5273_vm12, %v4282_v29, %v1745_v4  ;;  %vm5277_vm2 = vmmov %vm5274_vm1 }
 0x7bc   : > { %v2920_v42 = vpack.i.bf16 %v1751_v35, %v1750_v51  ;;  %v2915_v43 = vpack.i.bf16 %v1749_v16, %v1748_v15  ;;  %vm5280_vm6 = vmmov %vm5271_vm4 }
 0x7bd   : > { %vm5281_vm10 = vmmov %vm5271_vm4 }
 0x7be   : > { %2891 = vrot.lane.b32.xlu1 %v2890_v26, %s3195_s30  ;;  %2886 = vrot.lane.b32.xlu0 %v2885_v53, %s3195_s30 }
 0x7c2   : > { %2906 = vrot.lane.b32.xlu1 %v2890_v26, %s3196_s25  ;;  %2896 = vrot.lane.b32.xlu0 %v2885_v53, %s3196_s25 }
 0x7c6   : > { %2911 = vrot.lane.b32.xlu1 %v4288_v37, %s3196_s25  ;;  %2901 = vrot.lane.b32.xlu0 %v4292_v22, %s3196_s25 }
 0x7ca   : > { %2921 = vrot.lane.b32.xlu1 %v2920_v42, %s3195_s30  ;;  %2916 = vrot.lane.b32.xlu0 %v2915_v43, %s3195_s30 }
 0x828   : > { %v2872_v38 = vpop.permute.xlu1 %2871  ;;  %v2867_v30 = vpop.permute.xlu0 %2866 }
 0x829   : > { %v2874_v32 = vunpack.i.h.bf16 %v2872_v38  ;;  %v2873_v44 = vunpack.i.l.bf16 %v2872_v38  ;;  %v2869_v12 = vunpack.i.h.bf16 %v2867_v30  ;;  %v2868_v60 = vunpack.i.l.bf16 %v2867_v30 }
 0x82b   : > { %v1812_v1 = vsel %vm5274_vm1, %v2873_v44, %v2874_v32  ;;  %v1813_v37 = vsel %vm5275_vm3, %v2869_v12, %v2873_v44  ;;  %v1814_v22 = vsel %vm5276_vm13, %v2868_v60, %v2869_v12  ;;  %v1815_v17 = vsel %vm5277_vm2, %v2874_v32, %v2868_v60  ;;  %vm5282_vm1 = vmmov %vm5271_vm4 }
 0x82c   : > { %v2882_v52 = vpop.permute.xlu1 %2881  ;;  %v2877_v18 = vpop.permute.xlu0 %2876  ;;  %v1818_v49 = vsel %vm3683_vm0, %v4404_v46, %v1813_v37  ;;  %v1819_v19 = vsel %vm3675_vm14, %v4422_v40, %v1812_v1  ;;  %v1816_v41 = vsel %vm5278_vm15, %v4410_v14, %v1815_v17  ;;  %v1817_v50 = vsel %vm5279_vm5, %v4417_v25, %v1814_v22  ;;  %vm5283_vm3 = vmmov %vm5282_vm1 }
 0x82d   : > { %v2884_v54 = vunpack.i.h.bf16 %v2882_v52  ;;  %v2883_v3 = vunpack.i.l.bf16 %v2882_v52  ;;  %v2879_v55 = vunpack.i.h.bf16 %v2877_v18  ;;  %v2878_v2 = vunpack.i.l.bf16 %v2877_v18  ;;  %vm5284_vm13 = vmmov %vm5282_vm1 }
 0x82e   : > { %v2930_v13 = vpack.i.bf16 %v1819_v19, %v1818_v49  ;;  %v2925_v62 = vpack.i.bf16 %v1817_v50, %v1816_v41  ;;  %vm5285_vm2 = vmmov %vm5282_vm1 }
 0x82f   : > { %v1884_v24 = vsel %vm5280_vm6, %v2883_v3, %v2884_v54  ;;  %v1885_v23 = vsel %vm5281_vm10, %v2879_v55, %v2883_v3  ;;  %v1886_v27 = vsel %vm5271_vm4, %v2878_v2, %v2879_v55  ;;  %v1887_v45 = vsel %vm5282_vm1, %v2884_v54, %v2878_v2  ;;  %vm5286_vm6 = vmmov %vm5282_vm1 }
 0x830   : > { %2931 = vrot.lane.b32.xlu1 %v2930_v13, %s3196_s25  ;;  %2926 = vrot.lane.b32.xlu0 %v2925_v62, %s3196_s25  ;;  %v2892_v26 = vpop.permute.xlu1 %2891  ;;  %v2887_v53 = vpop.permute.xlu0 %2886  ;;  %v1890_v20 = vsel %vm3640_vm11, %v4404_v46, %v1884_v24  ;;  %v1891_v28 = vsel %vm3630_vm9, %v4422_v40, %v1887_v45  ;;  %v1888_v61 = vsel %vm5272_vm8, %v4410_v14, %v1886_v27  ;;  %vm5287_vm10 = vcmp.lt.s32.totalorder %v3430_v9, 1 }
 0x831   : > { %v2894_v5 = vunpack.i.h.bf16 %v2892_v26  ;;  %v2893_v31 = vunpack.i.l.bf16 %v2892_v26  ;;  %v2889_v4 = vunpack.i.h.bf16 %v2887_v53  ;;  %v2888_v21 = vunpack.i.l.bf16 %v2887_v53  ;;  %vm5288_vm4 = vmmov %vm5287_vm10 }
 0x832   : > { %v2940_v57 = vpack.i.bf16 %v1891_v28, %v1890_v20  ;;  %v1889_v51 = vsel %vm5273_vm12, %v4417_v25, %v1885_v23  ;;  %vm5289_vm1 = vmmov %vm5288_vm4 }
 0x833   : > { %v1604_v35 = vsel %vm5283_vm3, %v2893_v31, %v2894_v5  ;;  %v1605_v15 = vsel %vm5284_vm13, %v2889_v4, %v2893_v31  ;;  %v1606_v16 = vsel %vm5285_vm2, %v2888_v21, %v2889_v4  ;;  %v1607_v42 = vsel %vm5286_vm6, %v2894_v5, %v2888_v21  ;;  %vm5290_vm3 = vmmov %vm5289_vm1 }
 0x834   : > { %2941 = vrot.lane.b32.xlu1 %v2940_v57, %s3195_s30  ;;  %v2935_v43 = vpack.i.bf16 %v1889_v51, %v1888_v61  ;;  %v2907_v38 = vpop.permute.xlu1 %2906  ;;  %v2897_v30 = vpop.permute.xlu0 %2896  ;;  %v1610_v32 = vsel %vm3640_vm11, %v4441_v63, %v1604_v35  ;;  %v1611_v44 = vsel %vm3630_vm9, %v4436_v56, %v1607_v42  ;;  %v1608_v12 = vsel %vm5272_vm8, %v4450_v36, %v1606_v16  ;;  %vm5291_vm13 = vmmov %vm5289_vm1 }
 0x835   : > { %v2909_v60 = vunpack.i.h.bf16 %v2907_v38  ;;  %v2908_v1 = vunpack.i.l.bf16 %v2907_v38  ;;  %v2899_v37 = vunpack.i.h.bf16 %v2897_v30  ;;  %v2898_v22 = vunpack.i.l.bf16 %v2897_v30  ;;  %vm5292_vm2 = vmmov %vm5289_vm1 }
 0x836   : > { %2936 = vrot.lane.b32.xlu0 %v2935_v43, %s3195_s30  ;;  %v2950_v17 = vpack.i.bf16 %v1611_v44, %v1610_v32  ;;  %v1609_v52 = vsel %vm5273_vm12, %v4445_v0, %v1605_v15  ;;  %vm5293_vm6 = vmmov %vm5289_vm1 }
 0x837   : > { %v1532_v18 = vsel %vm5287_vm10, %v2908_v1, %v2909_v60  ;;  %v1533_v49 = vsel %vm5288_vm4, %v2899_v37, %v2908_v1  ;;  %v1534_v19 = vsel %vm5289_vm1, %v2898_v22, %v2899_v37  ;;  %v1535_v41 = vsel %vm5290_vm3, %v2909_v60, %v2898_v22  ;;  %vm5294_vm10 = vmmov %vm5289_vm1 }
 0x838   : > { %2951 = vrot.lane.b32.xlu1 %v2950_v17, %s3195_s30  ;;  %v2945_v50 = vpack.i.bf16 %v1609_v52, %v1608_v12  ;;  %v2912_v54 = vpop.permute.xlu1 %2911  ;;  %v2902_v3 = vpop.permute.xlu0 %2901  ;;  %v1538_v55 = vsel %vm3683_vm0, %v4441_v63, %v1533_v49  ;;  %v1539_v2 = vsel %vm3675_vm14, %v4436_v56, %v1532_v18  ;;  %v1536_v13 = vsel %vm5278_vm15, %v4450_v36, %v1535_v41 }
 0x839   : > { %v2914_v62 = vunpack.i.h.bf16 %v2912_v54  ;;  %v2913_v24 = vunpack.i.l.bf16 %v2912_v54  ;;  %v2904_v23 = vunpack.i.h.bf16 %v2902_v3  ;;  %v2903_v27 = vunpack.i.l.bf16 %v2902_v3 }
 0x83a   : > { %2946 = vrot.lane.b32.xlu0 %v2945_v50, %s3195_s30  ;;  %v2965_v45 = vpack.i.bf16 %v1539_v2, %v1538_v55  ;;  %v1537_v26 = vsel %vm5279_vm5, %v4445_v0, %v1534_v19  ;;  %vm5295_vm4 = vcmp.lt.s32.totalorder %v3430_v9, 127 }
 0x83b   : > { %v1672_v53 = vsel %vm5291_vm13, %v2913_v24, %v2914_v62  ;;  %v1673_v20 = vsel %vm5292_vm2, %v2904_v23, %v2913_v24  ;;  %v1674_v28 = vsel %vm5293_vm6, %v2903_v27, %v2904_v23  ;;  %v1675_v61 = vsel %vm5294_vm10, %v2914_v62, %v2903_v27  ;;  %vm5296_vm1 = vmmov %vm5295_vm4 }
 0x83c   : > { %2966 = vrot.lane.b32.xlu1 %v2965_v45, %s3196_s25  ;;  %v2955_v5 = vpack.i.bf16 %v1537_v26, %v1536_v13  ;;  %v2922_v31 = vpop.permute.xlu1 %2921  ;;  %v2917_v4 = vpop.permute.xlu0 %2916  ;;  %v1678_v21 = vsel %vm3683_vm0, %v4280_v33, %v1673_v20  ;;  %v1679_v57 = vsel %vm3675_vm14, %v4284_v39, %v1672_v53  ;;  %v1676_v51 = vsel %vm5278_vm15, %v4278_v34, %v1675_v61  ;;  %vm5297_vm3 = vmmov %vm5296_vm1 }
 0x83d   : > { %v2924_v35 = vunpack.i.h.bf16 %v2922_v31  ;;  %v2923_v15 = vunpack.i.l.bf16 %v2922_v31  ;;  %v2919_v16 = vunpack.i.h.bf16 %v2917_v4  ;;  %v2918_v42 = vunpack.i.l.bf16 %v2917_v4  ;;  %vm5298_vm13 = vmmov %vm5296_vm1 }
 0x83e   : > { %2956 = vrot.lane.b32.xlu0 %v2955_v5, %s3196_s25  ;;  %v2970_v43 = vpack.i.bf16 %v1679_v57, %v1678_v21  ;;  %v1677_v38 = vsel %vm5279_vm5, %v4282_v29, %v1674_v28  ;;  %vm5299_vm6 = vmmov %vm5292_vm2 }
 0x83f   : > { %v1760_v30 = vsel %vm5295_vm4, %v2923_v15, %v2924_v35  ;;  %v1761_v32 = vsel %vm5296_vm1, %v2919_v16, %v2923_v15  ;;  %v1762_v44 = vsel %vm5297_vm3, %v2918_v42, %v2919_v16  ;;  %v1763_v12 = vsel %vm5298_vm13, %v2924_v35, %v2918_v42  ;;  %vm5300_vm10 = vmmov %vm5292_vm2 }
 0x840   : > { %2971 = vrot.lane.b32.xlu1 %v2970_v43, %s3196_s25  ;;  %v2960_v60 = vpack.i.bf16 %v1677_v38, %v1676_v51  ;;  %v1766_v1 = vsel %vm3640_vm11, %v4280_v33, %v1760_v30  ;;  %v1767_v37 = vsel %vm3630_vm9, %v4284_v39, %v1763_v12  ;;  %v1764_v22 = vsel %vm5272_vm8, %v4278_v34, %v1762_v44  ;;  %vm5301_vm4 = vmmov %vm5292_vm2 }
 0x841   : > { %v2980_v17 = vpack.i.bf16 %v1767_v37, %v1766_v1  ;;  %v1765_v52 = vsel %vm5273_vm12, %v4282_v29, %v1761_v32  ;;  %vm5302_vm3 = vmmov %vm5296_vm1 }
 0x842   : > { %2961 = vrot.lane.b32.xlu0 %v2960_v60, %s3196_s25  ;;  %v2975_v18 = vpack.i.bf16 %v1765_v52, %v1764_v22  ;;  %vm5303_vm13 = vmmov %vm5296_vm1 }
 0x844   : > { %2981 = vrot.lane.b32.xlu1 %v2980_v17, %s3195_s30 }
 0x846   : > { %2976 = vrot.lane.b32.xlu0 %v2975_v18, %s3195_s30 }
 0x8a2   : > { %v2932_v49 = vpop.permute.xlu1 %2931  ;;  %v2927_v19 = vpop.permute.xlu0 %2926 }
 0x8a3   : > { %v2934_v41 = vunpack.i.h.bf16 %v2932_v49  ;;  %v2933_v50 = vunpack.i.l.bf16 %v2932_v49  ;;  %v2929_v54 = vunpack.i.h.bf16 %v2927_v19  ;;  %v2928_v3 = vunpack.i.l.bf16 %v2927_v19 }
 0x8a5   : > { %v1828_v55 = vsel %vm5292_vm2, %v2933_v50, %v2934_v41  ;;  %v1829_v2 = vsel %vm5299_vm6, %v2929_v54, %v2933_v50  ;;  %v1830_v13 = vsel %vm5300_vm10, %v2928_v3, %v2929_v54  ;;  %v1831_v62 = vsel %vm5301_vm4, %v2934_v41, %v2928_v3  ;;  %vm5304_vm2 = vmmov %vm5296_vm1 }
 0x8a6   : > { %v2942_v24 = vpop.permute.xlu1 %2941  ;;  %v1834_v23 = vsel %vm3683_vm0, %v4404_v46, %v1829_v2  ;;  %v1835_v27 = vsel %vm3675_vm14, %v4422_v40, %v1828_v55  ;;  %v1832_v45 = vsel %vm5278_vm15, %v4410_v14, %v1831_v62  ;;  %v1833_v26 = vsel %vm5279_vm5, %v4417_v25, %v1830_v13  ;;  %vm5305_vm6 = vmmov %vm5296_vm1 }
 0x8a7   : > { %v2944_v53 = vunpack.i.h.bf16 %v2942_v24  ;;  %v2943_v20 = vunpack.i.l.bf16 %v2942_v24  ;;  %v2990_v28 = vpack.i.bf16 %v1835_v27, %v1834_v23  ;;  %v2985_v61 = vpack.i.bf16 %v1833_v26, %v1832_v45  ;;  %vm5306_vm10 = vmmov %vm5296_vm1 }
 0x8a8   : > { %v2937_v5 = vpop.permute.xlu0 %2936  ;;  %vm5307_vm4 = vmmov %vm5296_vm1 }
 0x8a9   : > { %v1900_v31 = vsel %vm5296_vm1, %v2943_v20, %v2944_v53  ;;  %v2939_v4 = vunpack.i.h.bf16 %v2937_v5  ;;  %v2938_v21 = vunpack.i.l.bf16 %v2937_v5  ;;  %2991 = vrot.lane.b32.xlu1 %v2990_v28, %s3196_s25  ;;  %2986 = vrot.lane.b32.xlu0 %v2985_v61, %s3196_s25 }
 0x8aa   : > { %v2952_v57 = vpop.permute.xlu1 %2951  ;;  %v1906_v51 = vsel %vm3640_vm11, %v4404_v46, %v1900_v31 }
 0x8ab   : > { %v1901_v35 = vsel %vm5302_vm3, %v2939_v4, %v2943_v20  ;;  %v1902_v15 = vsel %vm5303_vm13, %v2938_v21, %v2939_v4  ;;  %v1903_v16 = vsel %vm5304_vm2, %v2944_v53, %v2938_v21  ;;  %v2954_v42 = vunpack.i.h.bf16 %v2952_v57 }
 0x8ac   : > { %v2953_v43 = vunpack.i.l.bf16 %v2952_v57  ;;  %v2947_v38 = vpop.permute.xlu0 %2946  ;;  %v1907_v30 = vsel %vm3630_vm9, %v4422_v40, %v1903_v16  ;;  %v1904_v32 = vsel %vm5272_vm8, %v4410_v14, %v1902_v15  ;;  %v1905_v44 = vsel %vm5273_vm12, %v4417_v25, %v1901_v35 }
 0x8ad   : > { %v2949_v12 = vunpack.i.h.bf16 %v2947_v38  ;;  %v2948_v60 = vunpack.i.l.bf16 %v2947_v38  ;;  %v3000_v1 = vpack.i.bf16 %v1907_v30, %v1906_v51  ;;  %v2995_v37 = vpack.i.bf16 %v1905_v44, %v1904_v32 }
 0x8ae   : > { %v1620_v22 = vsel %vm5305_vm6, %v2953_v43, %v2954_v42  ;;  %v2967_v17 = vpop.permute.xlu1 %2966  ;;  %vm5308_vm3 = vcmp.lt.s32.totalorder %v3430_v9, 1 }
 0x8af   : > { %v1621_v52 = vsel %vm5306_vm10, %v2949_v12, %v2953_v43  ;;  %v1622_v18 = vsel %vm5307_vm4, %v2948_v60, %v2949_v12  ;;  %v1623_v49 = vsel %vm5296_vm1, %v2954_v42, %v2948_v60  ;;  %3001 = vrot.lane.b32.xlu1 %v3000_v1, %s3195_s30  ;;  %2996 = vrot.lane.b32.xlu0 %v2995_v37, %s3195_s30  ;;  %v2969_v19 = vunpack.i.h.bf16 %v2967_v17  ;;  %vm5309_vm13 = vmmov %vm5308_vm3 }
 0x8b0   : > { %v2968_v41 = vunpack.i.l.bf16 %v2967_v17  ;;  %v2957_v50 = vpop.permute.xlu0 %2956  ;;  %v1626_v54 = vsel %vm3640_vm11, %v4441_v63, %v1620_v22  ;;  %v1627_v3 = vsel %vm3630_vm9, %v4436_v56, %v1623_v49  ;;  %v1624_v55 = vsel %vm5272_vm8, %v4450_v36, %v1622_v18  ;;  %vm5310_vm2 = vmmov %vm5308_vm3 }
 0x8b1   : > { %v2959_v2 = vunpack.i.h.bf16 %v2957_v50  ;;  %v2958_v13 = vunpack.i.l.bf16 %v2957_v50  ;;  %v3010_v62 = vpack.i.bf16 %v1627_v3, %v1626_v54  ;;  %v1625_v24 = vsel %vm5273_vm12, %v4445_v0, %v1621_v52  ;;  %vm5311_vm6 = vmmov %vm5310_vm2 }
 0x8b2   : > { %v1548_v23 = vsel %vm5308_vm3, %v2968_v41, %v2969_v19  ;;  %v3005_v27 = vpack.i.bf16 %v1625_v24, %v1624_v55  ;;  %v2972_v45 = vpop.permute.xlu1 %2971  ;;  %vm5312_vm10 = vmmov %vm5310_vm2 }
 0x8b3   : > { %v1549_v26 = vsel %vm5309_vm13, %v2959_v2, %v2968_v41  ;;  %v1550_v53 = vsel %vm5310_vm2, %v2958_v13, %v2959_v2  ;;  %v1551_v20 = vsel %vm5311_vm6, %v2969_v19, %v2958_v13  ;;  %3011 = vrot.lane.b32.xlu1 %v3010_v62, %s3195_s30  ;;  %v2974_v28 = vunpack.i.h.bf16 %v2972_v45  ;;  %vm5313_vm4 = vmmov %vm5310_vm2 }
 0x8b4   : > { %3006 = vrot.lane.b32.xlu0 %v3005_v27, %s3195_s30  ;;  %v2973_v61 = vunpack.i.l.bf16 %v2972_v45  ;;  %v2962_v5 = vpop.permute.xlu0 %2961  ;;  %v1554_v31 = vsel %vm3683_vm0, %v4441_v63, %v1549_v26  ;;  %v1555_v4 = vsel %vm3675_vm14, %v4436_v56, %v1548_v23  ;;  %v1552_v21 = vsel %vm5278_vm15, %v4450_v36, %v1551_v20  ;;  %vm5314_vm1 = vmmov %vm5310_vm2 }
 0x8b5   : > { %v2964_v57 = vunpack.i.h.bf16 %v2962_v5  ;;  %v2963_v51 = vunpack.i.l.bf16 %v2962_v5  ;;  %v3025_v35 = vpack.i.bf16 %v1555_v4, %v1554_v31  ;;  %v1553_v15 = vsel %vm5279_vm5, %v4445_v0, %v1550_v53  ;;  %vm5315_vm3 = vmmov %vm5314_vm1 }
 0x8b6   : > { %v1688_v16 = vsel %vm5312_vm10, %v2973_v61, %v2974_v28  ;;  %v3015_v42 = vpack.i.bf16 %v1553_v15, %v1552_v21  ;;  %v2982_v43 = vpop.permute.xlu1 %2981  ;;  %vm5316_vm13 = vcmp.lt.s32.totalorder %v3430_v9, 127 }
 0x8b7   : > { %v1689_v38 = vsel %vm5313_vm4, %v2964_v57, %v2973_v61  ;;  %v1690_v30 = vsel %vm5314_vm1, %v2963_v51, %v2964_v57  ;;  %v1691_v32 = vsel %vm5315_vm3, %v2974_v28, %v2963_v51  ;;  %3026 = vrot.lane.b32.xlu1 %v3025_v35, %s3196_s25  ;;  %v2984_v44 = vunpack.i.h.bf16 %v2982_v43  ;;  %vm5317_vm2 = vmmov %vm5316_vm13 }
 0x8b8   : > { %3016 = vrot.lane.b32.xlu0 %v3015_v42, %s3196_s25  ;;  %v2983_v12 = vunpack.i.l.bf16 %v2982_v43  ;;  %v2977_v60 = vpop.permute.xlu0 %2976  ;;  %v1694_v1 = vsel %vm3683_vm0, %v4280_v33, %v1689_v38  ;;  %v1695_v37 = vsel %vm3675_vm14, %v4284_v39, %v1688_v16  ;;  %v1692_v22 = vsel %vm5278_vm15, %v4278_v34, %v1691_v32  ;;  %vm5318_vm6 = vmmov %vm5317_vm2 }
 0x8b9   : > { %v2979_v17 = vunpack.i.h.bf16 %v2977_v60  ;;  %v2978_v52 = vunpack.i.l.bf16 %v2977_v60  ;;  %v3030_v18 = vpack.i.bf16 %v1695_v37, %v1694_v1  ;;  %v1693_v49 = vsel %vm5279_vm5, %v4282_v29, %v1690_v30  ;;  %vm5319_vm10 = vmmov %vm5317_vm2 }
 0x8ba   : > { %v1776_v19 = vsel %vm5316_vm13, %v2983_v12, %v2984_v44  ;;  %v3020_v41 = vpack.i.bf16 %v1693_v49, %v1692_v22  ;;  %vm5320_vm4 = vmmov %vm5314_vm1 }
 0x8bb   : > { %v1777_v50 = vsel %vm5317_vm2, %v2979_v17, %v2983_v12  ;;  %v1778_v54 = vsel %vm5318_vm6, %v2978_v52, %v2979_v17  ;;  %v1779_v3 = vsel %vm5319_vm10, %v2984_v44, %v2978_v52  ;;  %3031 = vrot.lane.b32.xlu1 %v3030_v18, %s3196_s25  ;;  %v1782_v55 = vsel %vm3640_vm11, %v4280_v33, %v1776_v19  ;;  %vm5321_vm3 = vmmov %vm5314_vm1 }
 0x8bc   : > { %3021 = vrot.lane.b32.xlu0 %v3020_v41, %s3196_s25  ;;  %v1783_v2 = vsel %vm3630_vm9, %v4284_v39, %v1779_v3  ;;  %v1780_v13 = vsel %vm5272_vm8, %v4278_v34, %v1778_v54  ;;  %v1781_v62 = vsel %vm5273_vm12, %v4282_v29, %v1777_v50  ;;  %vm5322_vm13 = vmmov %vm5314_vm1 }
 0x8bd   : > { %v3040_v24 = vpack.i.bf16 %v1783_v2, %v1782_v55  ;;  %v3035_v23 = vpack.i.bf16 %v1781_v62, %v1780_v13  ;;  %vm5323_vm6 = vmmov %vm5317_vm2 }
 0x8be   : > { %vm5324_vm10 = vmmov %vm5317_vm2 }
 0x8bf   : > { %3041 = vrot.lane.b32.xlu1 %v3040_v24, %s3195_s30 }
 0x8c0   : > { %3036 = vrot.lane.b32.xlu0 %v3035_v23, %s3195_s30 }
 0x91b   : > { %v2992_v27 = vpop.permute.xlu1 %2991  ;;  %v2987_v45 = vpop.permute.xlu0 %2986 }
 0x91c   : > { %v2994_v26 = vunpack.i.h.bf16 %v2992_v27  ;;  %v2993_v53 = vunpack.i.l.bf16 %v2992_v27  ;;  %v2989_v20 = vunpack.i.h.bf16 %v2987_v45  ;;  %v2988_v28 = vunpack.i.l.bf16 %v2987_v45 }
 0x91e   : > { %v1844_v61 = vsel %vm5320_vm4, %v2993_v53, %v2994_v26  ;;  %v1845_v5 = vsel %vm5314_vm1, %v2989_v20, %v2993_v53  ;;  %v1846_v31 = vsel %vm5321_vm3, %v2988_v28, %v2989_v20  ;;  %v1847_v4 = vsel %vm5322_vm13, %v2994_v26, %v2988_v28  ;;  %vm5325_vm4 = vmmov %vm5317_vm2 }
 0x91f   : > { %v1850_v21 = vsel %vm3683_vm0, %v4404_v46, %v1845_v5  ;;  %v1851_v57 = vsel %vm3675_vm14, %v4422_v40, %v1844_v61  ;;  %v1848_v51 = vsel %vm5278_vm15, %v4410_v14, %v1847_v4  ;;  %v1849_v35 = vsel %vm5279_vm5, %v4417_v25, %v1846_v31  ;;  %vm5326_vm1 = vmmov %vm5317_vm2 }
 0x920   : > { %v3050_v15 = vpack.i.bf16 %v1851_v57, %v1850_v21  ;;  %v3045_v16 = vpack.i.bf16 %v1849_v35, %v1848_v51  ;;  %vm5327_vm3 = vmmov %vm5326_vm1 }
 0x921   : > { %v3002_v42 = vpop.permute.xlu1 %3001  ;;  %v2997_v43 = vpop.permute.xlu0 %2996  ;;  %vm5328_vm13 = vmmov %vm5326_vm1 }
 0x922   : > { %v3004_v38 = vunpack.i.h.bf16 %v3002_v42  ;;  %v3003_v30 = vunpack.i.l.bf16 %v3002_v42  ;;  %v2999_v32 = vunpack.i.h.bf16 %v2997_v43  ;;  %v2998_v44 = vunpack.i.l.bf16 %v2997_v43  ;;  %3051 = vrot.lane.b32.xlu1 %v3050_v15, %s3196_s25  ;;  %3046 = vrot.lane.b32.xlu0 %v3045_v16, %s3196_s25 }
 0x924   : > { %v1916_v12 = vsel %vm5317_vm2, %v3003_v30, %v3004_v38  ;;  %v1917_v60 = vsel %vm5323_vm6, %v2999_v32, %v3003_v30  ;;  %v1918_v1 = vsel %vm5324_vm10, %v2998_v44, %v2999_v32  ;;  %v1919_v37 = vsel %vm5325_vm4, %v3004_v38, %v2998_v44  ;;  %vm5329_vm2 = vmmov %vm5326_vm1 }
 0x925   : > { %v3012_v22 = vpop.permute.xlu1 %3011  ;;  %v1922_v17 = vsel %vm3640_vm11, %v4404_v46, %v1916_v12  ;;  %v1923_v52 = vsel %vm3630_vm9, %v4422_v40, %v1919_v37  ;;  %v1920_v18 = vsel %vm5272_vm8, %v4410_v14, %v1918_v1  ;;  %v1921_v49 = vsel %vm5273_vm12, %v4417_v25, %v1917_v60 }
 0x926   : > { %v3014_v19 = vunpack.i.h.bf16 %v3012_v22  ;;  %v3013_v41 = vunpack.i.l.bf16 %v3012_v22  ;;  %v3007_v50 = vpop.permute.xlu0 %3006  ;;  %v3060_v54 = vpack.i.bf16 %v1923_v52, %v1922_v17  ;;  %v3055_v3 = vpack.i.bf16 %v1921_v49, %v1920_v18 }
 0x927   : > { %v3009_v55 = vunpack.i.h.bf16 %v3007_v50  ;;  %v3008_v2 = vunpack.i.l.bf16 %v3007_v50  ;;  %vm5330_vm6 = vcmp.lt.s32.totalorder %v3430_v9, 1 }
 0x928   : > { %v1636_v13 = vsel %vm5326_vm1, %v3013_v41, %v3014_v19  ;;  %3061 = vrot.lane.b32.xlu1 %v3060_v54, %s3195_s30  ;;  %3056 = vrot.lane.b32.xlu0 %v3055_v3, %s3195_s30  ;;  %vm5331_vm10 = vmmov %vm5330_vm6 }
 0x929   : > { %v1637_v62 = vsel %vm5327_vm3, %v3009_v55, %v3013_v41  ;;  %v1638_v24 = vsel %vm5328_vm13, %v3008_v2, %v3009_v55  ;;  %v1639_v23 = vsel %vm5329_vm2, %v3014_v19, %v3008_v2  ;;  %v3027_v27 = vpop.permute.xlu1 %3026  ;;  %v1642_v45 = vsel %vm3640_vm11, %v4441_v63, %v1636_v13  ;;  %vm5332_vm4 = vmmov %vm5330_vm6  ;;  %v2164_v13 = vld [vmem:[%s5168_s7] sm:$0xf] }
 0x92a   : > { %v3029_v26 = vunpack.i.h.bf16 %v3027_v27  ;;  %v3028_v53 = vunpack.i.l.bf16 %v3027_v27  ;;  %v3017_v20 = vpop.permute.xlu0 %3016  ;;  %v1643_v28 = vsel %vm3630_vm9, %v4436_v56, %v1639_v23  ;;  %v1640_v61 = vsel %vm5272_vm8, %v4450_v36, %v1638_v24  ;;  %vm5333_vm1 = vmmov %vm5332_vm4  ;;  %v2202_v24 = vld [vmem:[#allocation2] sm:$0x1] }
 0x92b   : > { %v3019_v5 = vunpack.i.h.bf16 %v3017_v20  ;;  %v3018_v31 = vunpack.i.l.bf16 %v3017_v20  ;;  %v3070_v4 = vpack.i.bf16 %v1643_v28, %v1642_v45  ;;  %v1641_v21 = vsel %vm5273_vm12, %v4445_v0, %v1637_v62  ;;  %vm5334_vm3 = vmmov %vm5333_vm1  ;;  %v2057_v62 = vld [vmem:[%s5167_s6] sm:$0xf] }
 0x92c   : > { %v1564_v57 = vsel %vm5330_vm6, %v3028_v53, %v3029_v26  ;;  %v3065_v51 = vpack.i.bf16 %v1641_v21, %v1640_v61  ;;  %vm5335_vm13 = vmmov %vm5333_vm1  ;;  %v1874_v21 = vpack.c.bf16 %v4404_v46, %v4404_v46 }
 0x92d   : > { %v1565_v35 = vsel %vm5331_vm10, %v3019_v5, %v3028_v53  ;;  %v1566_v15 = vsel %vm5332_vm4, %v3018_v31, %v3019_v5  ;;  %v1567_v16 = vsel %vm5333_vm1, %v3029_v26, %v3018_v31  ;;  %3071 = vrot.lane.b32.xlu1 %v3070_v4, %s3195_s30  ;;  %v3032_v42 = vpop.permute.xlu1 %3031  ;;  %v1571_v43 = vsel %vm3675_vm14, %v4436_v56, %v1564_v57  ;;  %vm5336_vm2 = vmmov %vm5333_vm1 }
 0x92e   : > { %3066 = vrot.lane.b32.xlu0 %v3065_v51, %s3195_s30  ;;  %v3034_v38 = vunpack.i.h.bf16 %v3032_v42  ;;  %v3033_v30 = vunpack.i.l.bf16 %v3032_v42  ;;  %v3022_v32 = vpop.permute.xlu0 %3021  ;;  %v1570_v44 = vsel %vm3683_vm0, %v4441_v63, %v1565_v35  ;;  %v1568_v12 = vsel %vm5278_vm15, %v4450_v36, %v1567_v16  ;;  %vm5337_vm6 = vmmov %vm5333_vm1 }
 0x92f   : > { %v3024_v60 = vunpack.i.h.bf16 %v3022_v32  ;;  %v3023_v1 = vunpack.i.l.bf16 %v3022_v32  ;;  %v3085_v37 = vpack.i.bf16 %v1571_v43, %v1570_v44  ;;  %v1569_v22 = vsel %vm5279_vm5, %v4445_v0, %v1566_v15 }
 0x930   : > { %v1704_v17 = vsel %vm5334_vm3, %v3033_v30, %v3034_v38  ;;  %v3075_v52 = vpack.i.bf16 %v1569_v22, %v1568_v12  ;;  %vm5338_vm10 = vcmp.lt.s32.totalorder %v3430_v9, 127  ;;  %v1872_v4 = vpack.c.bf16 %v4410_v14, %v4410_v14 }
 0x931   : > { %v1705_v18 = vsel %vm5335_vm13, %v3024_v60, %v3033_v30  ;;  %v1706_v49 = vsel %vm5336_vm2, %v3023_v1, %v3024_v60  ;;  %v1707_v19 = vsel %vm5337_vm6, %v3034_v38, %v3023_v1  ;;  %3086 = vrot.lane.b32.xlu1 %v3085_v37, %s3196_s25  ;;  %v1711_v41 = vsel %vm3675_vm14, %v4284_v39, %v1704_v17  ;;  %v3042_v23 = vpop.permute.xlu1 %3041  ;;  %vm5339_vm4 = vmmov %vm5338_vm10 }
 0x932   : > { %3076 = vrot.lane.b32.xlu0 %v3075_v52, %s3196_s25  ;;  %v1710_v50 = vsel %vm3683_vm0, %v4280_v33, %v1705_v18  ;;  %v1708_v54 = vsel %vm5278_vm15, %v4278_v34, %v1707_v19  ;;  %v1709_v55 = vsel %vm5279_vm5, %v4282_v29, %v1706_v49  ;;  %v3037_v27 = vpop.permute.xlu0 %3036  ;;  %v3044_v45 = vunpack.i.h.bf16 %v3042_v23  ;;  %vm5340_vm1 = vmmov %vm5339_vm4 }
 0x933   : > { %v3090_v3 = vpack.i.bf16 %v1711_v41, %v1710_v50  ;;  %v3080_v2 = vpack.i.bf16 %v1709_v55, %v1708_v54  ;;  %v3043_v26 = vunpack.i.l.bf16 %v3042_v23  ;;  %v3039_v53 = vunpack.i.h.bf16 %v3037_v27  ;;  %vm5341_vm3 = vmmov %vm5340_vm1 }
 0x934   : > { %v3038_v20 = vunpack.i.l.bf16 %v3037_v27  ;;  %v1873_v15 = vpack.c.bf16 %v4417_v25, %v4417_v25  ;;  %v1875_v16 = vpack.c.bf16 %v4422_v40, %v4422_v40  ;;  %v1733_v43 = vpack.c.bf16 %v4282_v29, %v4282_v29  ;;  %vm5342_vm13 = vmmov %vm5336_vm2 }
 0x935   : > { %3091 = vrot.lane.b32.xlu1 %v3090_v3, %s3196_s25  ;;  %v1792_v28 = vsel %vm5338_vm10, %v3043_v26, %v3044_v45  ;;  %v1793_v61 = vsel %vm5339_vm4, %v3039_v53, %v3043_v26  ;;  %v1732_v38 = vpack.c.bf16 %v4278_v34, %v4278_v34  ;;  %v1734_v30 = vpack.c.bf16 %v4280_v33, %v4280_v33  ;;  %vm5343_vm6 = vmmov %vm5336_vm2 }
 0x936   : > { %3081 = vrot.lane.b32.xlu0 %v3080_v2, %s3196_s25  ;;  %v1795_v5 = vsel %vm5340_vm1, %v3044_v45, %v3038_v20  ;;  %v1794_v31 = vsel %vm5341_vm3, %v3038_v20, %v3039_v53  ;;  %v1798_v57 = vsel %vm3640_vm11, %v4280_v33, %v1792_v28  ;;  %v1797_v51 = vsel %vm5273_vm12, %v4282_v29, %v1793_v61  ;;  %vm5344_vm10 = vmmov %vm5336_vm2  ;;  %s2398_s25 = sshll.u32 %s3273_s8, 12 }
 0x937   : > { %v1799_v35 = vsel %vm3630_vm9, %v4284_v39, %v1795_v5  ;;  %v1796_v42 = vsel %vm5272_vm8, %v4278_v34, %v1794_v31  ;;  %v1802_v32 = vpack.c.bf16 %v1798_v57, %v1798_v57  ;;  %v1801_v44 = vpack.c.bf16 %v1797_v51, %v1797_v51  ;;  %s5091_s20 = scalar_lea.hbm %s5170_s9, %s2398_s25 }
 0x938   : > { %v1803_v12 = vpack.c.bf16 %v1799_v35, %v1799_v35  ;;  %v1735_v60 = vpack.c.bf16 %v4284_v39, %v4284_v39  ;;  %v4904_v1 = vrot.slane %v1873_v15, 2  ;;  %v4906_v37 = vrot.slane %v1872_v4, 2 }
 0x939   : > { %2167 = vperm.xlu1 %2774, %v2164_v13   ;;  %v4908_v22 = vrot.slane %v1874_v21, 2  ;;  %v1593_v17 = vpack.c.bf16 %v4445_v0, %v4445_v0  ;;  %v1800_v52 = vpack.c.bf16 %v1796_v42, %v1796_v42  ;;  %v4912_v19 = vrot.slane %v1875_v16, 2 }
 0x93a   : > { %2060 = vperm.xlu0 %2453, %v2057_v62   ;;  %v1595_v41 = vpack.c.bf16 %v4436_v56, %v4436_v56  ;;  %v1592_v50 = vpack.c.bf16 %v4450_v36, %v4450_v36  ;;  %v1974_v13 = vrot.slane %v1802_v32, 6  ;;  %v1973_v62 = vrot.slane %v1801_v44, 6 }
 0x93b   : > { %v1594_v23 = vpack.c.bf16 %v4441_v63, %v4441_v63  ;;  %v1972_v20 = vrot.slane %v1800_v52, 6  ;;  %vm5345_vm4 = vcmask 1041408   ;;  %v4941_v16 = vrot.slane %v1593_v17, 6 }
 0x93c   : > { %v2032_v15 = vsel %vm5345_vm4, %v1734_v30, %v1974_v13  ;;  %v4943_v42 = vrot.slane %v1595_v41, 6  ;;  %v4945_v32 = vrot.slane %v1592_v50, 6  ;;  %vm5346_vm1 = vmmov %vm5345_vm4 }
 0x93d   : > { %v2029_v52 = vsel %vm5346_vm1, %v1733_v43, %v1973_v62  ;;  %vm5347_vm3 = vmmov %vm5346_vm1 }
 0x93e   : > { %2205 = vperm.xlu0 %2453, %v2202_v24   ;;  %v1975_v24 = vrot.slane %v1803_v12, 6 }
 0x994   : > { %v3052_v18 = vpop.permute.xlu1 %3051  ;;  %v3047_v49 = vpop.permute.xlu0 %3046 }
 0x995   : > { %v3054_v54 = vunpack.i.h.bf16 %v3052_v18  ;;  %v3053_v3 = vunpack.i.l.bf16 %v3052_v18  ;;  %v3049_v55 = vunpack.i.h.bf16 %v3047_v49  ;;  %v3048_v2 = vunpack.i.l.bf16 %v3047_v49 }
 0x996   : > { %v2035_v18 = vsel %vm5347_vm3, %v1735_v60, %v1975_v24 }
 0x997   : > { %v1860_v27 = vsel %vm5342_vm13, %v3053_v3, %v3054_v54  ;;  %v1861_v45 = vsel %vm5336_vm2, %v3049_v55, %v3053_v3  ;;  %v1862_v26 = vsel %vm5343_vm6, %v3048_v2, %v3049_v55  ;;  %v1863_v53 = vsel %vm5344_vm10, %v3054_v54, %v3048_v2  ;;  %vm5348_vm13 = vmmov %vm5346_vm1 }
 0x998   : > { %v1867_v28 = vsel %vm3675_vm14, %v4422_v40, %v1860_v27  ;;  %v1864_v61 = vsel %vm5278_vm15, %v4410_v14, %v1863_v53  ;;  %v1865_v5 = vsel %vm5279_vm5, %v4417_v25, %v1862_v26  ;;  %v1866_v4 = vsel %vm3683_vm0, %v4404_v46, %v1861_v45 }
 0x999   : > { %v1871_v31 = vpack.c.bf16 %v1867_v28, %v1867_v28  ;;  %v1868_v21 = vpack.c.bf16 %v1864_v61, %v1864_v61  ;;  %v1869_v57 = vpack.c.bf16 %v1865_v5, %v1865_v5  ;;  %v1870_v49 = vpack.c.bf16 %v1866_v4, %v1866_v4 }
 0x99a   : > { %v3062_v51 = vpop.permute.xlu1 %3061  ;;  %v3057_v35 = vpop.permute.xlu0 %3056  ;;  %v2026_v55 = vsel %vm5348_vm13, %v1732_v38, %v1972_v20  ;;  %vm5349_vm2 = vcmp.lt.s32.totalorder %v3430_v9, 127  ;;  %vm5354_vm13 = vmmov %vm5346_vm1 }
 0x99b   : > { %v3064_v44 = vunpack.i.h.bf16 %v3062_v51  ;;  %v3063_v12 = vunpack.i.l.bf16 %v3062_v51  ;;  %v3059_v54 = vunpack.i.h.bf16 %v3057_v35  ;;  %v3058_v3 = vunpack.i.l.bf16 %v3057_v35  ;;  %vm5350_vm6 = vmmov %vm5349_vm2 }
 0x99c   : > { %v1980_v2 = vrot.slane %v1868_v21, 4  ;;  %v1981_v17 = vrot.slane %v1869_v57, 4  ;;  %v1983_v41 = vrot.slane %v1871_v31, 4  ;;  %vm5351_vm10 = vmmov %vm5349_vm2  ;;  %v4976_v21 = vrot.slane %v1594_v23, 6 }
 0x99d   : > { %v1932_v30 = vsel %vm5349_vm2, %v3063_v12, %v3064_v44  ;;  %v1933_v50 = vsel %vm5350_vm6, %v3059_v54, %v3063_v12  ;;  %v1934_v13 = vsel %vm5351_vm10, %v3058_v3, %v3059_v54  ;;  %vm5352_vm4 = vmmov %vm5349_vm2  ;;  %vm5356_vm6 = vcmask 1043456  }
 0x99e   : > { %v1935_v43 = vsel %vm5352_vm4, %v3064_v44, %v3058_v3  ;;  %v1938_v60 = vsel %vm3640_vm11, %v4404_v46, %v1932_v30  ;;  %v1937_v62 = vsel %vm5273_vm12, %v4417_v25, %v1933_v50  ;;  %v1936_v27 = vsel %vm5272_vm8, %v4410_v14, %v1934_v13  ;;  %vm5353_vm3 = vmmov %vm5349_vm2 }
 0x99f   : > { %v3072_v38 = vpop.permute.xlu1 %3071  ;;  %v1939_v24 = vsel %vm3630_vm9, %v4422_v40, %v1935_v43  ;;  %v1942_v45 = vpack.c.bf16 %v1938_v60, %v1938_v60  ;;  %v1941_v28 = vpack.c.bf16 %v1937_v62, %v1937_v62  ;;  %v1982_v46 = vrot.slane %v1870_v49, 4  ;;  %vm5355_vm2 = vmmov %vm5346_vm1 }
 0x9a0   : > { %v3074_v26 = vunpack.i.h.bf16 %v3072_v38  ;;  %v3073_v53 = vunpack.i.l.bf16 %v3072_v38  ;;  %v3067_v20 = vpop.permute.xlu0 %3066  ;;  %v1943_v61 = vpack.c.bf16 %v1939_v24, %v1939_v24  ;;  %v1940_v40 = vpack.c.bf16 %v1936_v27, %v1936_v27  ;;  %vm5357_vm10 = vmmov %vm5353_vm3 }
 0x9a1   : > { %v3069_v5 = vunpack.i.h.bf16 %v3067_v20  ;;  %v3068_v31 = vunpack.i.l.bf16 %v3067_v20  ;;  %v2073_v4 = vsel %vm5346_vm1, %v1942_v45, 0  ;;  %2369 = vmatprep.subr.msk.bf16.mxu0 %vm5354_vm13, %v1941_v28  ;;  %v2037_v14 = vsel %vm5356_vm6, %v2026_v55, %v1980_v2  ;;  %vm5358_vm4 = vmmov %vm5353_vm3 }
 0x9a2   : > { %v1652_v25 = vsel %vm5353_vm3, %v3073_v53, %v3074_v26  ;;  %2371 = vmatprep.subr.msk.bf16.mxu1 %vm5355_vm2, %v1943_v61  ;;  %vm5359_vm1 = vmmov %vm5353_vm3 }
 0x9a3   : > { %v1658_v57 = vsel %vm3640_vm11, %v4441_v63, %v1652_v25  ;;  %v1653_v51 = vsel %vm5357_vm10, %v3069_v5, %v3073_v53  ;;  %v1654_v35 = vsel %vm5358_vm4, %v3068_v31, %v3069_v5  ;;  %v1655_v44 = vsel %vm5359_vm1, %v3074_v26, %v3068_v31  ;;  %v3087_v12 = vpop.permute.xlu1 %3086  ;;  %2130 = vmatpush1.bf16.msra.mxu1 %v2073_v4  ;;  %vm5360_vm11 = vmmov %vm5356_vm6 }
 0x9a4   : > { %v1657_v23 = vsel %vm5273_vm12, %v4445_v0, %v1653_v51  ;;  %v1656_v48 = vsel %vm5272_vm8, %v4450_v36, %v1654_v35  ;;  %v3077_v49 = vpop.permute.xlu0 %3076  ;;  %v2039_v54 = vsel %vm5360_vm11, %v2029_v52, %v1981_v17  ;;  %vm5361_vm3 = vmmov %vm5356_vm6  ;;  %v1662_v55 = vpack.c.bf16 %v1658_v57, %v1658_v57 }
 0x9a5   : > { %v2043_v3 = vsel %vm5361_vm3, %v2035_v18, %v1983_v41  ;;  %v1659_v2 = vsel %vm3630_vm9, %v4436_v56, %v1655_v44  ;;  %v3089_v30 = vunpack.i.h.bf16 %v3087_v12  ;;  %vm5362_vm13 = vmmov %vm5361_vm3  ;;  %v1661_v13 = vpack.c.bf16 %v1657_v23, %v1657_v23 }
 0x9a6   : > { %v2041_v50 = vsel %vm5362_vm13, %v2032_v15, %v1982_v46  ;;  %v3088_v11 = vunpack.i.l.bf16 %v3087_v12  ;;  %v3079_v43 = vunpack.i.h.bf16 %v3077_v49  ;;  %v3078_v60 = vunpack.i.l.bf16 %v3077_v49  ;;  %vm5363_vm12 = vmmov %vm5355_vm2 }
 0x9a7   : > { %v1660_v38 = vpack.c.bf16 %v1656_v48, %v1656_v48  ;;  %v2067_v47 = vsel %vm5363_vm12, %v1940_v40, 0  ;;  %vm5364_vm8 = vcmask 1045504   ;;  %vm5366_vm6 = vcmp.lt.s32.totalorder %v3430_v9, 1  ;;  %v3092_v62 = vpop.permute.xlu1 %3091 }
 0x9a8   : > { %v2048_v52 = vsel %vm5364_vm8, %v2039_v54, %v4904_v1  ;;  %vm5365_vm2 = vmmov %vm5364_vm8  ;;  %v1580_v10 = vsel %vm5366_vm6, %v3088_v11, %v3089_v30  ;;  %2089 = vmatpush1.bf16.msra.mxu0 %v2067_v47  ;;  %v3082_v24 = vpop.permute.xlu0 %3081  ;;  %v1958_v26 = vrot.slane %v1662_v55, 4  ;;  %v1663_v53 = vpack.c.bf16 %v1659_v2, %v1659_v2 }
 0x9a9   : > { %v2054_v18 = vsel %vm5365_vm2, %v2043_v3, %v4912_v19  ;;  %vm5367_vm9 = vmmov %vm5366_vm6  ;;  %v1587_v1 = vsel %vm3675_vm14, %v4436_v56, %v1580_v10  ;;  %2090 = vmatprep.subr.bf16.mxu0 %v2048_v52  ;;  %v3094_v61 = vunpack.i.h.bf16 %v3092_v62  ;;  %v3093_v56 = vunpack.i.l.bf16 %v3092_v62 }
 0x9aa   : > { %v1581_v17 = vsel %vm5367_vm9, %v3079_v43, %v3088_v11  ;;  %vm5368_vm10 = vmmov %vm5366_vm6  ;;  %v1591_v20 = vpack.c.bf16 %v1587_v1, %v1587_v1  ;;  %2131 = vmatprep.subr.bf16.mxu1 %v2054_v18  ;;  %v3084_v46 = vunpack.i.h.bf16 %v3082_v24  ;;  %v3083_v5 = vunpack.i.l.bf16 %v3082_v24 }
 0x9ab   : > { %v1582_v15 = vsel %vm5368_vm10, %v3078_v60, %v3079_v43  ;;  %vm5369_vm4 = vmmov %vm5366_vm6  ;;  %v1586_v19 = vsel %vm3683_vm0, %v4441_v63, %v1581_v17  ;;  %v1957_v51 = vrot.slane %v1661_v13, 4  ;;  %v1956_v7 = vrot.slane %v1660_v38, 4 }
 0x9ac   : > { %v1583_v41 = vsel %vm5369_vm4, %v3089_v30, %v3078_v60  ;;  %v1585_v45 = vsel %vm5279_vm5, %v4445_v0, %v1582_v15  ;;  %v1590_v31 = vpack.c.bf16 %v1586_v19, %v1586_v19  ;;  %vm5370_vm1 = vmmov %vm5365_vm2  ;;  %vm5376_vm2 = vcmask 1041408   ;;  %v2056_v30 = vld [vmem:[%s5166_s5] sm:$0x3] }
 0x9ad   : > { %v1584_v27 = vsel %vm5278_vm15, %v4450_v36, %v1583_v41  ;;  %v1589_v28 = vpack.c.bf16 %v1585_v45, %v1585_v45  ;;  %v2045_v4 = vsel %vm5370_vm1, %v2037_v14, %v4906_v37  ;;  %vm5371_vm11 = vmmov %vm5370_vm1  ;;  %v1959_v23 = vrot.slane %v1663_v53, 4 }
 0x9ae   : > { %v1588_v63 = vpack.c.bf16 %v1584_v27, %v1584_v27  ;;  %v2051_v36 = vsel %vm5371_vm11, %v2041_v50, %v4908_v22  ;;  %vm5372_vm3 = vmmov %vm5369_vm4  ;;  %2091 = vmatpush1.bf16.msra.mxu0 %v2045_v4  ;;  %vm5380_vm6 = vcmask 1043456  }
 0x9af   : > { %v1720_v0 = vsel %vm5372_vm3, %v3093_v56, %v3094_v61  ;;  %vm5373_vm13 = vmmov %vm5372_vm3  ;;  %2132 = vmatpush1.bf16.msra.mxu1 %v2051_v36  ;;  %v1997_v9 = vsel %vm5376_vm2, %v1589_v28, %v4941_v16 }
 0x9b0   : > { %v1721_v25 = vsel %vm5373_vm13, %v3084_v46, %v3093_v56  ;;  %vm5374_vm12 = vmmov %vm5372_vm3  ;;  %v1727_v44 = vsel %vm3675_vm14, %v4284_v39, %v1720_v0  ;;  %v2007_v16 = vsel %vm5380_vm6, %v1997_v9, %v1957_v51 }
 0x9b1   : > { %v1722_v40 = vsel %vm5374_vm12, %v3083_v5, %v3084_v46  ;;  %vm5375_vm8 = vmmov %vm5372_vm3  ;;  %v1726_v37 = vsel %vm3683_vm0, %v4280_v33, %v1721_v25  ;;  %v1731_v33 = vpack.c.bf16 %v1727_v44, %v1727_v44 }
 0x9b2   : > { %v1723_v57 = vsel %vm5375_vm8, %v3094_v61, %v3083_v5  ;;  %v1725_v14 = vsel %vm5279_vm5, %v4282_v29, %v1722_v40  ;;  %vm5377_vm0 = vmmov %vm5376_vm2  ;;  %v1730_v12 = vpack.c.bf16 %v1726_v37, %v1726_v37 }
 0x9b3   : > { %v1724_v22 = vsel %vm5278_vm15, %v4278_v34, %v1723_v57  ;;  %v1729_v35 = vpack.c.bf16 %v1725_v14, %v1725_v14  ;;  %v2003_v6 = vsel %vm5377_vm0, %v1591_v20, %v4943_v42  ;;  %vm5378_vm15 = vmmov %vm5377_vm0  ;;  %v1967_v49 = vrot.slane %v1731_v33, 2 }
 0x9b4   : > { %v1728_v58 = vpack.c.bf16 %v1724_v22, %v1724_v22  ;;  %v1994_v34 = vsel %vm5378_vm15, %v1588_v63, %v4945_v32  ;;  %vm5379_vm5 = vmmov %vm5377_vm0  ;;  %v1966_v39 = vrot.slane %v1730_v12, 2  ;;  %v2168_v10 = vpop.permute.xlu1 %2167 }
 0x9b5   : > { %v1965_v29 = vrot.slane %v1729_v35, 2  ;;  %v2000_v48 = vsel %vm5379_vm5, %v1590_v31, %v4976_v21  ;;  %vm5381_vm14 = vmmov %vm5370_vm1  ;;  %v2061_v50 = vpop.permute.xlu0 %2060  ;;  %v2209_v31 = vshrl.u32 %v357_v8, 7 }
 0x9b6   : > { %v1964_v59 = vrot.slane %v1728_v58, 2  ;;  %vm5382_vm9 = vmmov %vm5380_vm6 }
 0x9b7   : > { %v2016_v54 = vsel %vm5381_vm14, %v2007_v16, %v1965_v29  ;;  %v2011_v42 = vsel %vm5382_vm9, %v2003_v6, %v1959_v23  ;;  %vm5383_vm10 = vmmov %vm5380_vm6  ;;  %v2210_v14 = vsub.s32 0, %v2209_v31 }
 0x9b8   : > { %v2005_v3 = vsel %vm5383_vm10, %v1994_v34, %v1956_v7  ;;  %vm5384_vm4 = vmmov %vm5380_vm6  ;;  %2092 = vmatprep.subr.bf16.mxu0 %v2016_v54  ;;  %v2022_v55 = vsel %vm5370_vm1, %v2011_v42, %v1967_v49 }
 0x9b9   : > { %v2009_v32 = vsel %vm5384_vm4, %v2000_v48, %v1958_v26  ;;  %vm5385_vm11 = vmmov %vm5370_vm1  ;;  %2133 = vmatprep.subr.bf16.mxu1 %v2022_v55  ;;  %v2206_v9 = vpop.permute.xlu0 %2205 }
 0x9ba   : > { %v2013_v2 = vsel %vm5385_vm11, %v2005_v3, %v1964_v59  ;;  %vm5386_vm3 = vmmov %vm5370_vm1  ;;  %v2211_v12 = vrot.slane %v2206_v9, %v2210_v14 }
 0x9bb   : > { %v2019_v21 = vsel %vm5386_vm3, %v2009_v32, %v1966_v39  ;;  %2093 = vmatpush1.bf16.msra.mxu0 %v2013_v2  ;;  %vm5388_vm13 = vmmov %vm5384_vm4 }
 0x9bc   : > { %2134 = vmatpush1.bf16.msra.mxu1 %v2019_v21  ;;  %vm5389_vm12 = vmmov %vm5384_vm4 }
 0x9bd   : > { %vm5390_vm8 = vmmov %vm5384_vm4 }
 0x9be   : > { %2370 = vmatmul.mubr.msk.bf16.vlgmr.msra.gmra.mxu0 %vm1294_vm7, %v2056_v30 }
 0x9bf   : > { %2372 = vmatmul.mubr.msk.bf16.vlgmr.msra.gmra.mxu1 %vm1294_vm7, %v2056_v30  ;;  %vm5387_vm7 = vmmov %vm5384_vm4 }
 0xa7e   : > { %v2112_v13 = vpop.f32.mrf.mxu0 }
 0xa7f   : > { %v2113_v11 = vadd.f32 %v2112_v13, %v2061_v50  ;;  %v2153_v43 = vpop.f32.mrf.mxu1 }
 0xa80   : > { %v2154_v60 = vadd.f32 %v2153_v43, %v2061_v50  ;;  %v2114_v38 = vpop.f32.mrf.mxu0 }
 0xa81   : > { %v2160_v47 = vmax.f32 %v2113_v11, 0.0  ;;  %v2115_v52 = vadd.f32 %v2114_v38, %v2061_v50  ;;  %v2155_v18 = vpop.f32.mrf.mxu1 }
 0xa82   : > { %v2162_v17 = vmax.f32 %v2154_v60, 0.0  ;;  %v2156_v15 = vadd.f32 %v2155_v18, %v2061_v50  ;;  %v2116_v41 = vpop.f32.mrf.mxu0 }
 0xa83   : > { %v2170_v62 = vmul.f32 %v2168_v10, %v2160_v47  ;;  %v2161_v24 = vmax.f32 %v2115_v52, 0.0  ;;  %v2157_v1 = vpop.f32.mrf.mxu1 }
 0xa84   : > { %v2172_v19 = vmul.f32 %v2168_v10, %v2162_v17  ;;  %v2163_v27 = vmax.f32 %v2156_v15, 0.0  ;;  %v2117_v45 = vpop.f32.mrf.mxu0 }
 0xa85   : > { %v2174_v26 = vsel %vm5387_vm7, %v2170_v62, 0.0  ;;  %v2171_v53 = vmul.f32 %v2168_v10, %v2161_v24  ;;  %v2158_v20 = vpop.f32.mrf.mxu1 }
 0xa86   : > { %v2175_v28 = vrot.slane %v2174_v26, 4  ;;  %v2188_v61 = vsel %vm5388_vm13, %v2172_v19, 0.0  ;;  %v2173_v56 = vmul.f32 %v2168_v10, %v2163_v27 }
 0xa87   : > { %v2189_v46 = vrot.slane %v2188_v61, 4  ;;  %v2181_v5 = vsel %vm5389_vm12, %v2171_v53, 0.0 }
 0xa88   : > { %v2176_v63 = vadd.f32 %v2175_v28, %v2174_v26  ;;  %v2182_v4 = vrot.slane %v2181_v5, 4  ;;  %v2195_v36 = vsel %vm5390_vm8, %v2173_v56, 0.0 }
 0xa89   : > { %v2190_v0 = vadd.f32 %v2189_v46, %v2188_v61  ;;  %v2196_v25 = vrot.slane %v2195_v36, 4 }
 0xa8a   : > { %v2177_v40 = vrot.slane %v2176_v63, 2  ;;  %v2183_v57 = vadd.f32 %v2182_v4, %v2181_v5 }
 0xa8b   : > { %v2191_v37 = vrot.slane %v2190_v0, 2  ;;  %v2197_v22 = vadd.f32 %v2196_v25, %v2195_v36 }
 0xa8c   : > { %v2178_v51 = vadd.f32 %v2177_v40, %v2176_v63  ;;  %v2184_v35 = vrot.slane %v2183_v57, 2 }
 0xa8d   : > { %v2192_v44 = vadd.f32 %v2191_v37, %v2190_v0  ;;  %v2198_v6 = vrot.slane %v2197_v22, 2 }
 0xa8e   : > { %v2179_v33 = vrot.slane %v2178_v51, 1  ;;  %v2185_v8 = vadd.f32 %v2184_v35, %v2183_v57 }
 0xa8f   : > { %v2193_v58 = vrot.slane %v2192_v44, 1  ;;  %v2199_v34 = vadd.f32 %v2198_v6, %v2197_v22 }
 0xa90   : > { %v2180_v7 = vadd.f32 %v2179_v33, %v2178_v51  ;;  %v2186_v29 = vrot.slane %v2185_v8, 1 }
 0xa91   : > { %v2194_v23 = vadd.f32 %v2193_v58, %v2192_v44  ;;  %v2200_v48 = vrot.slane %v2199_v34, 1 }
 0xa92   : > { %v2212_v16 = vadd.f32 %v2211_v12, %v2180_v7  ;;  %v2187_v49 = vadd.f32 %v2186_v29, %v2185_v8 }
 0xa93   : > { %v2214_v59 = vadd.f32 %v2211_v12, %v2194_v23  ;;  %v2201_v39 = vadd.f32 %v2200_v48, %v2199_v34 }
 0xa94   : > { %2216 = vst [vmem:[%s5077_s18] sm:$0xff] %v2212_v16  ;;  %2218 = vst [vmem:[%s5077_s18 + $0x10] sm:$0xff] %v2212_v16  ;;  %v2213_v54 = vadd.f32 %v2211_v12, %v2187_v49 }
 0xa95   : > { %2220 = vst [vmem:[%s5077_s18 + $0x20] sm:$0xff] %v2212_v16  ;;  %2222 = vst [vmem:[%s5077_s18 + $0x30] sm:$0xff] %v2212_v16  ;;  %v2215_v42 = vadd.f32 %v2211_v12, %v2201_v39 }
 0xa96   : > { %2224 = vst [vmem:[%s5077_s18 + $0x40] sm:$0xff] %v2212_v16  ;;  %2226 = vst [vmem:[%s5077_s18 + $0x50] sm:$0xff] %v2212_v16 }
 0xa97   : > { %2228 = vst [vmem:[%s5077_s18 + $0x60] sm:$0xff] %v2212_v16  ;;  %2230 = vst [vmem:[%s5077_s18 + $0x70] sm:$0xff] %v2212_v16 }
 0xa98   : > { %2373 = vst [vmem:[%s5077_s18 + $0x80] sm:$0xff] %v2214_v59  ;;  %2375 = vst [vmem:[%s5077_s18 + $0x90] sm:$0xff] %v2214_v59 }
 0xa99   : > { %2377 = vst [vmem:[%s5077_s18 + $0xa0] sm:$0xff] %v2214_v59  ;;  %2379 = vst [vmem:[%s5077_s18 + $0xb0] sm:$0xff] %v2214_v59 }
 0xa9a   : > { %2381 = vst [vmem:[%s5077_s18 + $0xc0] sm:$0xff] %v2214_v59  ;;  %2383 = vst [vmem:[%s5077_s18 + $0xd0] sm:$0xff] %v2214_v59 }
 0xa9b   : > { %2385 = vst [vmem:[%s5077_s18 + $0xe0] sm:$0xff] %v2214_v59  ;;  %2387 = vst [vmem:[%s5077_s18 + $0xf0] sm:$0xff] %v2214_v59 }
 0xa9c   : > { %2217 = vst [vmem:[%s5077_s18 + $0x8] sm:$0xff] %v2213_v54  ;;  %2219 = vst [vmem:[%s5077_s18 + $0x18] sm:$0xff] %v2213_v54 }
 0xa9d   : > { %2221 = vst [vmem:[%s5077_s18 + $0x28] sm:$0xff] %v2213_v54  ;;  %2223 = vst [vmem:[%s5077_s18 + $0x38] sm:$0xff] %v2213_v54 }
 0xa9e   : > { %2225 = vst [vmem:[%s5077_s18 + $0x48] sm:$0xff] %v2213_v54  ;;  %2227 = vst [vmem:[%s5077_s18 + $0x58] sm:$0xff] %v2213_v54 }
 0xa9f   : > { %2229 = vst [vmem:[%s5077_s18 + $0x68] sm:$0xff] %v2213_v54  ;;  %2231 = vst [vmem:[%s5077_s18 + $0x78] sm:$0xff] %v2213_v54 }
 0xaa0   : > { %2374 = vst [vmem:[%s5077_s18 + $0x88] sm:$0xff] %v2215_v42  ;;  %2376 = vst [vmem:[%s5077_s18 + $0x98] sm:$0xff] %v2215_v42 }
 0xaa1   : > { %2378 = vst [vmem:[%s5077_s18 + $0xa8] sm:$0xff] %v2215_v42  ;;  %2380 = vst [vmem:[%s5077_s18 + $0xb8] sm:$0xff] %v2215_v42 }
 0xaa2   : > { %2382 = vst [vmem:[%s5077_s18 + $0xc8] sm:$0xff] %v2215_v42  ;;  %2384 = vst [vmem:[%s5077_s18 + $0xd8] sm:$0xff] %v2215_v42 }
 0xaa3   : > { %2386 = vst [vmem:[%s5077_s18 + $0xe8] sm:$0xff] %v2215_v42  ;;  %2388 = vst [vmem:[%s5077_s18 + $0xf8] sm:$0xff] %v2215_v42 }
 0xaa4   : > { %3136 = shalt.err (!%p3133_p10)
}
 0xaa5   : > { %s3137_s17 = scalar_lea.hbm %s5091_s20, 4096  ;;  %s3141_s18 = scalar_lea.hbm %s5170_s9, 8192 }
 0xaa6   : > { %p3138_p0 = scmp.ne.s32.totalorder %s5091_s20, %s3137_s17  ;;  %p3142_p1 = scmp.lt.s32.totalorder %s5091_s20, %s5170_s9 }
 0xaa7   : > { %p3143_p3 = scmp.lt.s32.totalorder %s3141_s18, %s3137_s17 }
 0xaa8   : > { %p3139_p2 = pnand %p3138_p0, %p5391_p12 }
 0xaa9   : > { %p3144_p6 = por %p3143_p3, %p3142_p1 }
 0xaaa   : > { %p3140_p9 = pneg %p3139_p2 }
 0xaac   : > { %p3145_p11 = pnand %p3144_p6, %p3140_p9 }
 0xaae   : > { %3148 = shalt.err (!%p3145_p11)
}
 0xaaf   : > { %s3198_s21 = smov 256  }
 0xab0   : > { %2401 = dma.vmem_to_hbm [thread:$0]  (%p5391_p12), %s5101_s27, 4096, %s5091_s20, %s2250_s28, %s3198_s21, %s3198_s21, %s3194_s24  }
 0xab1 PF: > { %s2279_s29 = sand.u32 1, %s3175_s11   ;;  %p5392_p13 = scmp.ne.s32.totalorder %s5191_s23, 0 }
 0xab2   : > { %p5393_p4 = scmp.ge.s32.totalorder %s3187_s14, 2  ;;  %s2280_s10 = scalar_lea.sflag [#allocation5], %s2279_s29 }
 0xab4   : > { %p2408_p5 = pnand %p5393_p4, %p5392_p13 }
 0xab6   : > { %p2409_p7 = pneg %p2408_p5 }
 0xab8   : > { %3170 = dma.done.wait (%p2409_p7), %s2280_s10, 4096  }
 0xab9   : > { %3172 = vsyncadd (%p2409_p7), %s2280_s10, 4294963200  ;;  %s5394_s22 = sld [smem:[#allocation9_spill]]  ;;  %p24_p8 = scmp.ge.s32.totalorder %s3277_s16, 4  }
 0xaba   : > { %s5395_s11 = smov %s3179_s12  ;;  %s5396_s12 = smov %s3183_s13 }
 0xabb   : > { %s5398_s14 = smov %s3277_s16  ;;  %26 = sbr.rel (!%p24_p8) target bundleno = 8 (0x8), region = 103 }
 0xabf   : > { %s5397_s13 = smov %s5394_s22 }
 0xac0   :  { %2285 = vsyncpa [#allocation4], 1 }
 0xac1   :  { %2287 = vsyncpa [#allocation4 + $0x1], 1 }
 0xac2   :  { %2288 = vsyncpa [#allocation5], 1 }
 0xac3   :  { %2290 = vsyncpa [#allocation5 + $0x1], 1 }

</bundles_post_ra>
